<compile_context>
chip_gen: v7x
topology: tpu7x:2x2x1
jax: 0.10.0
libtpu: 0.0.40
codegen_flags: <defaults>
</compile_context>

<pallas_src>
import math
import functools

import numpy as np
import jax
import jax.numpy as jnp
from jax import lax
from jax.experimental import pallas as pl
from jax.experimental.pallas import tpu as pltpu  # noqa: F401  (TPU backend)


# ----------------------------------------------------------------------------
# In-kernel math helpers (pure jnp, traced inside the Pallas kernel)
# ----------------------------------------------------------------------------
def _erf_approx(x):
    """Abramowitz & Stegun 7.1.26 polynomial erf, |error| <= 1.5e-7 (f32-safe)."""
    ax = jnp.abs(x)
    t = 1.0 / (1.0 + 0.3275911 * ax)
    poly = t * (0.254829592
                + t * (-0.284496736
                       + t * (1.421413741
                              + t * (-1.453152027
                                     + t * 1.061405429))))
    y = 1.0 - poly * jnp.exp(-ax * ax)
    return jnp.where(x < 0, -y, y)


def _gelu(x):
    """Exact (erf-form) GELU, matching torch.nn.GELU() default."""
    return 0.5 * x * (1.0 + _erf_approx(x * (1.0 / math.sqrt(2.0))))


def _layer_norm(x, gamma, beta, eps):
    """torch.nn.LayerNorm over the last dim (biased variance, eps inside sqrt)."""
    mean = jnp.mean(x, axis=-1, keepdims=True)
    xc = x - mean
    var = jnp.mean(xc * xc, axis=-1, keepdims=True)
    return xc * lax.rsqrt(var + eps) * gamma + beta


# ----------------------------------------------------------------------------
# The fused kernel
# ----------------------------------------------------------------------------
def _policy_kernel(
    # activations
    time_ref, state_ref, img_ref,
    # sinusoidal embedding constants + time MLP weights
    freq_ref, w1s_ref, w1c_ref, b1_ref, w2_ref, b2_ref,
    # input projection (MLPBlock) weights
    pws_ref, pwi_ref, pb_ref, pg_ref, pbe_ref,
    # stacked per-layer MLPBlock weights
    lwx_ref, lwt_ref, lb_ref, lg_ref, lbe_ref,
    # output projection
    ow_ref, ob_ref,
    # output
    out_ref,
    *, num_layers: int, eps: float):
    f32 = jnp.float32

    # ---- SinusoidalPosEmb fused with the first time-MLP matmul -------------
    # e[b, j] = time[b] * exp(-scale * j), j in [0, half_dim)
    e = time_ref[...] * freq_ref[...]                      # (B, half)
    h = (jnp.dot(jnp.sin(e), w1s_ref[...], preferred_element_type=f32)
         + jnp.dot(jnp.cos(e), w1c_ref[...], preferred_element_type=f32)
         + b1_ref[...])
    h = _gelu(h)
    temb = jnp.dot(h, w2_ref[...], preferred_element_type=f32) + b2_ref[...]  # (B, T)

    # ---- input_projection: cat([state, img]) @ W == state@Ws + img@Wi ------
    x = (jnp.dot(state_ref[...], pws_ref[...], preferred_element_type=f32)
         + jnp.dot(img_ref[...], pwi_ref[...], preferred_element_type=f32)
         + pb_ref[...])
    x = _gelu(_layer_norm(x, pg_ref[...], pbe_ref[...], eps))

    # ---- trunk: num_layers x MLPBlock on cat([x, temb]) ---------------------
    for i in range(num_layers):                             # static unroll
        y = (jnp.dot(x, lwx_ref[i], preferred_element_type=f32)
             + jnp.dot(temb, lwt_ref[i], preferred_element_type=f32)
             + lb_ref[i])
        x = _gelu(_layer_norm(y, lg_ref[i], lbe_ref[i], eps))

    # ---- output_projection --------------------------------------------------
    out_ref[...] = jnp.dot(x, ow_ref[...], preferred_element_type=f32) + ob_ref[...]


# ----------------------------------------------------------------------------
# Host-side wrapper
# ----------------------------------------------------------------------------
def _half_freqs(dim: int) -> np.ndarray:
    """Host-precomputed (1, dim//2) frequency table exp(-log(1e4)/(half-1) * j)."""
    half = dim // 2
    denom = 1.0 if half <= 1 else float(half - 1)
    scale = 0.0 if denom == 0 else math.log(10000.0) / denom
    f = np.exp(np.arange(half, dtype=np.float32) * np.float32(-scale))
    return f.astype(np.float32).reshape(1, half)


def _full_spec(shape):
    nd = len(shape)
    return pl.BlockSpec(shape, lambda nd=nd: (0,) * nd)


def diffusion_policy_forward(state, timestep, image_features, params):
    """Pallas equivalent of DiffusionPolicyModel.forward given precomputed
    ResNet image features (B, image_feature_dim)."""
    state = state.astype(jnp.float32)
    image_features = image_features.astype(jnp.float32)
    b, s_dim = state.shape
    time2d = timestep.astype(jnp.float32).reshape(b, 1)

    t_dim = params["time_b2"].shape[-1]
    half = t_dim // 2
    freqs = jnp.asarray(_half_freqs(t_dim))                 # (1, half), constant

    # Split the first time-MLP weight so cat([sin, cos(, 0)]) @ W1 needs no concat.
    w1 = params["time_w1"]                                  # (t_dim, 4*t_dim)
    w1_sin = w1[:half, :]
    w1_cos = w1[half:2 * half, :]

    num_layers = params["layer_wx"].shape[0]
    eps = 1e-5                                              # torch LayerNorm default

    operands = (
        time2d, state, image_features,
        freqs, w1_sin, w1_cos, params["time_b1"], params["time_w2"], params["time_b2"],
        params["proj_ws"], params["proj_wi"], params["proj_b"],
        params["proj_g"], params["proj_beta"],
        params["layer_wx"], params["layer_wt"], params["layer_b"],
        params["layer_g"], params["layer_beta"],
        params["out_w"], params["out_b"],
    )

    kernel = functools.partial(_policy_kernel, num_layers=num_layers, eps=eps)
    return pl.pallas_call(
        kernel,
        out_shape=jax.ShapeDtypeStruct((b, s_dim), jnp.float32),
        # Small problem: single full-array VMEM block per operand, no grid.
        in_specs=[_full_spec(op.shape) for op in operands],
        out_specs=_full_spec((b, s_dim)),
    )(*operands)


# ----------------------------------------------------------------------------
# Pure-JAX reference mirroring the PyTorch forward (concat form, true erf)
# ----------------------------------------------------------------------------
def _reference_forward(state, timestep, image_features, params):
    P = jax.lax.Precision.HIGHEST
    t_dim = params["time_b2"].shape[-1]
    freqs = jnp.asarray(_half_freqs(t_dim))                 # (1, half)

    e = timestep.astype(jnp.float32)[:, None] * freqs       # (B, half)
    emb = jnp.concatenate([jnp.sin(e), jnp.cos(e)], axis=-1)
    if t_dim % 2 == 1:
        emb = jnp.pad(emb, ((0, 0), (0, 1)))

    def gelu(x):
        return 0.5 * x * (1.0 + jax.scipy.special.erf(x / math.sqrt(2.0)))

    def layer_norm(x, g, beta):
        m = jnp.mean(x, axis=-1, keepdims=True)
        v = jnp.mean((x - m) ** 2, axis=-1, keepdims=True)
        return (x - m) / jnp.sqrt(v + 1e-5) * g + beta

    h = gelu(jnp.dot(emb, params["time_w1"], precision=P) + params["time_b1"])
    temb = jnp.dot(h, params["time_w2"], precision=P) + params["time_b2"]

    w_in = jnp.concatenate([params["proj_ws"], params["proj_wi"]], axis=0)
    combined = jnp.concatenate([state, image_features], axis=-1)
    x = gelu(layer_norm(jnp.dot(combined, w_in, precision=P) + params["proj_b"],
                        params["proj_g"], params["proj_beta"]))

    num_layers = params["layer_wx"].shape[0]
    for i in range(num_layers):
        w = jnp.concatenate([params["layer_wx"][i], params["layer_wt"][i]], axis=0)
        inp = jnp.concatenate([x, temb], axis=-1)
        x = gelu(layer_norm(jnp.dot(inp, w, precision=P) + params["layer_b"][i],
                            params["layer_g"][i], params["layer_beta"][i]))

    return jnp.dot(x, params["out_w"], precision=P) + params["out_b"]


# ----------------------------------------------------------------------------
# Demo / self-check
# ----------------------------------------------------------------------------
if __name__ == "__main__":
    B, S, T, H, F, L = 2, 7, 64, 256, 512, 4   # batch, state, time_emb, hidden, img_feat, layers

    key = jax.random.PRNGKey(0)
    keys = jax.random.split(key, 24)

    def w(k, shape, fan_in):
        return (jax.random.normal(k, shape, jnp.float32) / math.sqrt(float(fan_in)))

    state = jax.random.normal(keys[0], (B, S), jnp.float32)
    timestep = jax.random.randint(keys[1], (B,), 0, 100).astype(jnp.float32)
    # TODO(synk): ResNet-34 backbone not translated; (B, 512) image features supplied directly.
    image_features = jax.random.normal(keys[2], (B, F), jnp.float32)

    params = {
        # time_mlp: Linear(T, 4T) -> GELU -> Linear(4T, T)
        "time_w1": w(keys[3], (T, 4 * T), T),
        "time_b1": 0.1 * jax.random.normal(keys[4], (1, 4 * T), jnp.float32),
        "time_w2": w(keys[5], (4 * T, T), 4 * T),
        "time_b2": 0.1 * jax.random.normal(keys[6], (1, T), jnp.float32),
        # input_projection: Linear(S + F, H) + LayerNorm(H), weight stored split
        "proj_ws": w(keys[7], (S, H), S + F),
        "proj_wi": w(keys[8], (F, H), S + F),
        "proj_b": 0.1 * jax.random.normal(keys[9], (1, H), jnp.float32),
        "proj_g": 1.0 + 0.1 * jax.random.normal(keys[10], (1, H), jnp.float32),
        "proj_beta": 0.1 * jax.random.normal(keys[11], (1, H), jnp.float32),
        # L x MLPBlock: Linear(H + T, H) + LayerNorm(H), weights stored split & stacked
        "layer_wx": w(keys[12], (L, H, H), H + T),
        "layer_wt": w(keys[13], (L, T, H), H + T),
        "layer_b": 0.1 * jax.random.normal(keys[14], (L, 1, H), jnp.float32),
        "layer_g": 1.0 + 0.1 * jax.random.normal(keys[15], (L, 1, H), jnp.float32),
        "layer_beta": 0.1 * jax.random.normal(keys[16], (L, 1, H), jnp.float32),
        # output_projection: Linear(H, S)
        "out_w": w(keys[17], (H, S), H),
        "out_b": 0.1 * jax.random.normal(keys[18], (1, S), jnp.float32),
    }

    out = diffusion_policy_forward(state, timestep, image_features, params)
    out = jax.block_until_ready(out)

    ref = _reference_forward(state, timestep, image_features, params)
    assert out.shape == (B, S), out.shape
    max_err = float(jnp.max(jnp.abs(out - ref)))
    # Tolerance covers the polynomial-erf GELU (<=1.5e-7), split-matmul summation
    # order, and ulp-level transcendental differences between Pallas and XLA.
    assert jnp.allclose(out, ref, atol=2e-3, rtol=2e-3), f"mismatch vs reference (max abs err {max_err})"

    print("KERNEL_OK")
</pallas_src>

<mosaic_0001>
module attributes {stable_mosaic.version = 11 : i64} {
  func.func @_policy_kernel(%arg0: memref<2x1xf32, #tpu.memory_space<vmem>>, %arg1: memref<2x7xf32, #tpu.memory_space<vmem>>, %arg2: memref<2x512xf32, #tpu.memory_space<vmem>>, %arg3: memref<1x32xf32, #tpu.memory_space<vmem>>, %arg4: memref<32x256xf32, #tpu.memory_space<vmem>>, %arg5: memref<32x256xf32, #tpu.memory_space<vmem>>, %arg6: memref<1x256xf32, #tpu.memory_space<vmem>>, %arg7: memref<256x64xf32, #tpu.memory_space<vmem>>, %arg8: memref<1x64xf32, #tpu.memory_space<vmem>>, %arg9: memref<7x256xf32, #tpu.memory_space<vmem>>, %arg10: memref<512x256xf32, #tpu.memory_space<vmem>>, %arg11: memref<1x256xf32, #tpu.memory_space<vmem>>, %arg12: memref<1x256xf32, #tpu.memory_space<vmem>>, %arg13: memref<1x256xf32, #tpu.memory_space<vmem>>, %arg14: memref<4x256x256xf32, #tpu.memory_space<vmem>>, %arg15: memref<4x64x256xf32, #tpu.memory_space<vmem>>, %arg16: memref<4x1x256xf32, #tpu.memory_space<vmem>>, %arg17: memref<4x1x256xf32, #tpu.memory_space<vmem>>, %arg18: memref<4x1x256xf32, #tpu.memory_space<vmem>>, %arg19: memref<256x7xf32, #tpu.memory_space<vmem>>, %arg20: memref<1x7xf32, #tpu.memory_space<vmem>>, %arg21: memref<2x7xf32, #tpu.memory_space<vmem>>) attributes {dimension_semantics = [], scalar_prefetch = 0 : i64, scratch_operands = 0 : i64, tpu.core_type = #tpu.core_type<tc>} {
    %c0 = arith.constant 0 : index
    %c0_0 = arith.constant 0 : index
    %0 = vector.load %arg0[%c0, %c0_0] : memref<2x1xf32, #tpu.memory_space<vmem>>, vector<2x1xf32>
    %c0_1 = arith.constant 0 : index
    %c0_2 = arith.constant 0 : index
    %1 = vector.load %arg3[%c0_1, %c0_2] : memref<1x32xf32, #tpu.memory_space<vmem>>, vector<1x32xf32>
    %2 = vector.broadcast %0 : vector<2x1xf32> to vector<2x32xf32>
    %3 = vector.broadcast %1 : vector<1x32xf32> to vector<2x32xf32>
    %4 = arith.mulf %2, %3 : vector<2x32xf32>
    %5 = math.sin %4 : vector<2x32xf32>
    %c0_3 = arith.constant 0 : index
    %c0_4 = arith.constant 0 : index
    %6 = vector.load %arg4[%c0_3, %c0_4] : memref<32x256xf32, #tpu.memory_space<vmem>>, vector<32x256xf32>
    %cst = arith.constant dense<0.000000e+00> : vector<2x256xf32>
    %7 = tpu.matmul %5, %6, %cst {dimension_numbers = #tpu.dot_dimension_numbers<[1], [0], [0], [1], [0, 0, 1, 1], [], []>} : vector<2x32xf32>, vector<32x256xf32>, vector<2x256xf32> -> vector<2x256xf32>
    %8 = math.cos %4 : vector<2x32xf32>
    %c0_5 = arith.constant 0 : index
    %c0_6 = arith.constant 0 : index
    %9 = vector.load %arg5[%c0_5, %c0_6] : memref<32x256xf32, #tpu.memory_space<vmem>>, vector<32x256xf32>
    %cst_7 = arith.constant dense<0.000000e+00> : vector<2x256xf32>
    %10 = tpu.matmul %8, %9, %cst_7 {dimension_numbers = #tpu.dot_dimension_numbers<[1], [0], [0], [1], [0, 0, 1, 1], [], []>} : vector<2x32xf32>, vector<32x256xf32>, vector<2x256xf32> -> vector<2x256xf32>
    %11 = arith.addf %7, %10 : vector<2x256xf32>
    %c0_8 = arith.constant 0 : index
    %c0_9 = arith.constant 0 : index
    %12 = vector.load %arg6[%c0_8, %c0_9] : memref<1x256xf32, #tpu.memory_space<vmem>>, vector<1x256xf32>
    %13 = vector.broadcast %12 : vector<1x256xf32> to vector<2x256xf32>
    %14 = arith.addf %11, %13 : vector<2x256xf32>
    %cst_10 = arith.constant 5.000000e-01 : f32
    %15 = vector.broadcast %cst_10 : f32 to vector<2x256xf32>
    %16 = arith.mulf %15, %14 : vector<2x256xf32>
    %cst_11 = arith.constant 0.707106769 : f32
    %17 = vector.broadcast %cst_11 : f32 to vector<2x256xf32>
    %18 = arith.mulf %14, %17 : vector<2x256xf32>
    %19 = math.absf %18 : vector<2x256xf32>
    %cst_12 = arith.constant 0.327591091 : f32
    %20 = vector.broadcast %cst_12 : f32 to vector<2x256xf32>
    %21 = arith.mulf %20, %19 : vector<2x256xf32>
    %cst_13 = arith.constant 1.000000e+00 : f32
    %22 = vector.broadcast %cst_13 : f32 to vector<2x256xf32>
    %23 = arith.addf %22, %21 : vector<2x256xf32>
    %cst_14 = arith.constant 1.000000e+00 : f32
    %24 = vector.broadcast %cst_14 : f32 to vector<2x256xf32>
    %25 = arith.divf %24, %23 : vector<2x256xf32>
    %cst_15 = arith.constant 1.06140542 : f32
    %26 = vector.broadcast %cst_15 : f32 to vector<2x256xf32>
    %27 = arith.mulf %25, %26 : vector<2x256xf32>
    %cst_16 = arith.constant -1.45315206 : f32
    %28 = vector.broadcast %cst_16 : f32 to vector<2x256xf32>
    %29 = arith.addf %28, %27 : vector<2x256xf32>
    %30 = arith.mulf %25, %29 : vector<2x256xf32>
    %cst_17 = arith.constant 1.42141378 : f32
    %31 = vector.broadcast %cst_17 : f32 to vector<2x256xf32>
    %32 = arith.addf %31, %30 : vector<2x256xf32>
    %33 = arith.mulf %25, %32 : vector<2x256xf32>
    %cst_18 = arith.constant -0.284496725 : f32
    %34 = vector.broadcast %cst_18 : f32 to vector<2x256xf32>
    %35 = arith.addf %34, %33 : vector<2x256xf32>
    %36 = arith.mulf %25, %35 : vector<2x256xf32>
    %cst_19 = arith.constant 0.254829586 : f32
    %37 = vector.broadcast %cst_19 : f32 to vector<2x256xf32>
    %38 = arith.addf %37, %36 : vector<2x256xf32>
    %39 = arith.mulf %25, %38 : vector<2x256xf32>
    %cst_20 = arith.constant 0.000000e+00 : f32
    %40 = vector.broadcast %cst_20 : f32 to vector<2x256xf32>
    %41 = arith.subf %40, %19 : vector<2x256xf32>
    %42 = arith.mulf %41, %19 : vector<2x256xf32>
    %43 = math.exp %42 : vector<2x256xf32>
    %44 = arith.mulf %39, %43 : vector<2x256xf32>
    %cst_21 = arith.constant 1.000000e+00 : f32
    %45 = vector.broadcast %cst_21 : f32 to vector<2x256xf32>
    %46 = arith.subf %45, %44 : vector<2x256xf32>
    %cst_22 = arith.constant 0.000000e+00 : f32
    %47 = vector.broadcast %cst_22 : f32 to vector<2x256xf32>
    %48 = arith.cmpf olt, %18, %47 : vector<2x256xf32>
    %cst_23 = arith.constant 0.000000e+00 : f32
    %49 = vector.broadcast %cst_23 : f32 to vector<2x256xf32>
    %50 = arith.subf %49, %46 : vector<2x256xf32>
    %51 = arith.select %48, %50, %46 : vector<2x256xi1>, vector<2x256xf32>
    %cst_24 = arith.constant 1.000000e+00 : f32
    %52 = vector.broadcast %cst_24 : f32 to vector<2x256xf32>
    %53 = arith.addf %52, %51 : vector<2x256xf32>
    %54 = arith.mulf %16, %53 : vector<2x256xf32>
    %c0_25 = arith.constant 0 : index
    %c0_26 = arith.constant 0 : index
    %55 = vector.load %arg7[%c0_25, %c0_26] : memref<256x64xf32, #tpu.memory_space<vmem>>, vector<256x64xf32>
    %cst_27 = arith.constant dense<0.000000e+00> : vector<2x64xf32>
    %56 = tpu.matmul %54, %55, %cst_27 {dimension_numbers = #tpu.dot_dimension_numbers<[1], [0], [0], [1], [0, 0, 1, 1], [], []>} : vector<2x256xf32>, vector<256x64xf32>, vector<2x64xf32> -> vector<2x64xf32>
    %c0_28 = arith.constant 0 : index
    %c0_29 = arith.constant 0 : index
    %57 = vector.load %arg8[%c0_28, %c0_29] : memref<1x64xf32, #tpu.memory_space<vmem>>, vector<1x64xf32>
    %58 = vector.broadcast %57 : vector<1x64xf32> to vector<2x64xf32>
    %59 = arith.addf %56, %58 : vector<2x64xf32>
    %c0_30 = arith.constant 0 : index
    %c0_31 = arith.constant 0 : index
    %60 = vector.load %arg1[%c0_30, %c0_31] : memref<2x7xf32, #tpu.memory_space<vmem>>, vector<2x7xf32>
    %c0_32 = arith.constant 0 : index
    %c0_33 = arith.constant 0 : index
    %61 = vector.load %arg9[%c0_32, %c0_33] : memref<7x256xf32, #tpu.memory_space<vmem>>, vector<7x256xf32>
    %cst_34 = arith.constant dense<0.000000e+00> : vector<2x256xf32>
    %62 = tpu.matmul %60, %61, %cst_34 {dimension_numbers = #tpu.dot_dimension_numbers<[1], [0], [0], [1], [0, 0, 1, 1], [], []>} : vector<2x7xf32>, vector<7x256xf32>, vector<2x256xf32> -> vector<2x256xf32>
    %c0_35 = arith.constant 0 : index
    %c0_36 = arith.constant 0 : index
    %63 = vector.load %arg2[%c0_35, %c0_36] : memref<2x512xf32, #tpu.memory_space<vmem>>, vector<2x512xf32>
    %c0_37 = arith.constant 0 : index
    %c0_38 = arith.constant 0 : index
    %64 = vector.load %arg10[%c0_37, %c0_38] : memref<512x256xf32, #tpu.memory_space<vmem>>, vector<512x256xf32>
    %cst_39 = arith.constant dense<0.000000e+00> : vector<2x256xf32>
    %65 = tpu.matmul %63, %64, %cst_39 {dimension_numbers = #tpu.dot_dimension_numbers<[1], [0], [0], [1], [0, 0, 1, 1], [], []>} : vector<2x512xf32>, vector<512x256xf32>, vector<2x256xf32> -> vector<2x256xf32>
    %66 = arith.addf %62, %65 : vector<2x256xf32>
    %c0_40 = arith.constant 0 : index
    %c0_41 = arith.constant 0 : index
    %67 = vector.load %arg11[%c0_40, %c0_41] : memref<1x256xf32, #tpu.memory_space<vmem>>, vector<1x256xf32>
    %68 = vector.broadcast %67 : vector<1x256xf32> to vector<2x256xf32>
    %69 = arith.addf %66, %68 : vector<2x256xf32>
    %c0_42 = arith.constant 0 : index
    %c0_43 = arith.constant 0 : index
    %70 = vector.load %arg12[%c0_42, %c0_43] : memref<1x256xf32, #tpu.memory_space<vmem>>, vector<1x256xf32>
    %c0_44 = arith.constant 0 : index
    %c0_45 = arith.constant 0 : index
    %71 = vector.load %arg13[%c0_44, %c0_45] : memref<1x256xf32, #tpu.memory_space<vmem>>, vector<1x256xf32>
    %cst_46 = arith.constant dense<0.000000e+00> : vector<2xf32>
    %72 = vector.multi_reduction <add>, %69, %cst_46 [1] : vector<2x256xf32> to vector<2xf32>
    %73 = vector.shape_cast %72 : vector<2xf32> to vector<2x1xf32>
    %cst_47 = arith.constant 2.560000e+02 : f32
    %74 = vector.broadcast %cst_47 : f32 to vector<2x1xf32>
    %75 = arith.divf %73, %74 : vector<2x1xf32>
    %76 = vector.broadcast %75 : vector<2x1xf32> to vector<2x256xf32>
    %77 = arith.subf %69, %76 : vector<2x256xf32>
    %78 = arith.mulf %77, %77 : vector<2x256xf32>
    %cst_48 = arith.constant dense<0.000000e+00> : vector<2xf32>
    %79 = vector.multi_reduction <add>, %78, %cst_48 [1] : vector<2x256xf32> to vector<2xf32>
    %80 = vector.shape_cast %79 : vector<2xf32> to vector<2x1xf32>
    %cst_49 = arith.constant 2.560000e+02 : f32
    %81 = vector.broadcast %cst_49 : f32 to vector<2x1xf32>
    %82 = arith.divf %80, %81 : vector<2x1xf32>
    %cst_50 = arith.constant 9.99999974E-6 : f32
    %83 = vector.broadcast %cst_50 : f32 to vector<2x1xf32>
    %84 = arith.addf %82, %83 : vector<2x1xf32>
    %85 = math.rsqrt %84 : vector<2x1xf32>
    %86 = vector.broadcast %85 : vector<2x1xf32> to vector<2x256xf32>
    %87 = arith.mulf %77, %86 : vector<2x256xf32>
    %88 = vector.broadcast %70 : vector<1x256xf32> to vector<2x256xf32>
    %89 = arith.mulf %87, %88 : vector<2x256xf32>
    %90 = vector.broadcast %71 : vector<1x256xf32> to vector<2x256xf32>
    %91 = arith.addf %89, %90 : vector<2x256xf32>
    %cst_51 = arith.constant 5.000000e-01 : f32
    %92 = vector.broadcast %cst_51 : f32 to vector<2x256xf32>
    %93 = arith.mulf %92, %91 : vector<2x256xf32>
    %cst_52 = arith.constant 0.707106769 : f32
    %94 = vector.broadcast %cst_52 : f32 to vector<2x256xf32>
    %95 = arith.mulf %91, %94 : vector<2x256xf32>
    %96 = math.absf %95 : vector<2x256xf32>
    %cst_53 = arith.constant 0.327591091 : f32
    %97 = vector.broadcast %cst_53 : f32 to vector<2x256xf32>
    %98 = arith.mulf %97, %96 : vector<2x256xf32>
    %cst_54 = arith.constant 1.000000e+00 : f32
    %99 = vector.broadcast %cst_54 : f32 to vector<2x256xf32>
    %100 = arith.addf %99, %98 : vector<2x256xf32>
    %cst_55 = arith.constant 1.000000e+00 : f32
    %101 = vector.broadcast %cst_55 : f32 to vector<2x256xf32>
    %102 = arith.divf %101, %100 : vector<2x256xf32>
    %cst_56 = arith.constant 1.06140542 : f32
    %103 = vector.broadcast %cst_56 : f32 to vector<2x256xf32>
    %104 = arith.mulf %102, %103 : vector<2x256xf32>
    %cst_57 = arith.constant -1.45315206 : f32
    %105 = vector.broadcast %cst_57 : f32 to vector<2x256xf32>
    %106 = arith.addf %105, %104 : vector<2x256xf32>
    %107 = arith.mulf %102, %106 : vector<2x256xf32>
    %cst_58 = arith.constant 1.42141378 : f32
    %108 = vector.broadcast %cst_58 : f32 to vector<2x256xf32>
    %109 = arith.addf %108, %107 : vector<2x256xf32>
    %110 = arith.mulf %102, %109 : vector<2x256xf32>
    %cst_59 = arith.constant -0.284496725 : f32
    %111 = vector.broadcast %cst_59 : f32 to vector<2x256xf32>
    %112 = arith.addf %111, %110 : vector<2x256xf32>
    %113 = arith.mulf %102, %112 : vector<2x256xf32>
    %cst_60 = arith.constant 0.254829586 : f32
    %114 = vector.broadcast %cst_60 : f32 to vector<2x256xf32>
    %115 = arith.addf %114, %113 : vector<2x256xf32>
    %116 = arith.mulf %102, %115 : vector<2x256xf32>
    %cst_61 = arith.constant 0.000000e+00 : f32
    %117 = vector.broadcast %cst_61 : f32 to vector<2x256xf32>
    %118 = arith.subf %117, %96 : vector<2x256xf32>
    %119 = arith.mulf %118, %96 : vector<2x256xf32>
    %120 = math.exp %119 : vector<2x256xf32>
    %121 = arith.mulf %116, %120 : vector<2x256xf32>
    %cst_62 = arith.constant 1.000000e+00 : f32
    %122 = vector.broadcast %cst_62 : f32 to vector<2x256xf32>
    %123 = arith.subf %122, %121 : vector<2x256xf32>
    %cst_63 = arith.constant 0.000000e+00 : f32
    %124 = vector.broadcast %cst_63 : f32 to vector<2x256xf32>
    %125 = arith.cmpf olt, %95, %124 : vector<2x256xf32>
    %cst_64 = arith.constant 0.000000e+00 : f32
    %126 = vector.broadcast %cst_64 : f32 to vector<2x256xf32>
    %127 = arith.subf %126, %123 : vector<2x256xf32>
    %128 = arith.select %125, %127, %123 : vector<2x256xi1>, vector<2x256xf32>
    %cst_65 = arith.constant 1.000000e+00 : f32
    %129 = vector.broadcast %cst_65 : f32 to vector<2x256xf32>
    %130 = arith.addf %129, %128 : vector<2x256xf32>
    %131 = arith.mulf %93, %130 : vector<2x256xf32>
    %c0_66 = arith.constant 0 : index
    %c0_67 = arith.constant 0 : index
    %c0_68 = arith.constant 0 : index
    %132 = vector.load %arg14[%c0_66, %c0_67, %c0_68] : memref<4x256x256xf32, #tpu.memory_space<vmem>>, vector<1x256x256xf32>
    %133 = vector.shape_cast %132 : vector<1x256x256xf32> to vector<256x256xf32>
    %cst_69 = arith.constant dense<0.000000e+00> : vector<2x256xf32>
    %134 = tpu.matmul %131, %133, %cst_69 {dimension_numbers = #tpu.dot_dimension_numbers<[1], [0], [0], [1], [0, 0, 1, 1], [], []>} : vector<2x256xf32>, vector<256x256xf32>, vector<2x256xf32> -> vector<2x256xf32>
    %c0_70 = arith.constant 0 : index
    %c0_71 = arith.constant 0 : index
    %c0_72 = arith.constant 0 : index
    %135 = vector.load %arg15[%c0_70, %c0_71, %c0_72] : memref<4x64x256xf32, #tpu.memory_space<vmem>>, vector<1x64x256xf32>
    %136 = vector.shape_cast %135 : vector<1x64x256xf32> to vector<64x256xf32>
    %cst_73 = arith.constant dense<0.000000e+00> : vector<2x256xf32>
    %137 = tpu.matmul %59, %136, %cst_73 {dimension_numbers = #tpu.dot_dimension_numbers<[1], [0], [0], [1], [0, 0, 1, 1], [], []>} : vector<2x64xf32>, vector<64x256xf32>, vector<2x256xf32> -> vector<2x256xf32>
    %138 = arith.addf %134, %137 : vector<2x256xf32>
    %c0_74 = arith.constant 0 : index
    %c0_75 = arith.constant 0 : index
    %c0_76 = arith.constant 0 : index
    %139 = vector.load %arg16[%c0_74, %c0_75, %c0_76] : memref<4x1x256xf32, #tpu.memory_space<vmem>>, vector<1x1x256xf32>
    %140 = vector.shape_cast %139 : vector<1x1x256xf32> to vector<1x256xf32>
    %141 = vector.broadcast %140 : vector<1x256xf32> to vector<2x256xf32>
    %142 = arith.addf %138, %141 : vector<2x256xf32>
    %c0_77 = arith.constant 0 : index
    %c0_78 = arith.constant 0 : index
    %c0_79 = arith.constant 0 : index
    %143 = vector.load %arg17[%c0_77, %c0_78, %c0_79] : memref<4x1x256xf32, #tpu.memory_space<vmem>>, vector<1x1x256xf32>
    %144 = vector.shape_cast %143 : vector<1x1x256xf32> to vector<1x256xf32>
    %c0_80 = arith.constant 0 : index
    %c0_81 = arith.constant 0 : index
    %c0_82 = arith.constant 0 : index
    %145 = vector.load %arg18[%c0_80, %c0_81, %c0_82] : memref<4x1x256xf32, #tpu.memory_space<vmem>>, vector<1x1x256xf32>
    %146 = vector.shape_cast %145 : vector<1x1x256xf32> to vector<1x256xf32>
    %cst_83 = arith.constant dense<0.000000e+00> : vector<2xf32>
    %147 = vector.multi_reduction <add>, %142, %cst_83 [1] : vector<2x256xf32> to vector<2xf32>
    %148 = vector.shape_cast %147 : vector<2xf32> to vector<2x1xf32>
    %cst_84 = arith.constant 2.560000e+02 : f32
    %149 = vector.broadcast %cst_84 : f32 to vector<2x1xf32>
    %150 = arith.divf %148, %149 : vector<2x1xf32>
    %151 = vector.broadcast %150 : vector<2x1xf32> to vector<2x256xf32>
    %152 = arith.subf %142, %151 : vector<2x256xf32>
    %153 = arith.mulf %152, %152 : vector<2x256xf32>
    %cst_85 = arith.constant dense<0.000000e+00> : vector<2xf32>
    %154 = vector.multi_reduction <add>, %153, %cst_85 [1] : vector<2x256xf32> to vector<2xf32>
    %155 = vector.shape_cast %154 : vector<2xf32> to vector<2x1xf32>
    %cst_86 = arith.constant 2.560000e+02 : f32
    %156 = vector.broadcast %cst_86 : f32 to vector<2x1xf32>
    %157 = arith.divf %155, %156 : vector<2x1xf32>
    %cst_87 = arith.constant 9.99999974E-6 : f32
    %158 = vector.broadcast %cst_87 : f32 to vector<2x1xf32>
    %159 = arith.addf %157, %158 : vector<2x1xf32>
    %160 = math.rsqrt %159 : vector<2x1xf32>
    %161 = vector.broadcast %160 : vector<2x1xf32> to vector<2x256xf32>
    %162 = arith.mulf %152, %161 : vector<2x256xf32>
    %163 = vector.broadcast %144 : vector<1x256xf32> to vector<2x256xf32>
    %164 = arith.mulf %162, %163 : vector<2x256xf32>
    %165 = vector.broadcast %146 : vector<1x256xf32> to vector<2x256xf32>
    %166 = arith.addf %164, %165 : vector<2x256xf32>
    %cst_88 = arith.constant 5.000000e-01 : f32
    %167 = vector.broadcast %cst_88 : f32 to vector<2x256xf32>
    %168 = arith.mulf %167, %166 : vector<2x256xf32>
    %cst_89 = arith.constant 0.707106769 : f32
    %169 = vector.broadcast %cst_89 : f32 to vector<2x256xf32>
    %170 = arith.mulf %166, %169 : vector<2x256xf32>
    %171 = math.absf %170 : vector<2x256xf32>
    %cst_90 = arith.constant 0.327591091 : f32
    %172 = vector.broadcast %cst_90 : f32 to vector<2x256xf32>
    %173 = arith.mulf %172, %171 : vector<2x256xf32>
    %cst_91 = arith.constant 1.000000e+00 : f32
    %174 = vector.broadcast %cst_91 : f32 to vector<2x256xf32>
    %175 = arith.addf %174, %173 : vector<2x256xf32>
    %cst_92 = arith.constant 1.000000e+00 : f32
    %176 = vector.broadcast %cst_92 : f32 to vector<2x256xf32>
    %177 = arith.divf %176, %175 : vector<2x256xf32>
    %cst_93 = arith.constant 1.06140542 : f32
    %178 = vector.broadcast %cst_93 : f32 to vector<2x256xf32>
    %179 = arith.mulf %177, %178 : vector<2x256xf32>
    %cst_94 = arith.constant -1.45315206 : f32
    %180 = vector.broadcast %cst_94 : f32 to vector<2x256xf32>
    %181 = arith.addf %180, %179 : vector<2x256xf32>
    %182 = arith.mulf %177, %181 : vector<2x256xf32>
    %cst_95 = arith.constant 1.42141378 : f32
    %183 = vector.broadcast %cst_95 : f32 to vector<2x256xf32>
    %184 = arith.addf %183, %182 : vector<2x256xf32>
    %185 = arith.mulf %177, %184 : vector<2x256xf32>
    %cst_96 = arith.constant -0.284496725 : f32
    %186 = vector.broadcast %cst_96 : f32 to vector<2x256xf32>
    %187 = arith.addf %186, %185 : vector<2x256xf32>
    %188 = arith.mulf %177, %187 : vector<2x256xf32>
    %cst_97 = arith.constant 0.254829586 : f32
    %189 = vector.broadcast %cst_97 : f32 to vector<2x256xf32>
    %190 = arith.addf %189, %188 : vector<2x256xf32>
    %191 = arith.mulf %177, %190 : vector<2x256xf32>
    %cst_98 = arith.constant 0.000000e+00 : f32
    %192 = vector.broadcast %cst_98 : f32 to vector<2x256xf32>
    %193 = arith.subf %192, %171 : vector<2x256xf32>
    %194 = arith.mulf %193, %171 : vector<2x256xf32>
    %195 = math.exp %194 : vector<2x256xf32>
    %196 = arith.mulf %191, %195 : vector<2x256xf32>
    %cst_99 = arith.constant 1.000000e+00 : f32
    %197 = vector.broadcast %cst_99 : f32 to vector<2x256xf32>
    %198 = arith.subf %197, %196 : vector<2x256xf32>
    %cst_100 = arith.constant 0.000000e+00 : f32
    %199 = vector.broadcast %cst_100 : f32 to vector<2x256xf32>
    %200 = arith.cmpf olt, %170, %199 : vector<2x256xf32>
    %cst_101 = arith.constant 0.000000e+00 : f32
    %201 = vector.broadcast %cst_101 : f32 to vector<2x256xf32>
    %202 = arith.subf %201, %198 : vector<2x256xf32>
    %203 = arith.select %200, %202, %198 : vector<2x256xi1>, vector<2x256xf32>
    %cst_102 = arith.constant 1.000000e+00 : f32
    %204 = vector.broadcast %cst_102 : f32 to vector<2x256xf32>
    %205 = arith.addf %204, %203 : vector<2x256xf32>
    %206 = arith.mulf %168, %205 : vector<2x256xf32>
    %c1 = arith.constant 1 : index
    %c0_103 = arith.constant 0 : index
    %c0_104 = arith.constant 0 : index
    %207 = vector.load %arg14[%c1, %c0_103, %c0_104] : memref<4x256x256xf32, #tpu.memory_space<vmem>>, vector<1x256x256xf32>
    %208 = vector.shape_cast %207 : vector<1x256x256xf32> to vector<256x256xf32>
    %cst_105 = arith.constant dense<0.000000e+00> : vector<2x256xf32>
    %209 = tpu.matmul %206, %208, %cst_105 {dimension_numbers = #tpu.dot_dimension_numbers<[1], [0], [0], [1], [0, 0, 1, 1], [], []>} : vector<2x256xf32>, vector<256x256xf32>, vector<2x256xf32> -> vector<2x256xf32>
    %c1_106 = arith.constant 1 : index
    %c0_107 = arith.constant 0 : index
    %c0_108 = arith.constant 0 : index
    %210 = vector.load %arg15[%c1_106, %c0_107, %c0_108] : memref<4x64x256xf32, #tpu.memory_space<vmem>>, vector<1x64x256xf32>
    %211 = vector.shape_cast %210 : vector<1x64x256xf32> to vector<64x256xf32>
    %cst_109 = arith.constant dense<0.000000e+00> : vector<2x256xf32>
    %212 = tpu.matmul %59, %211, %cst_109 {dimension_numbers = #tpu.dot_dimension_numbers<[1], [0], [0], [1], [0, 0, 1, 1], [], []>} : vector<2x64xf32>, vector<64x256xf32>, vector<2x256xf32> -> vector<2x256xf32>
    %213 = arith.addf %209, %212 : vector<2x256xf32>
    %c1_110 = arith.constant 1 : index
    %c0_111 = arith.constant 0 : index
    %c0_112 = arith.constant 0 : index
    %214 = vector.load %arg16[%c1_110, %c0_111, %c0_112] : memref<4x1x256xf32, #tpu.memory_space<vmem>>, vector<1x1x256xf32>
    %215 = vector.shape_cast %214 : vector<1x1x256xf32> to vector<1x256xf32>
    %216 = vector.broadcast %215 : vector<1x256xf32> to vector<2x256xf32>
    %217 = arith.addf %213, %216 : vector<2x256xf32>
    %c1_113 = arith.constant 1 : index
    %c0_114 = arith.constant 0 : index
    %c0_115 = arith.constant 0 : index
    %218 = vector.load %arg17[%c1_113, %c0_114, %c0_115] : memref<4x1x256xf32, #tpu.memory_space<vmem>>, vector<1x1x256xf32>
    %219 = vector.shape_cast %218 : vector<1x1x256xf32> to vector<1x256xf32>
    %c1_116 = arith.constant 1 : index
    %c0_117 = arith.constant 0 : index
    %c0_118 = arith.constant 0 : index
    %220 = vector.load %arg18[%c1_116, %c0_117, %c0_118] : memref<4x1x256xf32, #tpu.memory_space<vmem>>, vector<1x1x256xf32>
    %221 = vector.shape_cast %220 : vector<1x1x256xf32> to vector<1x256xf32>
    %cst_119 = arith.constant dense<0.000000e+00> : vector<2xf32>
    %222 = vector.multi_reduction <add>, %217, %cst_119 [1] : vector<2x256xf32> to vector<2xf32>
    %223 = vector.shape_cast %222 : vector<2xf32> to vector<2x1xf32>
    %cst_120 = arith.constant 2.560000e+02 : f32
    %224 = vector.broadcast %cst_120 : f32 to vector<2x1xf32>
    %225 = arith.divf %223, %224 : vector<2x1xf32>
    %226 = vector.broadcast %225 : vector<2x1xf32> to vector<2x256xf32>
    %227 = arith.subf %217, %226 : vector<2x256xf32>
    %228 = arith.mulf %227, %227 : vector<2x256xf32>
    %cst_121 = arith.constant dense<0.000000e+00> : vector<2xf32>
    %229 = vector.multi_reduction <add>, %228, %cst_121 [1] : vector<2x256xf32> to vector<2xf32>
    %230 = vector.shape_cast %229 : vector<2xf32> to vector<2x1xf32>
    %cst_122 = arith.constant 2.560000e+02 : f32
    %231 = vector.broadcast %cst_122 : f32 to vector<2x1xf32>
    %232 = arith.divf %230, %231 : vector<2x1xf32>
    %cst_123 = arith.constant 9.99999974E-6 : f32
    %233 = vector.broadcast %cst_123 : f32 to vector<2x1xf32>
    %234 = arith.addf %232, %233 : vector<2x1xf32>
    %235 = math.rsqrt %234 : vector<2x1xf32>
    %236 = vector.broadcast %235 : vector<2x1xf32> to vector<2x256xf32>
    %237 = arith.mulf %227, %236 : vector<2x256xf32>
    %238 = vector.broadcast %219 : vector<1x256xf32> to vector<2x256xf32>
    %239 = arith.mulf %237, %238 : vector<2x256xf32>
    %240 = vector.broadcast %221 : vector<1x256xf32> to vector<2x256xf32>
    %241 = arith.addf %239, %240 : vector<2x256xf32>
    %cst_124 = arith.constant 5.000000e-01 : f32
    %242 = vector.broadcast %cst_124 : f32 to vector<2x256xf32>
    %243 = arith.mulf %242, %241 : vector<2x256xf32>
    %cst_125 = arith.constant 0.707106769 : f32
    %244 = vector.broadcast %cst_125 : f32 to vector<2x256xf32>
    %245 = arith.mulf %241, %244 : vector<2x256xf32>
    %246 = math.absf %245 : vector<2x256xf32>
    %cst_126 = arith.constant 0.327591091 : f32
    %247 = vector.broadcast %cst_126 : f32 to vector<2x256xf32>
    %248 = arith.mulf %247, %246 : vector<2x256xf32>
    %cst_127 = arith.constant 1.000000e+00 : f32
    %249 = vector.broadcast %cst_127 : f32 to vector<2x256xf32>
    %250 = arith.addf %249, %248 : vector<2x256xf32>
    %cst_128 = arith.constant 1.000000e+00 : f32
    %251 = vector.broadcast %cst_128 : f32 to vector<2x256xf32>
    %252 = arith.divf %251, %250 : vector<2x256xf32>
    %cst_129 = arith.constant 1.06140542 : f32
    %253 = vector.broadcast %cst_129 : f32 to vector<2x256xf32>
    %254 = arith.mulf %252, %253 : vector<2x256xf32>
    %cst_130 = arith.constant -1.45315206 : f32
    %255 = vector.broadcast %cst_130 : f32 to vector<2x256xf32>
    %256 = arith.addf %255, %254 : vector<2x256xf32>
    %257 = arith.mulf %252, %256 : vector<2x256xf32>
    %cst_131 = arith.constant 1.42141378 : f32
    %258 = vector.broadcast %cst_131 : f32 to vector<2x256xf32>
    %259 = arith.addf %258, %257 : vector<2x256xf32>
    %260 = arith.mulf %252, %259 : vector<2x256xf32>
    %cst_132 = arith.constant -0.284496725 : f32
    %261 = vector.broadcast %cst_132 : f32 to vector<2x256xf32>
    %262 = arith.addf %261, %260 : vector<2x256xf32>
    %263 = arith.mulf %252, %262 : vector<2x256xf32>
    %cst_133 = arith.constant 0.254829586 : f32
    %264 = vector.broadcast %cst_133 : f32 to vector<2x256xf32>
    %265 = arith.addf %264, %263 : vector<2x256xf32>
    %266 = arith.mulf %252, %265 : vector<2x256xf32>
    %cst_134 = arith.constant 0.000000e+00 : f32
    %267 = vector.broadcast %cst_134 : f32 to vector<2x256xf32>
    %268 = arith.subf %267, %246 : vector<2x256xf32>
    %269 = arith.mulf %268, %246 : vector<2x256xf32>
    %270 = math.exp %269 : vector<2x256xf32>
    %271 = arith.mulf %266, %270 : vector<2x256xf32>
    %cst_135 = arith.constant 1.000000e+00 : f32
    %272 = vector.broadcast %cst_135 : f32 to vector<2x256xf32>
    %273 = arith.subf %272, %271 : vector<2x256xf32>
    %cst_136 = arith.constant 0.000000e+00 : f32
    %274 = vector.broadcast %cst_136 : f32 to vector<2x256xf32>
    %275 = arith.cmpf olt, %245, %274 : vector<2x256xf32>
    %cst_137 = arith.constant 0.000000e+00 : f32
    %276 = vector.broadcast %cst_137 : f32 to vector<2x256xf32>
    %277 = arith.subf %276, %273 : vector<2x256xf32>
    %278 = arith.select %275, %277, %273 : vector<2x256xi1>, vector<2x256xf32>
    %cst_138 = arith.constant 1.000000e+00 : f32
    %279 = vector.broadcast %cst_138 : f32 to vector<2x256xf32>
    %280 = arith.addf %279, %278 : vector<2x256xf32>
    %281 = arith.mulf %243, %280 : vector<2x256xf32>
    %c2 = arith.constant 2 : index
    %c0_139 = arith.constant 0 : index
    %c0_140 = arith.constant 0 : index
    %282 = vector.load %arg14[%c2, %c0_139, %c0_140] : memref<4x256x256xf32, #tpu.memory_space<vmem>>, vector<1x256x256xf32>
    %283 = vector.shape_cast %282 : vector<1x256x256xf32> to vector<256x256xf32>
    %cst_141 = arith.constant dense<0.000000e+00> : vector<2x256xf32>
    %284 = tpu.matmul %281, %283, %cst_141 {dimension_numbers = #tpu.dot_dimension_numbers<[1], [0], [0], [1], [0, 0, 1, 1], [], []>} : vector<2x256xf32>, vector<256x256xf32>, vector<2x256xf32> -> vector<2x256xf32>
    %c2_142 = arith.constant 2 : index
    %c0_143 = arith.constant 0 : index
    %c0_144 = arith.constant 0 : index
    %285 = vector.load %arg15[%c2_142, %c0_143, %c0_144] : memref<4x64x256xf32, #tpu.memory_space<vmem>>, vector<1x64x256xf32>
    %286 = vector.shape_cast %285 : vector<1x64x256xf32> to vector<64x256xf32>
    %cst_145 = arith.constant dense<0.000000e+00> : vector<2x256xf32>
    %287 = tpu.matmul %59, %286, %cst_145 {dimension_numbers = #tpu.dot_dimension_numbers<[1], [0], [0], [1], [0, 0, 1, 1], [], []>} : vector<2x64xf32>, vector<64x256xf32>, vector<2x256xf32> -> vector<2x256xf32>
    %288 = arith.addf %284, %287 : vector<2x256xf32>
    %c2_146 = arith.constant 2 : index
    %c0_147 = arith.constant 0 : index
    %c0_148 = arith.constant 0 : index
    %289 = vector.load %arg16[%c2_146, %c0_147, %c0_148] : memref<4x1x256xf32, #tpu.memory_space<vmem>>, vector<1x1x256xf32>
    %290 = vector.shape_cast %289 : vector<1x1x256xf32> to vector<1x256xf32>
    %291 = vector.broadcast %290 : vector<1x256xf32> to vector<2x256xf32>
    %292 = arith.addf %288, %291 : vector<2x256xf32>
    %c2_149 = arith.constant 2 : index
    %c0_150 = arith.constant 0 : index
    %c0_151 = arith.constant 0 : index
    %293 = vector.load %arg17[%c2_149, %c0_150, %c0_151] : memref<4x1x256xf32, #tpu.memory_space<vmem>>, vector<1x1x256xf32>
    %294 = vector.shape_cast %293 : vector<1x1x256xf32> to vector<1x256xf32>
    %c2_152 = arith.constant 2 : index
    %c0_153 = arith.constant 0 : index
    %c0_154 = arith.constant 0 : index
    %295 = vector.load %arg18[%c2_152, %c0_153, %c0_154] : memref<4x1x256xf32, #tpu.memory_space<vmem>>, vector<1x1x256xf32>
    %296 = vector.shape_cast %295 : vector<1x1x256xf32> to vector<1x256xf32>
    %cst_155 = arith.constant dense<0.000000e+00> : vector<2xf32>
    %297 = vector.multi_reduction <add>, %292, %cst_155 [1] : vector<2x256xf32> to vector<2xf32>
    %298 = vector.shape_cast %297 : vector<2xf32> to vector<2x1xf32>
    %cst_156 = arith.constant 2.560000e+02 : f32
    %299 = vector.broadcast %cst_156 : f32 to vector<2x1xf32>
    %300 = arith.divf %298, %299 : vector<2x1xf32>
    %301 = vector.broadcast %300 : vector<2x1xf32> to vector<2x256xf32>
    %302 = arith.subf %292, %301 : vector<2x256xf32>
    %303 = arith.mulf %302, %302 : vector<2x256xf32>
    %cst_157 = arith.constant dense<0.000000e+00> : vector<2xf32>
    %304 = vector.multi_reduction <add>, %303, %cst_157 [1] : vector<2x256xf32> to vector<2xf32>
    %305 = vector.shape_cast %304 : vector<2xf32> to vector<2x1xf32>
    %cst_158 = arith.constant 2.560000e+02 : f32
    %306 = vector.broadcast %cst_158 : f32 to vector<2x1xf32>
    %307 = arith.divf %305, %306 : vector<2x1xf32>
    %cst_159 = arith.constant 9.99999974E-6 : f32
    %308 = vector.broadcast %cst_159 : f32 to vector<2x1xf32>
    %309 = arith.addf %307, %308 : vector<2x1xf32>
    %310 = math.rsqrt %309 : vector<2x1xf32>
    %311 = vector.broadcast %310 : vector<2x1xf32> to vector<2x256xf32>
    %312 = arith.mulf %302, %311 : vector<2x256xf32>
    %313 = vector.broadcast %294 : vector<1x256xf32> to vector<2x256xf32>
    %314 = arith.mulf %312, %313 : vector<2x256xf32>
    %315 = vector.broadcast %296 : vector<1x256xf32> to vector<2x256xf32>
    %316 = arith.addf %314, %315 : vector<2x256xf32>
    %cst_160 = arith.constant 5.000000e-01 : f32
    %317 = vector.broadcast %cst_160 : f32 to vector<2x256xf32>
    %318 = arith.mulf %317, %316 : vector<2x256xf32>
    %cst_161 = arith.constant 0.707106769 : f32
    %319 = vector.broadcast %cst_161 : f32 to vector<2x256xf32>
    %320 = arith.mulf %316, %319 : vector<2x256xf32>
    %321 = math.absf %320 : vector<2x256xf32>
    %cst_162 = arith.constant 0.327591091 : f32
    %322 = vector.broadcast %cst_162 : f32 to vector<2x256xf32>
    %323 = arith.mulf %322, %321 : vector<2x256xf32>
    %cst_163 = arith.constant 1.000000e+00 : f32
    %324 = vector.broadcast %cst_163 : f32 to vector<2x256xf32>
    %325 = arith.addf %324, %323 : vector<2x256xf32>
    %cst_164 = arith.constant 1.000000e+00 : f32
    %326 = vector.broadcast %cst_164 : f32 to vector<2x256xf32>
    %327 = arith.divf %326, %325 : vector<2x256xf32>
    %cst_165 = arith.constant 1.06140542 : f32
    %328 = vector.broadcast %cst_165 : f32 to vector<2x256xf32>
    %329 = arith.mulf %327, %328 : vector<2x256xf32>
    %cst_166 = arith.constant -1.45315206 : f32
    %330 = vector.broadcast %cst_166 : f32 to vector<2x256xf32>
    %331 = arith.addf %330, %329 : vector<2x256xf32>
    %332 = arith.mulf %327, %331 : vector<2x256xf32>
    %cst_167 = arith.constant 1.42141378 : f32
    %333 = vector.broadcast %cst_167 : f32 to vector<2x256xf32>
    %334 = arith.addf %333, %332 : vector<2x256xf32>
    %335 = arith.mulf %327, %334 : vector<2x256xf32>
    %cst_168 = arith.constant -0.284496725 : f32
    %336 = vector.broadcast %cst_168 : f32 to vector<2x256xf32>
    %337 = arith.addf %336, %335 : vector<2x256xf32>
    %338 = arith.mulf %327, %337 : vector<2x256xf32>
    %cst_169 = arith.constant 0.254829586 : f32
    %339 = vector.broadcast %cst_169 : f32 to vector<2x256xf32>
    %340 = arith.addf %339, %338 : vector<2x256xf32>
    %341 = arith.mulf %327, %340 : vector<2x256xf32>
    %cst_170 = arith.constant 0.000000e+00 : f32
    %342 = vector.broadcast %cst_170 : f32 to vector<2x256xf32>
    %343 = arith.subf %342, %321 : vector<2x256xf32>
    %344 = arith.mulf %343, %321 : vector<2x256xf32>
    %345 = math.exp %344 : vector<2x256xf32>
    %346 = arith.mulf %341, %345 : vector<2x256xf32>
    %cst_171 = arith.constant 1.000000e+00 : f32
    %347 = vector.broadcast %cst_171 : f32 to vector<2x256xf32>
    %348 = arith.subf %347, %346 : vector<2x256xf32>
    %cst_172 = arith.constant 0.000000e+00 : f32
    %349 = vector.broadcast %cst_172 : f32 to vector<2x256xf32>
    %350 = arith.cmpf olt, %320, %349 : vector<2x256xf32>
    %cst_173 = arith.constant 0.000000e+00 : f32
    %351 = vector.broadcast %cst_173 : f32 to vector<2x256xf32>
    %352 = arith.subf %351, %348 : vector<2x256xf32>
    %353 = arith.select %350, %352, %348 : vector<2x256xi1>, vector<2x256xf32>
    %cst_174 = arith.constant 1.000000e+00 : f32
    %354 = vector.broadcast %cst_174 : f32 to vector<2x256xf32>
    %355 = arith.addf %354, %353 : vector<2x256xf32>
    %356 = arith.mulf %318, %355 : vector<2x256xf32>
    %c3 = arith.constant 3 : index
    %c0_175 = arith.constant 0 : index
    %c0_176 = arith.constant 0 : index
    %357 = vector.load %arg14[%c3, %c0_175, %c0_176] : memref<4x256x256xf32, #tpu.memory_space<vmem>>, vector<1x256x256xf32>
    %358 = vector.shape_cast %357 : vector<1x256x256xf32> to vector<256x256xf32>
    %cst_177 = arith.constant dense<0.000000e+00> : vector<2x256xf32>
    %359 = tpu.matmul %356, %358, %cst_177 {dimension_numbers = #tpu.dot_dimension_numbers<[1], [0], [0], [1], [0, 0, 1, 1], [], []>} : vector<2x256xf32>, vector<256x256xf32>, vector<2x256xf32> -> vector<2x256xf32>
    %c3_178 = arith.constant 3 : index
    %c0_179 = arith.constant 0 : index
    %c0_180 = arith.constant 0 : index
    %360 = vector.load %arg15[%c3_178, %c0_179, %c0_180] : memref<4x64x256xf32, #tpu.memory_space<vmem>>, vector<1x64x256xf32>
    %361 = vector.shape_cast %360 : vector<1x64x256xf32> to vector<64x256xf32>
    %cst_181 = arith.constant dense<0.000000e+00> : vector<2x256xf32>
    %362 = tpu.matmul %59, %361, %cst_181 {dimension_numbers = #tpu.dot_dimension_numbers<[1], [0], [0], [1], [0, 0, 1, 1], [], []>} : vector<2x64xf32>, vector<64x256xf32>, vector<2x256xf32> -> vector<2x256xf32>
    %363 = arith.addf %359, %362 : vector<2x256xf32>
    %c3_182 = arith.constant 3 : index
    %c0_183 = arith.constant 0 : index
    %c0_184 = arith.constant 0 : index
    %364 = vector.load %arg16[%c3_182, %c0_183, %c0_184] : memref<4x1x256xf32, #tpu.memory_space<vmem>>, vector<1x1x256xf32>
    %365 = vector.shape_cast %364 : vector<1x1x256xf32> to vector<1x256xf32>
    %366 = vector.broadcast %365 : vector<1x256xf32> to vector<2x256xf32>
    %367 = arith.addf %363, %366 : vector<2x256xf32>
    %c3_185 = arith.constant 3 : index
    %c0_186 = arith.constant 0 : index
    %c0_187 = arith.constant 0 : index
    %368 = vector.load %arg17[%c3_185, %c0_186, %c0_187] : memref<4x1x256xf32, #tpu.memory_space<vmem>>, vector<1x1x256xf32>
    %369 = vector.shape_cast %368 : vector<1x1x256xf32> to vector<1x256xf32>
    %c3_188 = arith.constant 3 : index
    %c0_189 = arith.constant 0 : index
    %c0_190 = arith.constant 0 : index
    %370 = vector.load %arg18[%c3_188, %c0_189, %c0_190] : memref<4x1x256xf32, #tpu.memory_space<vmem>>, vector<1x1x256xf32>
    %371 = vector.shape_cast %370 : vector<1x1x256xf32> to vector<1x256xf32>
    %cst_191 = arith.constant dense<0.000000e+00> : vector<2xf32>
    %372 = vector.multi_reduction <add>, %367, %cst_191 [1] : vector<2x256xf32> to vector<2xf32>
    %373 = vector.shape_cast %372 : vector<2xf32> to vector<2x1xf32>
    %cst_192 = arith.constant 2.560000e+02 : f32
    %374 = vector.broadcast %cst_192 : f32 to vector<2x1xf32>
    %375 = arith.divf %373, %374 : vector<2x1xf32>
    %376 = vector.broadcast %375 : vector<2x1xf32> to vector<2x256xf32>
    %377 = arith.subf %367, %376 : vector<2x256xf32>
    %378 = arith.mulf %377, %377 : vector<2x256xf32>
    %cst_193 = arith.constant dense<0.000000e+00> : vector<2xf32>
    %379 = vector.multi_reduction <add>, %378, %cst_193 [1] : vector<2x256xf32> to vector<2xf32>
    %380 = vector.shape_cast %379 : vector<2xf32> to vector<2x1xf32>
    %cst_194 = arith.constant 2.560000e+02 : f32
    %381 = vector.broadcast %cst_194 : f32 to vector<2x1xf32>
    %382 = arith.divf %380, %381 : vector<2x1xf32>
    %cst_195 = arith.constant 9.99999974E-6 : f32
    %383 = vector.broadcast %cst_195 : f32 to vector<2x1xf32>
    %384 = arith.addf %382, %383 : vector<2x1xf32>
    %385 = math.rsqrt %384 : vector<2x1xf32>
    %386 = vector.broadcast %385 : vector<2x1xf32> to vector<2x256xf32>
    %387 = arith.mulf %377, %386 : vector<2x256xf32>
    %388 = vector.broadcast %369 : vector<1x256xf32> to vector<2x256xf32>
    %389 = arith.mulf %387, %388 : vector<2x256xf32>
    %390 = vector.broadcast %371 : vector<1x256xf32> to vector<2x256xf32>
    %391 = arith.addf %389, %390 : vector<2x256xf32>
    %cst_196 = arith.constant 5.000000e-01 : f32
    %392 = vector.broadcast %cst_196 : f32 to vector<2x256xf32>
    %393 = arith.mulf %392, %391 : vector<2x256xf32>
    %cst_197 = arith.constant 0.707106769 : f32
    %394 = vector.broadcast %cst_197 : f32 to vector<2x256xf32>
    %395 = arith.mulf %391, %394 : vector<2x256xf32>
    %396 = math.absf %395 : vector<2x256xf32>
    %cst_198 = arith.constant 0.327591091 : f32
    %397 = vector.broadcast %cst_198 : f32 to vector<2x256xf32>
    %398 = arith.mulf %397, %396 : vector<2x256xf32>
    %cst_199 = arith.constant 1.000000e+00 : f32
    %399 = vector.broadcast %cst_199 : f32 to vector<2x256xf32>
    %400 = arith.addf %399, %398 : vector<2x256xf32>
    %cst_200 = arith.constant 1.000000e+00 : f32
    %401 = vector.broadcast %cst_200 : f32 to vector<2x256xf32>
    %402 = arith.divf %401, %400 : vector<2x256xf32>
    %cst_201 = arith.constant 1.06140542 : f32
    %403 = vector.broadcast %cst_201 : f32 to vector<2x256xf32>
    %404 = arith.mulf %402, %403 : vector<2x256xf32>
    %cst_202 = arith.constant -1.45315206 : f32
    %405 = vector.broadcast %cst_202 : f32 to vector<2x256xf32>
    %406 = arith.addf %405, %404 : vector<2x256xf32>
    %407 = arith.mulf %402, %406 : vector<2x256xf32>
    %cst_203 = arith.constant 1.42141378 : f32
    %408 = vector.broadcast %cst_203 : f32 to vector<2x256xf32>
    %409 = arith.addf %408, %407 : vector<2x256xf32>
    %410 = arith.mulf %402, %409 : vector<2x256xf32>
    %cst_204 = arith.constant -0.284496725 : f32
    %411 = vector.broadcast %cst_204 : f32 to vector<2x256xf32>
    %412 = arith.addf %411, %410 : vector<2x256xf32>
    %413 = arith.mulf %402, %412 : vector<2x256xf32>
    %cst_205 = arith.constant 0.254829586 : f32
    %414 = vector.broadcast %cst_205 : f32 to vector<2x256xf32>
    %415 = arith.addf %414, %413 : vector<2x256xf32>
    %416 = arith.mulf %402, %415 : vector<2x256xf32>
    %cst_206 = arith.constant 0.000000e+00 : f32
    %417 = vector.broadcast %cst_206 : f32 to vector<2x256xf32>
    %418 = arith.subf %417, %396 : vector<2x256xf32>
    %419 = arith.mulf %418, %396 : vector<2x256xf32>
    %420 = math.exp %419 : vector<2x256xf32>
    %421 = arith.mulf %416, %420 : vector<2x256xf32>
    %cst_207 = arith.constant 1.000000e+00 : f32
    %422 = vector.broadcast %cst_207 : f32 to vector<2x256xf32>
    %423 = arith.subf %422, %421 : vector<2x256xf32>
    %cst_208 = arith.constant 0.000000e+00 : f32
    %424 = vector.broadcast %cst_208 : f32 to vector<2x256xf32>
    %425 = arith.cmpf olt, %395, %424 : vector<2x256xf32>
    %cst_209 = arith.constant 0.000000e+00 : f32
    %426 = vector.broadcast %cst_209 : f32 to vector<2x256xf32>
    %427 = arith.subf %426, %423 : vector<2x256xf32>
    %428 = arith.select %425, %427, %423 : vector<2x256xi1>, vector<2x256xf32>
    %cst_210 = arith.constant 1.000000e+00 : f32
    %429 = vector.broadcast %cst_210 : f32 to vector<2x256xf32>
    %430 = arith.addf %429, %428 : vector<2x256xf32>
    %431 = arith.mulf %393, %430 : vector<2x256xf32>
    %c0_211 = arith.constant 0 : index
    %c0_212 = arith.constant 0 : index
    %432 = vector.load %arg19[%c0_211, %c0_212] : memref<256x7xf32, #tpu.memory_space<vmem>>, vector<256x7xf32>
    %cst_213 = arith.constant dense<0.000000e+00> : vector<2x7xf32>
    %433 = tpu.matmul %431, %432, %cst_213 {dimension_numbers = #tpu.dot_dimension_numbers<[1], [0], [0], [1], [0, 0, 1, 1], [], []>} : vector<2x256xf32>, vector<256x7xf32>, vector<2x7xf32> -> vector<2x7xf32>
    %c0_214 = arith.constant 0 : index
    %c0_215 = arith.constant 0 : index
    %434 = vector.load %arg20[%c0_214, %c0_215] : memref<1x7xf32, #tpu.memory_space<vmem>>, vector<1x7xf32>
    %435 = vector.broadcast %434 : vector<1x7xf32> to vector<2x7xf32>
    %436 = arith.addf %433, %435 : vector<2x7xf32>
    %c0_216 = arith.constant 0 : index
    %c0_217 = arith.constant 0 : index
    %437 = vector.load %arg21[%c0_216, %c0_217] : memref<2x7xf32, #tpu.memory_space<vmem>>, vector<2x7xf32>
    tpu.vector_store %arg21[%c0_216, %c0_217], %436 {strides = array<i32>} : memref<2x7xf32, #tpu.memory_space<vmem>>, vector<2x7xf32>,
    return
  }
}

</mosaic_0001>

<bundles_post_ra>
// kernel: tpu_custom_call.1
= control target key start
LH: loop header
LB: loop body
LE: loop exit
PB: predicated region body
PF: predicated region fallthrough
CT: control target
= control target key end

     0   :  { %s4351_s0 = inlined_call_operand.vmem [shape: f32[2,1], index: 0, kind: input, shape index: {}]   ;;  %s4352_s1 = inlined_call_operand.vmem [shape: f32[2,7], index: 1, kind: input, shape index: {}]   ;;  %s4353_s2 = inlined_call_operand.vmem [shape: f32[2,512], index: 2, kind: input, shape index: {}]   ;;  %s4354_s3 = inlined_call_operand.vmem [shape: f32[1,32], index: 3, kind: input, shape index: {}]   ;;  %s4355_s4 = inlined_call_operand.vmem [shape: f32[32,256], index: 4, kind: input, shape index: {}]   ;;  %s4356_s5 = inlined_call_operand.vmem [shape: f32[32,256], index: 5, kind: input, shape index: {}]   ;;  %s4357_s6 = inlined_call_operand.vmem [shape: f32[1,256], index: 6, kind: input, shape index: {}]   ;;  %s4358_s7 = inlined_call_operand.vmem [shape: f32[256,64], index: 7, kind: input, shape index: {}]   ;;  %s4359_s8 = inlined_call_operand.vmem [shape: f32[1,64], index: 8, kind: input, shape index: {}]   ;;  %s4360_s9 = inlined_call_operand.vmem [shape: f32[7,256], index: 9, kind: input, shape index: {}]   ;;  %s4361_s10 = inlined_call_operand.hbm [shape: f32[512,256], index: 10, kind: input, shape index: {}]   ;;  %s4362_s11 = inlined_call_operand.vmem [shape: f32[1,256], index: 11, kind: input, shape index: {}]   ;;  %s4363_s12 = inlined_call_operand.vmem [shape: f32[1,256], index: 12, kind: input, shape index: {}]   ;;  %s4364_s13 = inlined_call_operand.vmem [shape: f32[1,256], index: 13, kind: input, shape index: {}]   ;;  %s4365_s14 = inlined_call_operand.hbm [shape: f32[4,256,256], index: 14, kind: input, shape index: {}]   ;;  %s4366_s15 = inlined_call_operand.vmem [shape: f32[4,64,256], index: 15, kind: input, shape index: {}]   ;;  %s4367_s16 = inlined_call_operand.vmem [shape: f32[4,1,256], index: 16, kind: input, shape index: {}]   ;;  %s4368_s17 = inlined_call_operand.vmem [shape: f32[4,1,256], index: 17, kind: input, shape index: {}]   ;;  %s4369_s18 = inlined_call_operand.vmem [shape: f32[4,1,256], index: 18, kind: input, shape index: {}]   ;;  %s4370_s19 = inlined_call_operand.vmem [shape: f32[256,7], index: 19, kind: input, shape index: {}]   ;;  %s4371_s20 = inlined_call_operand.vmem [shape: f32[1,7], index: 20, kind: input, shape index: {}]   ;;  %s4372_s21 = inlined_call_operand.hbm [shape: f32[2,7], index: 21, kind: output, shape index: {}]  }
   0x1   :  { %4375 = sst [smem:[#allocation11_spill]] %s4351_s0 }
   0x2   :  { %4376 = sst [smem:[#allocation12_spill]] %s4352_s1 }
   0x3   :  { %4377 = sst [smem:[#allocation13_spill]] %s4353_s2 }
   0x4   :  { %4378 = sst [smem:[#allocation14_spill]] %s4354_s3 }
   0x5   :  { %4379 = sst [smem:[#allocation15_spill]] %s4355_s4 }
   0x6   :  { %4380 = sst [smem:[#allocation16_spill]] %s4356_s5 }
   0x7   :  { %26 = vsyncpa [#allocation3], 0 }
   0x8   :  { %27 = vsyncpa [#allocation6], 0 }
   0x9   :  { %28 = vsyncpa [#allocation4], 0  ;;  %s3497_s2 = smov [#allocation2]   ;;  %s3425_s3 = scalar_lea.hbm %s4361_s10, 16384 }
   0xa   :  { %s54_s25 = sshll.u32 %s3497_s2, 4  ;;  %p3426_p0 = scmp.ne.s32.totalorder %s4361_s10, %s3425_s3  ;;  %s55_s25 = int_to_ptr.vmem [resolvable:$true] %s54_s25 }
   0xb   :  { %p3429_p1 = scmp.lt.u32.totalorder %s3425_s3, %s4361_s10 }
   0xd   :  { %p3431_p2 = pnand %p3429_p1, %p3426_p0 }
   0xf   :  { %3434 = shalt.err (!%p3431_p2)
}
  0x10   :  { %s3435_s30 = scalar_lea.vmem %s55_s25, 16384  ;;  %p3440_p4 = scmp.lt.s32.totalorder %s55_s25, %s55_s25 }
  0x11   :  { %p3436_p3 = scmp.ne.s32.totalorder %s55_s25, %s3435_s30  ;;  %p3441_p5 = scmp.lt.s32.totalorder %s3435_s30, %s3435_s30 }
  0x13   :  { %p3442_p6 = por %p3441_p5, %p3440_p4 }
  0x15   :  { %p3443_p7 = pnand %p3442_p6, %p3436_p3 }
  0x17   :  { %3446 = shalt.err (!%p3443_p7)
}
  0x18   :  { %s3498_s5 = smov 256   ;;  %s3499_s22 = smov 16  }
  0x19   :  { %60 = dma.hbm_to_vmem [thread:$0]  %s4361_s10, 16384, %s55_s25, [#allocation3], %s3498_s5, %s3498_s5, %s3499_s22  }
  0x1a   :  { %s3500_s24 = smov [#allocation5]   ;;  %s3447_s3 = scalar_lea.hbm %s4365_s14, 32768 }
  0x1b   :  { %s72_s2 = sshll.u32 %s3500_s24, 4  ;;  %p3448_p8 = scmp.ne.s32.totalorder %s4365_s14, %s3447_s3  ;;  %s73_s2 = int_to_ptr.vmem [resolvable:$true] %s72_s2 }
  0x1c   :  { %p3451_p9 = scmp.lt.u32.totalorder %s3447_s3, %s4365_s14 }
  0x1e   :  { %p3453_p10 = pnand %p3451_p9, %p3448_p8 }
  0x20   :  { %3456 = shalt.err (!%p3453_p10)
}
  0x21   :  { %s3457_s30 = scalar_lea.vmem %s73_s2, 32768  ;;  %p3462_p12 = scmp.lt.s32.totalorder %s73_s2, %s73_s2 }
  0x22   :  { %p3458_p11 = scmp.ne.s32.totalorder %s73_s2, %s3457_s30  ;;  %p3463_p13 = scmp.lt.s32.totalorder %s3457_s30, %s3457_s30 }
  0x24   :  { %p3464_p0 = por %p3463_p13, %p3462_p12 }
  0x26   :  { %p3465_p1 = pnand %p3464_p0, %p3458_p11 }
  0x28   :  { %3468 = shalt.err (!%p3465_p1)
}
  0x29   :  { %78 = dma.hbm_to_vmem [thread:$0]  %s4365_s14, 32768, %s73_s2, [#allocation6], %s3498_s5, %s3498_s5, %s3499_s22  }
  0x2a   :  { %3491 = dma.done.wait [#allocation3], 16384  }
  0x2b   :  { %3492 = vsyncadd [#allocation3], 4294950912 }
  0x2c   :  { %3493 = dma.done.wait [#allocation6], 32768  }
  0x2d   :  { %3494 = vsyncadd [#allocation6], 4294934528  ;;  %v3501_v0 = vmov 0   ;;  %s4381_s24 = sld [smem:[#allocation11_spill]]  ;;  %s4382_s3 = sld [smem:[#allocation16_spill]]  ;;  %v3502_v9 = vmov 0.0  }
  0x2e   :  { %3361 = vset.pattern.permute.xlu0 %v3501_v0  ;;  %402 = vmatprep.mubr.f32.mxu0 %v3502_v9  ;;  %s4383_s28 = sld [smem:[#allocation15_spill]]  ;;  %s4384_s2 = sld [smem:[#allocation14_spill]]  ;;  %v3503_v31 = vmov 683565275   ;;  %v3504_v33 = vmov 2475754826  }
  0x2f   :  { %v3505_v36 = vmov 2131351028   ;;  %v3506_v39 = vmov 2102212464   ;;  %v3507_v42 = vmov 920167782  }
  0x30   :  { %v3508_v45 = vmov 1326507024   ;;  %vm334_vm11 = vcmask 261120   ;;  %s4385_s22 = sld [smem:[#allocation13_spill]] }
  0x33   :  { %v97_v1 = vld [vmem:[%s4381_s24] sm:$0x3]  ;;  %v327_v2 = vld [vmem:[%s4382_s3 + $0x8] sm:$0xff]  ;;  %v329_v3 = vld [vmem:[%s4382_s3 + $0x18] sm:$0xff] }
  0x34   :  { %101 = vperm.xlu0 %3361, %v97_v1   ;;  %v326_v4 = vld [vmem:[%s4382_s3] sm:$0xff]  ;;  %v2801_v5 = vpack.c.bf16 %v329_v3, %v327_v2  ;;  %v328_v6 = vld [vmem:[%s4382_s3 + $0x10] sm:$0xff]  ;;  %v331_v7 = vld [vmem:[%s4382_s3 + $0x28] sm:$0xff] }
  0x35   :  { %v333_v8 = vld [vmem:[%s4382_s3 + $0x38] sm:$0xff]  ;;  %v2803_v10 = vpack.c.bf16 %v328_v6, %v326_v4  ;;  %v330_v12 = vld [vmem:[%s4382_s3 + $0x20] sm:$0xff]  ;;  %v332_v13 = vld [vmem:[%s4382_s3 + $0x30] sm:$0xff]  ;;  %s4386_s3 = sld [smem:[#allocation12_spill]] }
  0x36   :  { %v2805_v11 = vpack.c.bf16 %v333_v8, %v331_v7  ;;  %v216_v14 = vld [vmem:[%s4383_s28 + $0x8] sm:$0xff]  ;;  %2802 = vmatprep.subr.bf16.mxu0 %v2801_v5  ;;  %v218_v15 = vld [vmem:[%s4383_s28 + $0x18] sm:$0xff]  ;;  %v2807_v16 = vpack.c.bf16 %v332_v13, %v330_v12  ;;  %v2654_v18 = vld [vmem:[%s4384_s2] ss:$0 sm:$0xff] }
  0x37   :  { %2804 = vmatpush1.bf16.msra.mxu0 %v2803_v10  ;;  %v2809_v17 = vpack.c.bf16 %v218_v15, %v216_v14 }
  0x38   :  { %2806 = vmatprep.subr.bf16.mxu0 %v2805_v11 }
  0x3b   :  { %2808 = vmatpush1.bf16.msra.mxu0 %v2807_v16 }
  0x3c   :  { %2810 = vmatprep.subr.bf16.mxu0 %v2809_v17 }
  0xb3   :  { %v102_v19 = vpop.permute.xlu0 %101 }
  0xb4   :  { %v3682_v20 = vmul.f32 %v2654_v18, %v102_v19 }
  0xb6   :  { %v114_v21 = vand.u32 2139095040, %v3682_v20  ;;  %v111_v25 = vand.u32 2147483647, %v3682_v20  ;;  %vm113_vm7 = vcmp.lt.s32.totalorder %v3682_v20, 0  ;;  %vm203_vm13 = vweird.f32 %v3682_v20 }
  0xb8   :  { %v115_v22 = vshrl.u32 %v114_v21, 23  ;;  %v118_v28 = vand.u32 8388607, %v111_v25  ;;  %vm112_vm8 = vcmp.le.f32.partialorder %v111_v25, 0.7853982  ;;  %v215_v25 = vld [vmem:[%s4383_s28] sm:$0xff] }
  0xba   :  { %v2655_v23 = vadd.s32 4294967169, %v115_v22  ;;  %v119_v47 = vor.u32 8388608, %v118_v28 }
  0xbc   :  { %v121_v24 = vadd.s32 1, %v2655_v23  ;;  %v159_v61 = vshll.u32 %v119_v47, 8 }
  0xbe   :  { %vm122_vm0 = vcmp.gt.s32.totalorder %v121_v24, 0 }
  0xbf   :  { %v123_v26 = vsel %vm122_vm0, %v121_v24, 0 }
  0xc0   :  { %v125_v27 = vand.u32 31, %v123_v26  ;;  %v124_v30 = vshrl.u32 %v123_v26, 5 }
  0xc2   :  { %v126_v29 = vsub.s32 32, %v125_v27  ;;  %v128_v32 = vshll.u32 %v3503_v31, %v125_v27  ;;  %v131_v34 = vshll.u32 %v3504_v33, %v125_v27  ;;  %v134_v38 = vshll.u32 %v3505_v36, %v125_v27 }
  0xc3   :  { %v137_v41 = vshll.u32 %v3506_v39, %v125_v27  ;;  %v140_v44 = vshll.u32 %v3507_v42, %v125_v27  ;;  %vm143_vm1 = vcmp.lt.s32.totalorder %v124_v30, 1  ;;  %vm146_vm2 = vcmp.lt.s32.totalorder %v124_v30, 4 }
  0xc4   :  { %v129_v35 = vshrl.u32 %v3504_v33, %v126_v29  ;;  %v132_v37 = vshrl.u32 %v3505_v36, %v126_v29  ;;  %v135_v40 = vshrl.u32 %v3506_v39, %v126_v29  ;;  %v138_v43 = vshrl.u32 %v3507_v42, %v126_v29 }
  0xc5   :  { %v141_v46 = vshrl.u32 %v3508_v45, %v126_v29  ;;  %v127_v56 = vshrl.u32 %v3503_v31, %v126_v29  ;;  %vm145_vm3 = vcmp.lt.s32.totalorder %v124_v30, 3  ;;  %vm144_vm4 = vcmp.lt.s32.totalorder %v124_v30, 2 }
  0xc6   :  { %v130_v48 = vor.u32 %v129_v35, %v128_v32  ;;  %v133_v49 = vor.u32 %v132_v37, %v131_v34  ;;  %v136_v50 = vor.u32 %v135_v40, %v134_v38  ;;  %v139_v51 = vor.u32 %v138_v43, %v137_v41 }
  0xc7   :  { %v142_v52 = vor.u32 %v141_v46, %v140_v44  ;;  %v485_v41 = vlaneseq  ;;  %v3509_v42 = vmov 1983009808  }
  0xc8   :  { %v148_v53 = vsel %vm146_vm2, %v136_v50, 2102212464  ;;  %v151_v54 = vsel %vm143_vm1, %v130_v48, %v133_v49  ;;  %v155_v55 = vsel %vm143_vm1, %v133_v49, %v136_v50  ;;  %v152_v57 = vsel %vm146_vm2, %v139_v51, 920167782 }
  0xc9   :  { %v156_v58 = vsel %vm146_vm2, %v142_v52, 1326507024  ;;  %v153_v59 = vsel %vm145_vm3, %v136_v50, %v152_v57  ;;  %v147_v62 = vsel %vm143_vm1, %v127_v56, %v130_v48  ;;  %v149_v63 = vsel %vm145_vm3, %v133_v49, %v148_v53  ;;  %v220_v53 = vld [vmem:[%s4383_s28 + $0x28] sm:$0xff] }
  0xca   :  { %v157_v60 = vsel %vm145_vm3, %v139_v51, %v156_v58  ;;  %v154_v0 = vsel %vm144_vm4, %v151_v54, %v153_v59  ;;  %v150_v6 = vsel %vm144_vm4, %v147_v62, %v149_v63  ;;  %v795_v43 = vunpack.c.l.s4 %v3509_v42  ;;  %v217_v51 = vld [vmem:[%s4383_s28 + $0x10] sm:$0xff]  ;;  %v222_v54 = vld [vmem:[%s4383_s28 + $0x38] sm:$0xff]  ;;  %v219_v59 = vld [vmem:[%s4383_s28 + $0x20] sm:$0xff] }
  0xcb   :  { %v158_v1 = vsel %vm144_vm4, %v155_v55, %v157_v60  ;;  %v3691_v4 = vmul.u32.u64.low %v159_v61, %v154_v0  ;;  %v3692_v5 = vmul.u32.u64.high %v159_v61, %v154_v0, %v3691_v4  ;;  %v166_v8 = vmul.u32 %v159_v61, %v150_v6  ;;  %v221_v60 = vld [vmem:[%s4383_s28 + $0x30] sm:$0xff]  ;;  %v3729_v0 = vld [vmem:[%s4385_s22] sm:$0xff] }
  0xcc   :  { %v3688_v2 = vmul.u32.u64.low %v159_v61, %v158_v1  ;;  %v3689_v3 = vmul.u32.u64.high %v159_v61, %v158_v1, %v3688_v2  ;;  %v3702_v47 = vshrl.u32 %v485_v41, 7  ;;  %v796_v48 = vunpack.c.0.s8 %v795_v43  ;;  %v687_v41 = vld [vmem:[#allocation2 + $0xb8] sm:$0xff] }
  0xcd   :  { %v169_v7 = vadd.s32 1, %v3692_v5  ;;  %v2811_v58 = vpack.c.bf16 %v217_v51, %v215_v25  ;;  %v2813_v63 = vpack.c.bf16 %v222_v54, %v220_v53  ;;  %v665_v2 = vld [vmem:[#allocation2 + $0x8] sm:$0xff]  ;;  %v688_v25 = vld [vmem:[#allocation2 + $0xc0] sm:$0xff]  ;;  %v690_v51 = vld [vmem:[#allocation2 + $0xd0] sm:$0xff]  ;;  %vm960_vm1 = vcmask 1046528  }
  0xce   :  { %vm168_vm5 = vc.u32 %v3689_v3, %v3691_v4  ;;  %v167_v22 = vadd.s32 %v3691_v4, %v3689_v3  ;;  %v3723_v61 = vsub.s32 %v796_v48, %v3702_v47  ;;  %v667_v3 = vld [vmem:[#allocation2 + $0x18] sm:$0xff]  ;;  %v2815_v4 = vpack.c.bf16 %v221_v60, %v219_v59 }
  0xcf   :  { %v170_v10 = vsel %vm168_vm5, %v169_v7, %v3692_v5  ;;  %v691_v48 = vld [vmem:[#allocation2 + $0xd8] sm:$0xff]  ;;  %v2875_v54 = vpack.c.bf16 %v690_v51, %v688_v25  ;;  %vm956_vm2 = vcmask 56320   ;;  %vm1054_vm5 = vcmask 1041408  }
  0xd0   :  { %v171_v11 = vadd.s32 %v170_v10, %v166_v8  ;;  %v3737_v7 = vrot.slane %v3729_v0, %v3723_v61  ;;  %v2849_v8 = vpack.c.bf16 %v667_v3, %v665_v2  ;;  %v664_v10 = vld [vmem:[#allocation2] sm:$0xff]  ;;  %v695_v53 = vld [vmem:[#allocation2 + $0xf8] sm:$0xff]  ;;  %v701_v2 = vld [vmem:[#allocation2 + $0x128] sm:$0xff] }
  0xd1   :  { %v699_v59 = vld [vmem:[#allocation2 + $0x118] sm:$0xff] }
  0xd2   :  { %v172_v12 = vadd.s32 536870912, %v171_v11  ;;  %v703_v3 = vld [vmem:[#allocation2 + $0x138] sm:$0xff] }
  0xd4   :  { %v173_v13 = vshrl.u32 %v172_v12, 30  ;;  %v669_v12 = vld [vmem:[#allocation2 + $0x28] sm:$0xff] }
  0xd6   :  { %v174_v14 = vshll.u32 %v173_v13, 30  ;;  %v197_v37 = vsub.s32 4, %v173_v13 }
  0xd8   :  { %v175_v15 = vsub.s32 %v171_v11, %v174_v14  ;;  %v198_v39 = vsel %vm113_vm7, %v197_v37, %v173_v13  ;;  %v666_v11 = vld [vmem:[#allocation2 + $0x10] sm:$0xff]  ;;  %v671_v13 = vld [vmem:[#allocation2 + $0x38] sm:$0xff] }
  0xd9   :  { %v200_v40 = vsel %vm112_vm8, 0, %v198_v39  ;;  %v682_v39 = vld [vmem:[#allocation2 + $0x90] sm:$0xff] }
  0xda   :  { %v177_v16 = vsub.s32 0, %v175_v15  ;;  %v316_v44 = vand.u32 3, %v200_v40  ;;  %v204_v45 = vadd.s32 3, %v200_v40  ;;  %v685_v40 = vld [vmem:[#allocation2 + $0xa8] sm:$0xff] }
  0xdb   :  { %v2869_v43 = vpack.c.bf16 %v687_v41, %v685_v40  ;;  %v722_v40 = vld [vmem:[#allocation2 + $0x1d0] sm:$0xff]  ;;  %v725_v41 = vld [vmem:[#allocation2 + $0x1e8] sm:$0xff] }
  0xdc   :  { %v2656_v17 = vmin.u32 %v177_v16, %v175_v15  ;;  %vm321_vm9 = vcmp.eq.s32.totalorder %v316_v44, 2  ;;  %v205_v55 = vand.u32 3, %v204_v45  ;;  %vm318_vm10 = vcmp.eq.s32.totalorder %v316_v44, 0  ;;  %v686_v45 = vld [vmem:[#allocation2 + $0xb0] sm:$0xff] }
  0xdd   :  { %vm317_vm12 = vcmp.lt.s32.totalorder %v316_v44, 2  ;;  %v808_v16 = vcombine.high %v3737_v7, %v3737_v7  ;;  %v684_v44 = vld [vmem:[#allocation2 + $0xa0] sm:$0xff] }
  0xde   :  { %v179_v18 = vclz %v2656_v17  ;;  %vm207_vm14 = vcmp.eq.s32.totalorder %v205_v55, 0  ;;  %vm210_vm15 = vcmp.eq.s32.totalorder %v205_v55, 2  ;;  %vm206_vm0 = vcmp.lt.s32.totalorder %v205_v55, 2 }
  0xdf   :  { %v2853_v17 = vpack.c.bf16 %v671_v13, %v669_v12 }
  0xe0   :  { %v2657_v19 = vadd.s32 4294967294, %v179_v18  ;;  %v668_v18 = vld [vmem:[#allocation2 + $0x20] sm:$0xff] }
  0xe2   :  { %vm2658_vm6 = vcmp.lt.s32.totalorder %v2657_v19, 0 }
  0xe3   :  { %v182_v21 = vsel %vm2658_vm6, 0, %v2657_v19  ;;  %v670_v19 = vld [vmem:[#allocation2 + $0x30] sm:$0xff]  ;;  %vm1236_vm6 = vcmask 523264  }
  0xe4   :  { %v183_v23 = vsub.s32 32, %v182_v21  ;;  %v187_v24 = vsub.s32 4294967266, %v182_v21  ;;  %v184_v26 = vshll.u32 %v175_v15, %v182_v21  ;;  %v2851_v15 = vpack.c.bf16 %v666_v11, %v664_v10  ;;  %v705_v10 = vld [vmem:[#allocation2 + $0x148] sm:$0xff]  ;;  %v707_v11 = vld [vmem:[#allocation2 + $0x158] sm:$0xff] }
  0xe5   :  { %v2889_v13 = vpack.c.bf16 %v707_v11, %v705_v10  ;;  %v740_v10 = vld [vmem:[#allocation2 + $0x260] sm:$0xff]  ;;  %v742_v11 = vld [vmem:[#allocation2 + $0x270] sm:$0xff] }
  0xe6   :  { %v185_v27 = vshrl.u32 %v167_v22, %v183_v23  ;;  %v188_v28 = vadd.s32 127, %v187_v24  ;;  %v673_v22 = vld [vmem:[#allocation2 + $0x48] sm:$0xff]  ;;  %v675_v23 = vld [vmem:[#allocation2 + $0x58] sm:$0xff]  ;;  %v2855_v24 = vpack.c.bf16 %v670_v19, %v668_v18 }
  0xe8   :  { %v186_v29 = vor.u32 %v185_v27, %v184_v26  ;;  %v189_v30 = vshll.u32 %v188_v28, 23  ;;  %v2857_v26 = vpack.c.bf16 %v675_v23, %v673_v22  ;;  %v672_v27 = vld [vmem:[#allocation2 + $0x40] sm:$0xff]  ;;  %v674_v28 = vld [vmem:[#allocation2 + $0x50] sm:$0xff]  ;;  %v713_v23 = vld [vmem:[#allocation2 + $0x188] sm:$0xff] }
  0xe9   :  { %v710_v22 = vld [vmem:[#allocation2 + $0x170] sm:$0xff] }
  0xea   :  { %v190_v31 = vor.u32 4788187, %v189_v30  ;;  %v193_v33 = vcvt.s32.f32 %v186_v29  ;;  %v677_v29 = vld [vmem:[#allocation2 + $0x68] sm:$0xff]  ;;  %v679_v30 = vld [vmem:[#allocation2 + $0x78] sm:$0xff] }
  0xec   :  { %v191_v32 = vand.u32 2147483647, %v190_v31  ;;  %v2859_v31 = vpack.c.bf16 %v674_v28, %v672_v27  ;;  %v712_v28 = vld [vmem:[#allocation2 + $0x180] sm:$0xff] }
  0xee   :  { %v194_v34 = vmul.f32 %v193_v33, %v191_v32  ;;  %v2861_v32 = vpack.c.bf16 %v679_v30, %v677_v29  ;;  %v676_v33 = vld [vmem:[#allocation2 + $0x60] sm:$0xff]  ;;  %v714_v29 = vld [vmem:[#allocation2 + $0x190] sm:$0xff]  ;;  %v717_v30 = vld [vmem:[#allocation2 + $0x1a8] sm:$0xff] }
  0xf0   :  { %v195_v35 = vxor.u32 2147483648, %v194_v34 }
  0xf2   :  { %v196_v36 = vsel %vm113_vm7, %v195_v35, %v194_v34  ;;  %v681_v34 = vld [vmem:[#allocation2 + $0x88] sm:$0xff]  ;;  %v683_v35 = vld [vmem:[#allocation2 + $0x98] sm:$0xff] }
  0xf3   :  { %v199_v38 = vsel %vm112_vm8, %v3682_v20, %v196_v36  ;;  %v678_v20 = vld [vmem:[#allocation2 + $0x70] sm:$0xff]  ;;  %v2865_v37 = vpack.c.bf16 %v683_v35, %v681_v34  ;;  %v721_v35 = vld [vmem:[#allocation2 + $0x1c8] sm:$0xff] }
  0xf4   :  { %3363 = vcosq.f32 %v199_v38  ;;  %v2863_v36 = vpack.c.bf16 %v678_v20, %v676_v33  ;;  %v716_v20 = vld [vmem:[#allocation2 + $0x1a0] sm:$0xff]  ;;  %v718_v34 = vld [vmem:[#allocation2 + $0x1b0] sm:$0xff] }
  0xf5   :  { %3365 = vsinq.f32 %v199_v38  ;;  %v680_v38 = vld [vmem:[#allocation2 + $0x80] sm:$0xff] }
  0xf6   :  { %v2867_v42 = vpack.c.bf16 %v682_v39, %v680_v38  ;;  %v720_v39 = vld [vmem:[#allocation2 + $0x1c0] sm:$0xff] }
  0xfe   :  { %v3364_v46 = vpop.eup %3363 }
  0xff   :  { %v3366_v49 = vpop.eup %3365  ;;  %v211_v50 = vxor.u32 2147483648, %v3364_v46 }
 0x100   :  { %v208_v52 = vxor.u32 2147483648, %v3366_v49 }
 0x101   :  { %v323_v56 = vsel %vm321_vm9, %v211_v50, %v3366_v49  ;;  %v212_v6 = vsel %vm210_vm15, %v211_v50, %v3366_v49  ;;  %v2871_v49 = vpack.c.bf16 %v686_v45, %v684_v44  ;;  %v793_v44 = vcombine.high %v3729_v0, %v3729_v0 }
 0x102   :  { %v320_v57 = vsel %vm318_vm10, %v3364_v46, %v208_v52  ;;  %v209_v5 = vsel %vm207_vm14, %v3364_v46, %v208_v52  ;;  %v689_v46 = vld [vmem:[#allocation2 + $0xc8] sm:$0xff] }
 0x103   :  { %v324_v62 = vsel %vm317_vm12, %v320_v57, %v323_v56  ;;  %v213_v14 = vsel %vm206_vm0, %v209_v5, %v212_v6  ;;  %v2873_v50 = vpack.c.bf16 %v691_v48, %v689_v46  ;;  %v693_v52 = vld [vmem:[#allocation2 + $0xe8] sm:$0xff]  ;;  %v692_v56 = vld [vmem:[#allocation2 + $0xe0] sm:$0xff]  ;;  %v694_v57 = vld [vmem:[#allocation2 + $0xf0] sm:$0xff]  ;;  %v2885_v5 = vpack.c.bf16 %v703_v3, %v701_v2 }
 0x104   :  { %v325_v1 = vsel %vm203_vm13, nan, %v324_v62  ;;  %v214_v21 = vsel %vm203_vm13, nan, %v213_v14  ;;  %v2877_v55 = vpack.c.bf16 %v695_v53, %v693_v52  ;;  %v2879_v60 = vpack.c.bf16 %v694_v57, %v692_v56  ;;  %v700_v6 = vld [vmem:[#allocation2 + $0x120] sm:$0xff]  ;;  %v726_v48 = vld [vmem:[#allocation2 + $0x1f0] sm:$0xff]  ;;  %v735_v56 = vld [vmem:[#allocation2 + $0x238] sm:$0xff] }
 0x105   :  { %2663 = vmatmul.mubr.msk.f32.vlgmr.msra.gmra.mrb[0].mxu0 %vm334_vm11, %v325_v1  ;;  %v698_v1 = vld [vmem:[#allocation2 + $0x110] sm:$0xff]  ;;  %v704_v14 = vld [vmem:[#allocation2 + $0x140] sm:$0xff]  ;;  %v3747_v51 = vrot.slane %v793_v44, %v3723_v61 }
 0x106   :  { %2812 = vmatpush1.bf16.msra.mxu0 %v2811_v58  ;;  %476 = vmatprep.mubr.f32.mxu0 %v3502_v9  ;;  %v697_v58 = vld [vmem:[#allocation2 + $0x108] sm:$0xff]  ;;  %v724_v46 = vld [vmem:[#allocation2 + $0x1e0] sm:$0xff]  ;;  %v738_v3 = vld [vmem:[#allocation2 + $0x250] sm:$0xff] }
 0x107   :  { %2814 = vmatprep.subr.bf16.mxu0 %v2813_v63  ;;  %v2881_v62 = vpack.c.bf16 %v699_v59, %v697_v58  ;;  %v696_v63 = vld [vmem:[#allocation2 + $0x100] sm:$0xff]  ;;  %v2911_v25 = vpack.c.bf16 %v726_v48, %v724_v46  ;;  %v809_v0 = vcombine.high %v3747_v51, %v3747_v51  ;;  %v766_v48 = vld [vmem:[#allocation2 + $0x330] sm:$0xff] }
 0x108   :  { %v728_v53 = vld [vmem:[#allocation2 + $0x200] sm:$0xff] }
 0x109   :  { %v732_v59 = vld [vmem:[#allocation2 + $0x220] sm:$0xff] }
 0x10a   :  { %2816 = vmatpush1.bf16.msra.mxu0 %v2815_v4  ;;  %v2883_v4 = vpack.c.bf16 %v698_v1, %v696_v63  ;;  %v739_v63 = vld [vmem:[#allocation2 + $0x258] sm:$0xff]  ;;  %v736_v2 = vld [vmem:[#allocation2 + $0x240] sm:$0xff] }
 0x10b   :  { %2850 = vmatprep.subr.bf16.mxu0 %v2849_v8  ;;  %v702_v8 = vld [vmem:[#allocation2 + $0x130] sm:$0xff]  ;;  %v764_v46 = vld [vmem:[#allocation2 + $0x320] sm:$0xff] }
 0x10c   :  { %v2887_v12 = vpack.c.bf16 %v702_v8, %v700_v6  ;;  %v2923_v6 = vpack.c.bf16 %v738_v3, %v736_v2  ;;  %v553_v2 = vld [vmem:[%s4358_s7 + $0x10] sm:$0xff]  ;;  %v554_v3 = vld [vmem:[%s4358_s7 + $0x18] sm:$0xff] }
 0x10d   :  { %2664 = vmatmul.mubr.msk.f32.vlgmr.msra.gmra.mrb[0].mxu0 %vm334_vm11, %v214_v21  ;;  %v708_v21 = vld [vmem:[#allocation2 + $0x160] sm:$0xff] }
 0x10e   :  { %2852 = vmatpush1.bf16.msra.mxu0 %v2851_v15  ;;  %878 = vmatprep.mubr.f32.mxu0 %v808_v16  ;;  %v706_v15 = vld [vmem:[#allocation2 + $0x150] sm:$0xff]  ;;  %v709_v16 = vld [vmem:[#allocation2 + $0x168] sm:$0xff] }
 0x10f   :  { %2854 = vmatprep.subr.bf16.mxu0 %v2853_v17  ;;  %v711_v17 = vld [vmem:[#allocation2 + $0x178] sm:$0xff]  ;;  %v2891_v18 = vpack.c.bf16 %v706_v15, %v704_v14  ;;  %v2927_v14 = vpack.c.bf16 %v742_v11, %v740_v10  ;;  %v744_v15 = vld [vmem:[#allocation2 + $0x280] sm:$0xff]  ;;  %v774_v10 = vld [vmem:[#allocation2 + $0x370] sm:$0xff]  ;;  %v2823_v11 = vpack.c.bf16 %v554_v3, %v553_v2 }
 0x110   :  { %v2893_v19 = vpack.c.bf16 %v711_v17, %v709_v16  ;;  %v746_v16 = vld [vmem:[#allocation2 + $0x290] sm:$0xff]  ;;  %v749_v17 = vld [vmem:[#allocation2 + $0x2a8] sm:$0xff]  ;;  %v582_v2 = vld [vmem:[%s4358_s7 + $0xf8] sm:$0xff] }
 0x112   :  { %2856 = vmatpush1.bf16.msra.mxu0 %v2855_v24  ;;  %v715_v24 = vld [vmem:[#allocation2 + $0x198] sm:$0xff] }
 0x113   :  { %2858 = vmatprep.subr.bf16.mxu0 %v2857_v26  ;;  %v2895_v26 = vpack.c.bf16 %v710_v22, %v708_v21  ;;  %v2897_v27 = vpack.c.bf16 %v715_v24, %v713_v23  ;;  %v748_v22 = vld [vmem:[#allocation2 + $0x2a0] sm:$0xff]  ;;  %v750_v23 = vld [vmem:[#allocation2 + $0x2b0] sm:$0xff]  ;;  %v753_v24 = vld [vmem:[#allocation2 + $0x2c8] sm:$0xff] }
 0x116   :  { %2860 = vmatpush1.bf16.msra.mxu0 %v2859_v31  ;;  %v719_v31 = vld [vmem:[#allocation2 + $0x1b8] sm:$0xff] }
 0x117   :  { %2862 = vmatprep.subr.bf16.mxu0 %v2861_v32  ;;  %v2899_v32 = vpack.c.bf16 %v714_v29, %v712_v28  ;;  %v2901_v33 = vpack.c.bf16 %v719_v31, %v717_v30  ;;  %v752_v29 = vld [vmem:[#allocation2 + $0x2c0] sm:$0xff]  ;;  %v754_v30 = vld [vmem:[#allocation2 + $0x2d0] sm:$0xff]  ;;  %v757_v31 = vld [vmem:[#allocation2 + $0x2e8] sm:$0xff] }
 0x11a   :  { %2864 = vmatpush1.bf16.msra.mxu0 %v2863_v36  ;;  %v723_v36 = vld [vmem:[#allocation2 + $0x1d8] sm:$0xff] }
 0x11b   :  { %2866 = vmatprep.subr.bf16.mxu0 %v2865_v37  ;;  %v2903_v37 = vpack.c.bf16 %v718_v34, %v716_v20  ;;  %v2905_v38 = vpack.c.bf16 %v723_v36, %v721_v35  ;;  %v756_v34 = vld [vmem:[#allocation2 + $0x2e0] sm:$0xff]  ;;  %v758_v35 = vld [vmem:[#allocation2 + $0x2f0] sm:$0xff]  ;;  %v761_v36 = vld [vmem:[#allocation2 + $0x308] sm:$0xff] }
 0x11e   :  { %2868 = vmatpush1.bf16.msra.mxu0 %v2867_v42  ;;  %v727_v42 = vld [vmem:[#allocation2 + $0x1f8] sm:$0xff] }
 0x11f   :  { %2870 = vmatprep.subr.bf16.mxu0 %v2869_v43  ;;  %v2907_v43 = vpack.c.bf16 %v722_v40, %v720_v39  ;;  %v2909_v45 = vpack.c.bf16 %v727_v42, %v725_v41  ;;  %v760_v40 = vld [vmem:[#allocation2 + $0x300] sm:$0xff]  ;;  %v762_v41 = vld [vmem:[#allocation2 + $0x310] sm:$0xff]  ;;  %v765_v42 = vld [vmem:[#allocation2 + $0x328] sm:$0xff] }
 0x120   :  { %v2947_v44 = vpack.c.bf16 %v762_v41, %v760_v40  ;;  %v560_v40 = vld [vmem:[%s4358_s7 + $0x48] sm:$0xff]  ;;  %v787_v41 = vld [vmem:[#allocation2 + $0x3d8] sm:$0xff] }
 0x122   :  { %2872 = vmatpush1.bf16.msra.mxu0 %v2871_v49  ;;  %v729_v49 = vld [vmem:[#allocation2 + $0x208] sm:$0xff] }
 0x123   :  { %2874 = vmatprep.subr.bf16.mxu0 %v2873_v50  ;;  %v731_v50 = vld [vmem:[#allocation2 + $0x218] sm:$0xff] }
 0x124   :  { %v2913_v52 = vpack.c.bf16 %v731_v50, %v729_v49  ;;  %v769_v49 = vld [vmem:[#allocation2 + $0x348] sm:$0xff]  ;;  %v771_v50 = vld [vmem:[#allocation2 + $0x358] sm:$0xff] }
 0x126   :  { %2876 = vmatpush1.bf16.msra.mxu0 %v2875_v54  ;;  %v730_v54 = vld [vmem:[#allocation2 + $0x210] sm:$0xff] }
 0x127   :  { %2878 = vmatprep.subr.bf16.mxu0 %v2877_v55  ;;  %v733_v55 = vld [vmem:[#allocation2 + $0x228] sm:$0xff]  ;;  %v2915_v57 = vpack.c.bf16 %v730_v54, %v728_v53  ;;  %v2951_v53 = vpack.c.bf16 %v766_v48, %v764_v46  ;;  %v786_v46 = vld [vmem:[#allocation2 + $0x3d0] sm:$0xff] }
 0x128   :  { %v2917_v58 = vpack.c.bf16 %v735_v56, %v733_v55  ;;  %v773_v54 = vld [vmem:[#allocation2 + $0x368] sm:$0xff]  ;;  %v775_v55 = vld [vmem:[#allocation2 + $0x378] sm:$0xff] }
 0x129   :  { %v567_v56 = vld [vmem:[%s4358_s7 + $0x80] sm:$0xff] }
 0x12a   :  { %2880 = vmatpush1.bf16.msra.mxu0 %v2879_v60  ;;  %v734_v60 = vld [vmem:[#allocation2 + $0x230] sm:$0xff] }
 0x12b   :  { %2882 = vmatprep.subr.bf16.mxu0 %v2881_v62  ;;  %v737_v62 = vld [vmem:[#allocation2 + $0x248] sm:$0xff]  ;;  %v2919_v61 = vpack.c.bf16 %v734_v60, %v732_v59  ;;  %v552_v60 = vld [vmem:[%s4358_s7 + $0x8] sm:$0xff] }
 0x12c   :  { %v2921_v1 = vpack.c.bf16 %v739_v63, %v737_v62  ;;  %v569_v62 = vld [vmem:[%s4358_s7 + $0x90] sm:$0xff]  ;;  %v570_v63 = vld [vmem:[%s4358_s7 + $0x98] sm:$0xff] }
 0x12e   :  { %2884 = vmatpush1.bf16.msra.mxu0 %v2883_v4  ;;  %v741_v4 = vld [vmem:[#allocation2 + $0x268] sm:$0xff] }
 0x12f   :  { %2886 = vmatprep.subr.bf16.mxu0 %v2885_v5  ;;  %v743_v5 = vld [vmem:[#allocation2 + $0x278] sm:$0xff] }
 0x130   :  { %v2925_v8 = vpack.c.bf16 %v743_v5, %v741_v4  ;;  %v571_v4 = vld [vmem:[%s4358_s7 + $0xa0] sm:$0xff]  ;;  %v572_v5 = vld [vmem:[%s4358_s7 + $0xa8] sm:$0xff] }
 0x132   :  { %2888 = vmatpush1.bf16.msra.mxu0 %v2887_v12  ;;  %v745_v12 = vld [vmem:[#allocation2 + $0x288] sm:$0xff] }
 0x133   :  { %2890 = vmatprep.subr.bf16.mxu0 %v2889_v13  ;;  %v747_v13 = vld [vmem:[#allocation2 + $0x298] sm:$0xff] }
 0x136   :  { %2892 = vmatpush1.bf16.msra.mxu0 %v2891_v18  ;;  %v751_v18 = vld [vmem:[#allocation2 + $0x2b8] sm:$0xff] }
 0x137   :  { %2894 = vmatprep.subr.bf16.mxu0 %v2893_v19  ;;  %v2931_v19 = vpack.c.bf16 %v746_v16, %v744_v15  ;;  %v2933_v21 = vpack.c.bf16 %v751_v18, %v749_v17  ;;  %v556_v15 = vld [vmem:[%s4358_s7 + $0x28] sm:$0xff]  ;;  %v779_v16 = vld [vmem:[#allocation2 + $0x398] sm:$0xff]  ;;  %v574_v18 = vld [vmem:[%s4358_s7 + $0xb8] sm:$0xff] }
 0x138   :  { %v573_v17 = vld [vmem:[%s4358_s7 + $0xb0] sm:$0xff] }
 0x13a   :  { %2896 = vmatpush1.bf16.msra.mxu0 %v2895_v26  ;;  %v755_v26 = vld [vmem:[#allocation2 + $0x2d8] sm:$0xff] }
 0x13b   :  { %2898 = vmatprep.subr.bf16.mxu0 %v2897_v27  ;;  %v2935_v27 = vpack.c.bf16 %v750_v23, %v748_v22  ;;  %v2937_v28 = vpack.c.bf16 %v755_v26, %v753_v24  ;;  %v778_v22 = vld [vmem:[#allocation2 + $0x390] sm:$0xff]  ;;  %v781_v26 = vld [vmem:[#allocation2 + $0x3a8] sm:$0xff] }
 0x13e   :  { %2900 = vmatpush1.bf16.msra.mxu0 %v2899_v32  ;;  %v759_v32 = vld [vmem:[#allocation2 + $0x2f8] sm:$0xff] }
 0x13f   :  { %2902 = vmatprep.subr.bf16.mxu0 %v2901_v33  ;;  %v2939_v33 = vpack.c.bf16 %v754_v30, %v752_v29  ;;  %v2941_v20 = vpack.c.bf16 %v759_v32, %v757_v31  ;;  %v558_v29 = vld [vmem:[%s4358_s7 + $0x38] sm:$0xff]  ;;  %v783_v30 = vld [vmem:[#allocation2 + $0x3b8] sm:$0xff]  ;;  %v575_v31 = vld [vmem:[%s4358_s7 + $0xc0] sm:$0xff] }
 0x140   :  { %v576_v32 = vld [vmem:[%s4358_s7 + $0xc8] sm:$0xff] }
 0x142   :  { %2904 = vmatpush1.bf16.msra.mxu0 %v2903_v37  ;;  %v763_v37 = vld [vmem:[#allocation2 + $0x318] sm:$0xff] }
 0x143   :  { %2906 = vmatprep.subr.bf16.mxu0 %v2905_v38  ;;  %v2943_v38 = vpack.c.bf16 %v758_v35, %v756_v34  ;;  %v2945_v39 = vpack.c.bf16 %v763_v37, %v761_v36  ;;  %v782_v34 = vld [vmem:[#allocation2 + $0x3b0] sm:$0xff]  ;;  %v2965_v36 = vpack.c.bf16 %v783_v30, %v781_v26  ;;  %v785_v37 = vld [vmem:[#allocation2 + $0x3c8] sm:$0xff] }
 0x144   :  { %v1221_v30 = vld [vmem:[%s4366_s15 + $0x8] sm:$0xff] }
 0x146   :  { %2908 = vmatpush1.bf16.msra.mxu0 %v2907_v43  ;;  %v767_v43 = vld [vmem:[#allocation2 + $0x338] sm:$0xff] }
 0x147   :  { %2910 = vmatprep.subr.bf16.mxu0 %v2909_v45  ;;  %v2949_v45 = vpack.c.bf16 %v767_v43, %v765_v42  ;;  %v577_v42 = vld [vmem:[%s4358_s7 + $0xd0] sm:$0xff]  ;;  %v578_v43 = vld [vmem:[%s4358_s7 + $0xd8] sm:$0xff] }
 0x14a   :  { %2912 = vmatpush1.bf16.msra.mxu0 %v2911_v25  ;;  %v768_v25 = vld [vmem:[#allocation2 + $0x340] sm:$0xff] }
 0x14b   :  { %2914 = vmatprep.subr.bf16.mxu0 %v2913_v52  ;;  %v770_v52 = vld [vmem:[#allocation2 + $0x350] sm:$0xff] }
 0x14d   :  { %879 = vmatmul.mubr.f32.vlgmr.msra.gmra.mrb[2].mxu0 %v3737_v7  ;;  %v2929_v7 = vpack.c.bf16 %v747_v13, %v745_v12  ;;  %v2957_v12 = vpack.c.bf16 %v775_v55, %v773_v54  ;;  %v777_v13 = vld [vmem:[#allocation2 + $0x388] sm:$0xff]  ;;  %v791_v54 = vld [vmem:[#allocation2 + $0x3f8] sm:$0xff] }
 0x14e   :  { %2916 = vmatpush1.bf16.msra.mxu0 %v2915_v57  ;;  %949 = vmatprep.mubr.f32.mxu0 %v809_v0  ;;  %v568_v57 = vld [vmem:[%s4358_s7 + $0x88] sm:$0xff]  ;;  %v551_v0 = vld [vmem:[%s4358_s7] sm:$0xff]  ;;  %v2961_v24 = vpack.c.bf16 %v779_v16, %v777_v13 }
 0x14f   :  { %2918 = vmatprep.subr.bf16.mxu0 %v2917_v58  ;;  %v2953_v58 = vpack.c.bf16 %v771_v50, %v769_v49  ;;  %v2817_v59 = vpack.c.bf16 %v568_v57, %v567_v56  ;;  %v2969_v49 = vpack.c.bf16 %v787_v41, %v785_v37  ;;  %v789_v50 = vld [vmem:[#allocation2 + $0x3e8] sm:$0xff]  ;;  %v580_v56 = vld [vmem:[%s4358_s7 + $0xe8] sm:$0xff]  ;;  %v2692_v37 = vld [vmem:[%s4366_s15 + $0x110] sm:$0xff] }
 0x150   :  { %v579_v55 = vld [vmem:[%s4358_s7 + $0xe0] sm:$0xff]  ;;  %v2697_v41 = vld [vmem:[%s4366_s15 + $0x138] sm:$0xff] }
 0x151   :  { %2818 = vmatprep.subr.bf16.mxu1 %v2817_v59  ;;  %v2973_v59 = vpack.c.bf16 %v791_v54, %v789_v50  ;;  %v660_v13 = vld [vmem:[%s4386_s3] sm:$0x3]  ;;  %v2701_v50 = vld [vmem:[%s4366_s15 + $0x158] sm:$0xff] }
 0x152   :  { %2920 = vmatpush1.bf16.msra.mxu0 %v2919_v61  ;;  %v2819_v61 = vpack.c.bf16 %v552_v60, %v551_v0  ;;  %v788_v0 = vld [vmem:[#allocation2 + $0x3e0] sm:$0xff]  ;;  %v790_v60 = vld [vmem:[#allocation2 + $0x3f0] sm:$0xff] }
 0x153   :  { %2922 = vmatprep.subr.bf16.mxu0 %v2921_v1  ;;  %v2821_v1 = vpack.c.bf16 %v570_v63, %v569_v62  ;;  %v2841_v62 = vpack.c.bf16 %v580_v56, %v579_v55  ;;  %v563_v63 = vld [vmem:[%s4358_s7 + $0x60] sm:$0xff]  ;;  %v2975_v3 = vpack.c.bf16 %v790_v60, %v788_v0  ;;  %v2700_v56 = vld [vmem:[%s4366_s15 + $0x150] sm:$0xff] }
 0x154   :  { %2820 = vmatpush3.bf16.msra.mxu1 %v2819_v61  ;;  %v564_v61 = vld [vmem:[%s4358_s7 + $0x68] sm:$0xff]  ;;  %v2698_v55 = vld [vmem:[%s4366_s15 + $0x140] sm:$0xff] }
 0x155   :  { %2822 = vmatprep.subr.bf16.mxu1 %v2821_v1  ;;  %v581_v1 = vld [vmem:[%s4358_s7 + $0xf0] sm:$0xff] }
 0x156   :  { %2924 = vmatpush1.bf16.msra.mxu0 %v2923_v6  ;;  %v2955_v6 = vpack.c.bf16 %v770_v52, %v768_v25  ;;  %v2837_v25 = vpack.c.bf16 %v578_v43, %v577_v42  ;;  %v561_v52 = vld [vmem:[%s4358_s7 + $0x50] sm:$0xff]  ;;  %v2694_v43 = vld [vmem:[%s4366_s15 + $0x120] sm:$0xff] }
 0x157   :  { %2926 = vmatprep.subr.bf16.mxu0 %v2925_v8  ;;  %v772_v8 = vld [vmem:[#allocation2 + $0x360] sm:$0xff] }
 0x158   :  { %2824 = vmatpush3.bf16.msra.mxu1 %v2823_v11  ;;  %v661_v11 = vld [vmem:[%s4360_s9] sm:$0x7f] }
 0x15a   :  { %2928 = vmatpush1.bf16.msra.mxu0 %v2927_v14  ;;  %v2825_v14 = vpack.c.bf16 %v572_v5, %v571_v4  ;;  %v2843_v4 = vpack.c.bf16 %v564_v61, %v563_v63  ;;  %v2845_v5 = vpack.c.bf16 %v582_v2, %v581_v1 }
 0x15b   :  { %2930 = vmatprep.subr.bf16.mxu0 %v2929_v7  ;;  %v555_v7 = vld [vmem:[%s4358_s7 + $0x20] sm:$0xff] }
 0x15c   :  { %v2827_v23 = vpack.c.bf16 %v556_v15, %v555_v7  ;;  %2826 = vmatprep.subr.bf16.mxu1 %v2825_v14  ;;  %v3861_v14 = vsub.s32 0, %v3702_v47  ;;  %v3864_v7 = vsub.s32 1, %v3702_v47 }
 0x15e   :  { %2932 = vmatpush1.bf16.msra.mxu0 %v2931_v19  ;;  %v2959_v19 = vpack.c.bf16 %v774_v10, %v772_v8  ;;  %2828 = vmatpush3.bf16.msra.mxu1 %v2827_v23  ;;  %v565_v8 = vld [vmem:[%s4358_s7 + $0x70] sm:$0xff]  ;;  %v566_v10 = vld [vmem:[%s4358_s7 + $0x78] sm:$0xff] }
 0x15f   :  { %2934 = vmatprep.subr.bf16.mxu0 %v2933_v21  ;;  %v776_v21 = vld [vmem:[#allocation2 + $0x380] sm:$0xff] }
 0x162   :  { %2936 = vmatpush1.bf16.msra.mxu0 %v2935_v27  ;;  %v2829_v27 = vpack.c.bf16 %v574_v18, %v573_v17 }
 0x163   :  { %2938 = vmatprep.subr.bf16.mxu0 %v2937_v28  ;;  %v557_v28 = vld [vmem:[%s4358_s7 + $0x30] sm:$0xff] }
 0x164   :  { %v2831_v35 = vpack.c.bf16 %v558_v29, %v557_v28  ;;  %2830 = vmatprep.subr.bf16.mxu1 %v2829_v27 }
 0x166   :  { %2940 = vmatpush1.bf16.msra.mxu0 %v2939_v33  ;;  %v2963_v33 = vpack.c.bf16 %v778_v22, %v776_v21  ;;  %2832 = vmatpush3.bf16.msra.mxu1 %v2831_v35 }
 0x167   :  { %2942 = vmatprep.subr.bf16.mxu0 %v2941_v20  ;;  %v780_v20 = vld [vmem:[#allocation2 + $0x3a0] sm:$0xff] }
 0x16a   :  { %2944 = vmatpush1.bf16.msra.mxu0 %v2943_v38  ;;  %v2833_v38 = vpack.c.bf16 %v576_v32, %v575_v31  ;;  %v1223_v31 = vld [vmem:[%s4366_s15 + $0x18] sm:$0xff]  ;;  %v2691_v32 = vld [vmem:[%s4366_s15 + $0x108] sm:$0xff] }
 0x16b   :  { %2946 = vmatprep.subr.bf16.mxu0 %v2945_v39  ;;  %v559_v39 = vld [vmem:[%s4358_s7 + $0x40] sm:$0xff] }
 0x16c   :  { %v2835_v48 = vpack.c.bf16 %v560_v40, %v559_v39  ;;  %2834 = vmatprep.subr.bf16.mxu1 %v2833_v38  ;;  %v2695_v40 = vld [vmem:[%s4366_s15 + $0x128] sm:$0xff] }
 0x16d   :  { %v3141_v42 = vpack.c.bf16 %v2697_v41, %v2695_v40  ;;  %v1229_v40 = vld [vmem:[%s4366_s15 + $0x48] sm:$0xff] }
 0x16e   :  { %2948 = vmatpush1.bf16.msra.mxu0 %v2947_v44  ;;  %v2967_v44 = vpack.c.bf16 %v782_v34, %v780_v20  ;;  %2836 = vmatpush3.bf16.msra.mxu1 %v2835_v48  ;;  %v2693_v20 = vld [vmem:[%s4366_s15 + $0x118] sm:$0xff] }
 0x16f   :  { %2950 = vmatprep.subr.bf16.mxu0 %v2949_v45  ;;  %v784_v45 = vld [vmem:[#allocation2 + $0x3c0] sm:$0xff]  ;;  %2838 = vmatprep.subr.bf16.mxu1 %v2837_v25  ;;  %v3137_v35 = vpack.c.bf16 %v2693_v20, %v2691_v32  ;;  %v1222_v32 = vld [vmem:[%s4366_s15 + $0x10] sm:$0xff] }
 0x170   :  { %v2971_v57 = vpack.c.bf16 %v786_v46, %v784_v45 }
 0x172   :  { %2952 = vmatpush1.bf16.msra.mxu0 %v2951_v53  ;;  %v562_v53 = vld [vmem:[%s4358_s7 + $0x58] sm:$0xff] }
 0x173   :  { %2954 = vmatprep.subr.bf16.mxu0 %v2953_v58  ;;  %v2839_v58 = vpack.c.bf16 %v562_v53, %v561_v52 }
 0x175   :  { %2840 = vmatpush3.bf16.msra.mxu1 %v2839_v58  ;;  %v3147_v58 = vpack.c.bf16 %v2700_v56, %v2698_v55  ;;  %v2703_v56 = vld [vmem:[%s4366_s15 + $0x168] sm:$0xff] }
 0x176   :  { %2956 = vmatpush1.bf16.msra.mxu0 %v2955_v6  ;;  %2842 = vmatprep.subr.bf16.mxu1 %v2841_v62  ;;  %v662_v6 = vld [vmem:[%s4360_s9 + $0x8] sm:$0x7f] }
 0x177   :  { %2958 = vmatprep.subr.bf16.mxu0 %v2957_v12  ;;  %v2847_v12 = vpack.c.bf16 %v566_v10, %v565_v8 }
 0x179   :  { %2844 = vmatpush3.bf16.msra.mxu1 %v2843_v4 }
 0x17a   :  { %2960 = vmatpush1.bf16.msra.mxu0 %v2959_v19  ;;  %2846 = vmatprep.subr.bf16.mxu1 %v2845_v5 }
 0x17b   :  { %2962 = vmatprep.subr.bf16.mxu0 %v2961_v24 }
 0x17d   :  { %2848 = vmatpush3.bf16.msra.mxu1 %v2847_v12 }
 0x17e   :  { %2964 = vmatpush1.bf16.msra.mxu0 %v2963_v33  ;;  %v2977_v33 = vpack.c.bf16 %v1223_v31, %v1221_v30  ;;  %v1220_v31 = vld [vmem:[%s4366_s15] sm:$0xff] }
 0x17f   :  { %2966 = vmatprep.subr.bf16.mxu0 %v2965_v36  ;;  %v2690_v36 = vld [vmem:[%s4366_s15 + $0x100] sm:$0xff] }
 0x180   :  { %2978 = vmatprep.subr.bf16.mxu1 %v2977_v33  ;;  %v3139_v39 = vpack.c.bf16 %v2692_v37, %v2690_v36  ;;  %v2979_v36 = vpack.c.bf16 %v1222_v32, %v1220_v31  ;;  %v1161_v32 = vld [vmem:[#allocation5 + $0x28] sm:$0xff] }
 0x182   :  { %2968 = vmatpush1.bf16.msra.mxu0 %v2967_v44  ;;  %v2696_v44 = vld [vmem:[%s4366_s15 + $0x130] sm:$0xff] }
 0x183   :  { %2970 = vmatprep.subr.bf16.mxu0 %v2969_v49  ;;  %v3143_v48 = vpack.c.bf16 %v2696_v44, %v2694_v43  ;;  %v2699_v49 = vld [vmem:[%s4366_s15 + $0x148] sm:$0xff]  ;;  %v1228_v43 = vld [vmem:[%s4366_s15 + $0x40] sm:$0xff]  ;;  %v1230_v44 = vld [vmem:[%s4366_s15 + $0x50] sm:$0xff] }
 0x184   :  { %v3145_v54 = vpack.c.bf16 %v2701_v50, %v2699_v49 }
 0x186   :  { %2972 = vmatpush1.bf16.msra.mxu0 %v2971_v57 }
 0x187   :  { %2974 = vmatprep.subr.bf16.mxu0 %v2973_v59 }
 0x18a   :  { %2976 = vmatpush1.bf16.msra.mxu0 %v2975_v3 }
 0x18b   :  { %2666 = vmatprep.subr.msk.mxu0 %vm960_vm1, %v662_v6 }
 0x18d   :  { %950 = vmatmul.mubr.f32.vlgmr.msra.gmra.mrb[2].mxu0 %v3747_v51  ;;  %v483_v51 = vld [vmem:[%s4357_s6] sm:$0x3] }
 0x18e   :  { %2667 = vmatpush1.msk.msra.mxu0 %vm960_vm1, %v661_v11  ;;  %1031 = vmatprep.mubr.f32.mxu0 %v3502_v9  ;;  %v488_v15 = vrot.slane %v483_v51, %v3861_v14  ;;  %v492_v16 = vrot.slane %v483_v51, %v3864_v7  ;;  %vm2636_vm1 = vcmask 50176  }
 0x18f   :  { %3138 = vmatprep.subr.bf16.mxu0 %v3137_v35 }
 0x195   :  { %2668 = vmatmul.mubr.msk.f32.vlgmr.msra.gmra.mrb[2].mxu0 %vm956_vm2, %v660_v13 }
 0x196   :  { %1987 = vmatprep.mubr.f32.mxu0 %v3502_v9  ;;  %3140 = vmatpush1.bf16.msra.mxu0 %v3139_v39  ;;  %v1224_v39 = vld [vmem:[%s4366_s15 + $0x20] sm:$0xff] }
 0x197   :  { %3142 = vmatprep.subr.bf16.mxu0 %v3141_v42 }
 0x19a   :  { %3144 = vmatpush1.bf16.msra.mxu0 %v3143_v48 }
 0x19b   :  { %3146 = vmatprep.subr.bf16.mxu0 %v3145_v54 }
 0x19e   :  { %3148 = vmatpush1.bf16.msra.mxu0 %v3147_v58 }
 0x1e0   :  { %v478_v17 = vpop.f32.mrb[0].mxu0 }
 0x1e1   :  { %v3871_v18 = vadd.f32 %v488_v15, %v478_v17  ;;  %v480_v19 = vpop.f32.mrb[1].mxu0 }
 0x1e2   :  { %v3873_v21 = vadd.f32 %v492_v16, %v480_v19 }
 0x1e3   :  { %v3876_v22 = vmul.f32 0.70710677, %v3871_v18 }
 0x1e4   :  { %v3879_v47 = vmul.f32 0.70710677, %v3873_v21  ;;  %v498_v33 = vmul.f32 0.5, %v3873_v21  ;;  %v1226_v21 = vld [vmem:[%s4366_s15 + $0x30] sm:$0xff] }
 0x1e5   :  { %v501_v23 = vand.u32 2147483647, %v3876_v22  ;;  %vm541_vm3 = vcmp.lt.f32.partialorder %v3876_v22, 0.0  ;;  %v1225_v22 = vld [vmem:[%s4366_s15 + $0x28] sm:$0xff]  ;;  %v2983_v41 = vpack.c.bf16 %v1226_v21, %v1224_v39 }
 0x1e6   :  { %v502_v24 = vand.u32 2147483647, %v3879_v47  ;;  %vm542_vm4 = vcmp.lt.f32.partialorder %v3879_v47, 0.0  ;;  %v1227_v47 = vld [vmem:[%s4366_s15 + $0x38] sm:$0xff]  ;;  %v1166_v39 = vld [vmem:[#allocation5 + $0x50] sm:$0xff] }
 0x1e7   :  { %v503_v26 = vmul.f32 0.3275911, %v501_v23  ;;  %v529_v34 = vsub.f32 0.0, %v501_v23 }
 0x1e8   :  { %v504_v27 = vmul.f32 0.3275911, %v502_v24  ;;  %v530_v38 = vsub.f32 0.0, %v502_v24 }
 0x1e9   :  { %v505_v28 = vadd.f32 1.0, %v503_v26  ;;  %v531_v46 = vmul.f32 %v529_v34, %v501_v23  ;;  %v497_v34 = vmul.f32 0.5, %v3871_v18  ;;  %v1231_v18 = vld [vmem:[%s4366_s15 + $0x58] sm:$0xff] }
 0x1ea   :  { %v506_v29 = vadd.f32 1.0, %v504_v27  ;;  %v532_v52 = vmul.f32 %v530_v38, %v502_v24  ;;  %v2981_v38 = vpack.c.bf16 %v1227_v47, %v1225_v22  ;;  %v2985_v42 = vpack.c.bf16 %v1231_v18, %v1229_v40  ;;  %v1160_v22 = vld [vmem:[#allocation5 + $0x20] sm:$0xff]  ;;  %v1162_v47 = vld [vmem:[#allocation5 + $0x30] sm:$0xff]  ;;  %v1169_v40 = vld [vmem:[#allocation5 + $0x68] sm:$0xff] }
 0x1eb   :  { %3367 = vrcp.f32 %v505_v28  ;;  %v533_v59 = vmul.f32 1.442695, %v531_v46  ;;  %v1038_v46 = vld [vmem:[%s4362_s11] sm:$0x3]  ;;  %v1171_v18 = vld [vmem:[#allocation5 + $0x78] sm:$0xff] }
 0x1ec   :  { %3369 = vrcp.f32 %v506_v29  ;;  %v535_v62 = vmul.f32 1.442695, %v532_v52  ;;  %v1043_v48 = vrot.slane %v1038_v46, %v3861_v14  ;;  %v1047_v49 = vrot.slane %v1038_v46, %v3864_v7  ;;  %v1235_v52 = vld [vmem:[%s4366_s15 + $0x78] sm:$0xff]  ;;  %v1175_v46 = vld [vmem:[#allocation5 + $0x98] sm:$0xff] }
 0x1ed   :  { %3371 = vpow2.f32 %v533_v59 }
 0x1ee   :  { %3373 = vpow2.f32 %v535_v62  ;;  %v2702_v62 = vld [vmem:[%s4366_s15 + $0x160] sm:$0xff] }
 0x1f5   :  { %v3368_v45 = vpop.eup %3367 }
 0x1f6   :  { %v3370_v25 = vpop.eup %3369  ;;  %v511_v53 = vmul.f32 1.0614054, %v3368_v45 }
 0x1f7   :  { %v512_v57 = vmul.f32 1.0614054, %v3370_v25  ;;  %v3372_v51 = vpop.eup %3371 }
 0x1f8   :  { %v513_v0 = vadd.f32 -1.4531521, %v511_v53  ;;  %v3374_v16 = vpop.eup %3373 }
 0x1f9   :  { %v514_v60 = vadd.f32 -1.4531521, %v512_v57  ;;  %v2705_v57 = vld [vmem:[%s4366_s15 + $0x178] sm:$0xff] }
 0x1fa   :  { %v515_v63 = vmul.f32 %v3368_v45, %v513_v0  ;;  %v1232_v0 = vld [vmem:[%s4366_s15 + $0x60] sm:$0xff]  ;;  %v3149_v59 = vpack.c.bf16 %v2705_v57, %v2703_v56  ;;  %v1178_v56 = vld [vmem:[#allocation5 + $0xb0] sm:$0xff] }
 0x1fb   :  { %v516_v61 = vmul.f32 %v3370_v25, %v514_v60  ;;  %v1234_v60 = vld [vmem:[%s4366_s15 + $0x70] sm:$0xff]  ;;  %v1181_v57 = vld [vmem:[#allocation5 + $0xc8] sm:$0xff] }
 0x1fc   :  { %v517_v1 = vadd.f32 1.4214138, %v515_v63  ;;  %v2704_v63 = vld [vmem:[%s4366_s15 + $0x170] sm:$0xff]  ;;  %3150 = vmatprep.subr.bf16.mxu0 %v3149_v59 }
 0x1fd   :  { %v518_v2 = vadd.f32 1.4214138, %v516_v61 }
 0x1fe   :  { %v519_v3 = vmul.f32 %v3368_v45, %v517_v1  ;;  %v2991_v1 = vpack.c.bf16 %v1234_v60, %v1232_v0  ;;  %v1183_v0 = vld [vmem:[#allocation5 + $0xd8] sm:$0xff]  ;;  %v1180_v60 = vld [vmem:[#allocation5 + $0xc0] sm:$0xff] }
 0x1ff   :  { %v520_v4 = vmul.f32 %v3370_v25, %v518_v2  ;;  %v3151_v2 = vpack.c.bf16 %v2704_v63, %v2702_v62  ;;  %v3017_v59 = vpack.c.bf16 %v1183_v0, %v1181_v57  ;;  %v1182_v62 = vld [vmem:[#allocation5 + $0xd0] sm:$0xff]  ;;  %v1185_v63 = vld [vmem:[#allocation5 + $0xe8] sm:$0xff]  ;;  %v1216_v57 = vld [vmem:[#allocation5 + $0x1e0] sm:$0xff] }
 0x200   :  { %v521_v5 = vadd.f32 -0.28449672, %v519_v3  ;;  %v1218_v0 = vld [vmem:[#allocation5 + $0x1f0] sm:$0xff] }
 0x201   :  { %v522_v6 = vadd.f32 -0.28449672, %v520_v4  ;;  %3152 = vmatpush1.bf16.msra.mxu0 %v3151_v2 }
 0x202   :  { %v523_v8 = vmul.f32 %v3368_v45, %v521_v5 }
 0x203   :  { %v524_v10 = vmul.f32 %v3370_v25, %v522_v6  ;;  %v2665_v6 = vld [vmem:[%s4359_s8] ss:$0 sm:$0xff] }
 0x204   :  { %v525_v11 = vadd.f32 0.2548296, %v523_v8 }
 0x205   :  { %v526_v12 = vadd.f32 0.2548296, %v524_v10 }
 0x206   :  { %v527_v13 = vmul.f32 %v3368_v45, %v525_v11  ;;  %v2987_v45 = vpack.c.bf16 %v1230_v44, %v1228_v43  ;;  %v1170_v43 = vld [vmem:[#allocation5 + $0x70] sm:$0xff]  ;;  %v1173_v44 = vld [vmem:[#allocation5 + $0x88] sm:$0xff] }
 0x207   :  { %v528_v15 = vmul.f32 %v3370_v25, %v526_v12  ;;  %v1233_v25 = vld [vmem:[%s4366_s15 + $0x68] sm:$0xff] }
 0x208   :  { %v537_v17 = vmul.f32 %v3372_v51, %v527_v13  ;;  %v2989_v55 = vpack.c.bf16 %v1235_v52, %v1233_v25  ;;  %v1177_v25 = vld [vmem:[#allocation5 + $0xa8] sm:$0xff]  ;;  %v1179_v52 = vld [vmem:[#allocation5 + $0xb8] sm:$0xff] }
 0x209   :  { %v538_v19 = vmul.f32 %v3374_v16, %v528_v15 }
 0x20a   :  { %v539_v23 = vsub.f32 1.0, %v537_v17 }
 0x20b   :  { %v540_v24 = vsub.f32 1.0, %v538_v19 }
 0x20c   :  { %v543_v26 = vsub.f32 0.0, %v539_v23 }
 0x20d   :  { %v544_v27 = vsub.f32 0.0, %v540_v24 }
 0x20e   :  { %v545_v28 = vsel %vm541_vm3, %v543_v26, %v539_v23  ;;  %v1157_v26 = vld [vmem:[#allocation5 + $0x8] sm:$0xff] }
 0x20f   :  { %v546_v29 = vsel %vm542_vm4, %v544_v27, %v540_v24  ;;  %v547_v30 = vadd.f32 1.0, %v545_v28  ;;  %v1159_v27 = vld [vmem:[#allocation5 + $0x18] sm:$0xff] }
 0x210   :  { %v548_v20 = vadd.f32 1.0, %v546_v29  ;;  %v2993_v28 = vpack.c.bf16 %v1159_v27, %v1157_v26  ;;  %v1156_v29 = vld [vmem:[#allocation5] sm:$0xff]  ;;  %v1194_v26 = vld [vmem:[#allocation5 + $0x130] sm:$0xff]  ;;  %v1197_v27 = vld [vmem:[#allocation5 + $0x148] sm:$0xff] }
 0x211   :  { %v549_v37 = vmul.f32 %v547_v30, %v497_v34  ;;  %v1158_v30 = vld [vmem:[#allocation5 + $0x10] sm:$0xff]  ;;  %v2999_v34 = vpack.c.bf16 %v1162_v47, %v1160_v22 }
 0x212   :  { %v550_v35 = vmul.f32 %v548_v20, %v498_v33  ;;  %v2995_v31 = vpack.c.bf16 %v1158_v30, %v1156_v29  ;;  %v1163_v33 = vld [vmem:[#allocation5 + $0x38] sm:$0xff] }
 0x213   :  { %v2997_v20 = vpack.c.bf16 %v1163_v33, %v1161_v32  ;;  %v1198_v32 = vld [vmem:[#allocation5 + $0x150] sm:$0xff]  ;;  %v1201_v33 = vld [vmem:[#allocation5 + $0x168] sm:$0xff] }
 0x214   :  { %654 = vmatprep.mubr.f32.mxu1 %v550_v35  ;;  %v1165_v35 = vld [vmem:[#allocation5 + $0x48] sm:$0xff] }
 0x215   :  { %655 = vmatmul.mubr.f32.vlgmr.msra.gmra.mrb[0].mxu1 %v549_v37 }
 0x216   :  { %2980 = vmatpush1.bf16.msra.mxu1 %v2979_v36  ;;  %1304 = vmatprep.mubr.f32.mxu1 %v3502_v9  ;;  %v1167_v36 = vld [vmem:[#allocation5 + $0x58] sm:$0xff] }
 0x217   :  { %2982 = vmatprep.subr.bf16.mxu1 %v2981_v38  ;;  %v3001_v37 = vpack.c.bf16 %v1167_v36, %v1165_v35  ;;  %v1164_v38 = vld [vmem:[#allocation5 + $0x40] sm:$0xff]  ;;  %v1202_v35 = vld [vmem:[#allocation5 + $0x170] sm:$0xff]  ;;  %v1205_v36 = vld [vmem:[#allocation5 + $0x188] sm:$0xff] }
 0x218   :  { %v3003_v21 = vpack.c.bf16 %v1166_v39, %v1164_v38 }
 0x21a   :  { %2984 = vmatpush1.bf16.msra.mxu1 %v2983_v41  ;;  %v3005_v41 = vpack.c.bf16 %v1171_v18, %v1169_v40  ;;  %v1206_v40 = vld [vmem:[#allocation5 + $0x190] sm:$0xff]  ;;  %v1209_v18 = vld [vmem:[#allocation5 + $0x1a8] sm:$0xff] }
 0x21b   :  { %2986 = vmatprep.subr.bf16.mxu1 %v2985_v42  ;;  %v1168_v42 = vld [vmem:[#allocation5 + $0x60] sm:$0xff] }
 0x21e   :  { %2988 = vmatpush1.bf16.msra.mxu1 %v2987_v45  ;;  %v3007_v45 = vpack.c.bf16 %v1170_v43, %v1168_v42 }
 0x21f   :  { %2990 = vmatprep.subr.bf16.mxu1 %v2989_v55  ;;  %v1176_v55 = vld [vmem:[#allocation5 + $0xa0] sm:$0xff] }
 0x222   :  { %2992 = vmatpush1.bf16.msra.mxu1 %v2991_v1  ;;  %v3019_v1 = vpack.c.bf16 %v1182_v62, %v1180_v60  ;;  %v2673_v60 = vld [vmem:[%s4366_s15 + $0x98] sm:$0xff] }
 0x223   :  { %2994 = vmatprep.subr.bf16.mxu1 %v2993_v28  ;;  %v1199_v28 = vld [vmem:[#allocation5 + $0x158] sm:$0xff] }
 0x224   :  { %v3033_v30 = vpack.c.bf16 %v1199_v28, %v1197_v27 }
 0x268   :  { %v1033_v50 = vpop.f32.mrb[2].mxu0 }
 0x269   :  { %v1050_v53 = vadd.f32 %v1043_v48, %v1033_v50  ;;  %v1035_v54 = vpop.f32.mrb[3].mxu0  ;;  %v1172_v48 = vld [vmem:[#allocation5 + $0x80] sm:$0xff]  ;;  %v3009_v50 = vpack.c.bf16 %v1175_v46, %v1173_v44  ;;  %v1213_v46 = vld [vmem:[#allocation5 + $0x1c8] sm:$0xff] }
 0x26a   :  { %v1051_v58 = vadd.f32 %v1047_v49, %v1035_v54  ;;  %v1174_v49 = vld [vmem:[#allocation5 + $0x90] sm:$0xff]  ;;  %v3013_v54 = vpack.c.bf16 %v1179_v52, %v1177_v25  ;;  %v1208_v44 = vld [vmem:[#allocation5 + $0x1a0] sm:$0xff] }
 0x26b   :  { %v1055_v61 = vsel %vm1054_vm5, %v1050_v53, 0.0  ;;  %v1212_v25 = vld [vmem:[#allocation5 + $0x1c0] sm:$0xff]  ;;  %v1214_v52 = vld [vmem:[#allocation5 + $0x1d0] sm:$0xff] }
 0x26c   :  { %v1056_v3 = vsel %vm1054_vm5, %v1051_v58, 0.0 }
 0x26d   :  { %v1057_v4 = vadd.f32 %v1056_v3, %v1055_v61  ;;  %v1187_v61 = vld [vmem:[#allocation5 + $0xf8] sm:$0xff]  ;;  %v1184_v3 = vld [vmem:[#allocation5 + $0xe0] sm:$0xff] }
 0x26e   :  { %v3021_v2 = vpack.c.bf16 %v1187_v61, %v1185_v63 }
 0x26f   :  { %1058 = vadd.xlane.f32.xlu0 %v1057_v4  ;;  %v1186_v4 = vld [vmem:[#allocation5 + $0xf0] sm:$0xff] }
 0x2e8   :  { %v2763_v5 = vpop.f32.mrb[0].mxu1 }
 0x2e9   :  { %v2764_v8 = vpop.f32.mrb[1].mxu1 }
 0x2ea   :  { %v2765_v10 = vadd.f32 %v2764_v8, %v2763_v5  ;;  %v1189_v5 = vld [vmem:[#allocation5 + $0x108] sm:$0xff]  ;;  %v3023_v8 = vpack.c.bf16 %v1186_v4, %v1184_v3 }
 0x2eb   :  { %v1053_v3 = vld [vmem:[%s4364_s13] sm:$0x3] }
 0x2ec   :  { %v3994_v11 = vadd.f32 %v2765_v10, %v2665_v6  ;;  %v1191_v6 = vld [vmem:[#allocation5 + $0x118] sm:$0xff] }
 0x2ed   :  { %v3025_v10 = vpack.c.bf16 %v1191_v6, %v1189_v5 }
 0x2ee   :  { %2669 = vmatmul.mubr.msk.f32.vlgmr.msra.gmra.mrb[2].mxu1 %vm1236_vm6, %v3994_v11  ;;  %2706 = vmatmul.mubr.msk.f32.vlgmr.msra.gmra.mrb[4].mxu0 %vm1236_vm6, %v3994_v11 }
 0x2ef   :  { %2996 = vmatpush1.bf16.msra.mxu1 %v2995_v31  ;;  %v1196_v31 = vld [vmem:[#allocation5 + $0x140] sm:$0xff] }
 0x2f0   :  { %2998 = vmatprep.subr.bf16.mxu1 %v2997_v20  ;;  %v1203_v20 = vld [vmem:[#allocation5 + $0x178] sm:$0xff]  ;;  %v3035_v22 = vpack.c.bf16 %v1198_v32, %v1196_v31 }
 0x2f1   :  { %v3037_v47 = vpack.c.bf16 %v1203_v20, %v1201_v33 }
 0x2f3   :  { %3000 = vmatpush1.bf16.msra.mxu1 %v2999_v34  ;;  %v1200_v34 = vld [vmem:[#allocation5 + $0x160] sm:$0xff] }
 0x2f4   :  { %3002 = vmatprep.subr.bf16.mxu1 %v3001_v37  ;;  %v1207_v37 = vld [vmem:[#allocation5 + $0x198] sm:$0xff]  ;;  %v3039_v38 = vpack.c.bf16 %v1202_v35, %v1200_v34 }
 0x2f5   :  { %v3041_v39 = vpack.c.bf16 %v1207_v37, %v1205_v36 }
 0x2f7   :  { %3004 = vmatpush1.bf16.msra.mxu1 %v3003_v21  ;;  %v1204_v21 = vld [vmem:[#allocation5 + $0x180] sm:$0xff] }
 0x2f8   :  { %3006 = vmatprep.subr.bf16.mxu1 %v3005_v41  ;;  %v1211_v41 = vld [vmem:[#allocation5 + $0x1b8] sm:$0xff]  ;;  %v3043_v42 = vpack.c.bf16 %v1206_v40, %v1204_v21 }
 0x2f9   :  { %v3045_v43 = vpack.c.bf16 %v1211_v41, %v1209_v18 }
 0x2fb   :  { %3008 = vmatpush1.bf16.msra.mxu1 %v3007_v45  ;;  %v1210_v45 = vld [vmem:[#allocation5 + $0x1b0] sm:$0xff] }
 0x2fc   :  { %v1059_v12 = vpop.xlane.xlu0 %1058  ;;  %3010 = vmatprep.subr.bf16.mxu1 %v3009_v50 }
 0x2fd   :  { %v1061_v13 = vmul.f32 0.00390625, %v1059_v12  ;;  %v1188_v12 = vld [vmem:[#allocation5 + $0x100] sm:$0xff] }
 0x2ff   :  { %v4000_v51 = vsub.f32 %v1050_v53, %v1061_v13  ;;  %v4002_v15 = vsub.f32 %v1051_v58, %v1061_v13  ;;  %v3011_v53 = vpack.c.bf16 %v1174_v49, %v1172_v48  ;;  %v3015_v58 = vpack.c.bf16 %v1178_v56, %v1176_v55  ;;  %v1190_v13 = vld [vmem:[#allocation5 + $0x110] sm:$0xff]  ;;  %v1215_v48 = vld [vmem:[#allocation5 + $0x1d8] sm:$0xff] }
 0x300   :  { %v3047_v49 = vpack.c.bf16 %v1210_v45, %v1208_v44  ;;  %v3049_v50 = vpack.c.bf16 %v1215_v48, %v1213_v46  ;;  %v3051_v55 = vpack.c.bf16 %v1214_v52, %v1212_v25 }
 0x301   :  { %v1064_v16 = vmul.f32 %v4000_v51, %v4000_v51  ;;  %v1065_v17 = vmul.f32 %v4002_v15, %v4002_v15  ;;  %3012 = vmatpush1.bf16.msra.mxu1 %v3011_v53  ;;  %v1217_v53 = vld [vmem:[#allocation5 + $0x1e8] sm:$0xff] }
 0x302   :  { %3014 = vmatprep.subr.bf16.mxu1 %v3013_v54  ;;  %v1219_v54 = vld [vmem:[#allocation5 + $0x1f8] sm:$0xff] }
 0x303   :  { %v1066_v19 = vsel %vm1054_vm5, %v1064_v16, 0.0  ;;  %v1067_v23 = vsel %vm1054_vm5, %v1065_v17, 0.0  ;;  %v1193_v16 = vld [vmem:[#allocation5 + $0x128] sm:$0xff]  ;;  %v1195_v17 = vld [vmem:[#allocation5 + $0x138] sm:$0xff]  ;;  %v3053_v56 = vpack.c.bf16 %v1219_v54, %v1217_v53 }
 0x304   :  { %v1068_v24 = vadd.f32 %v1067_v23, %v1066_v19  ;;  %v3027_v19 = vpack.c.bf16 %v1190_v13, %v1188_v12  ;;  %v3029_v23 = vpack.c.bf16 %v1195_v17, %v1193_v16  ;;  %v1093_v12 = vrot.slane %v1053_v3, %v3861_v14 }
 0x305   :  { %3016 = vmatpush1.bf16.msra.mxu1 %v3015_v58  ;;  %v3055_v58 = vpack.c.bf16 %v1218_v0, %v1216_v57  ;;  %v1097_v13 = vrot.slane %v1053_v3, %v3864_v7  ;;  %v2675_v3 = vld [vmem:[%s4366_s15 + $0xa8] sm:$0xff] }
 0x306   :  { %1069 = vadd.xlane.f32.xlu1 %v1068_v24  ;;  %3018 = vmatprep.subr.bf16.mxu1 %v3017_v59  ;;  %v1192_v24 = vld [vmem:[#allocation5 + $0x120] sm:$0xff]  ;;  %v2671_v59 = vld [vmem:[%s4366_s15 + $0x88] sm:$0xff] }
 0x307   :  { %v3031_v29 = vpack.c.bf16 %v1194_v26, %v1192_v24  ;;  %v3057_v62 = vpack.c.bf16 %v2673_v60, %v2671_v59 }
 0x309   :  { %3020 = vmatpush1.bf16.msra.mxu1 %v3019_v1 }
 0x30a   :  { %3022 = vmatprep.subr.bf16.mxu1 %v3021_v2  ;;  %v1052_v2 = vld [vmem:[%s4363_s12] sm:$0x3] }
 0x30b   :  { %v1080_v4 = vrot.slane %v1052_v2, %v3861_v14  ;;  %v1084_v5 = vrot.slane %v1052_v2, %v3864_v7 }
 0x30d   :  { %3024 = vmatpush1.bf16.msra.mxu1 %v3023_v8 }
 0x30e   :  { %3026 = vmatprep.subr.bf16.mxu1 %v3025_v10 }
 0x311   :  { %3028 = vmatpush1.bf16.msra.mxu1 %v3027_v19 }
 0x312   :  { %3030 = vmatprep.subr.bf16.mxu1 %v3029_v23 }
 0x315   :  { %3032 = vmatpush1.bf16.msra.mxu1 %v3031_v29 }
 0x316   :  { %3034 = vmatprep.subr.bf16.mxu1 %v3033_v30 }
 0x319   :  { %3036 = vmatpush1.bf16.msra.mxu1 %v3035_v22 }
 0x31a   :  { %3038 = vmatprep.subr.bf16.mxu1 %v3037_v47 }
 0x31d   :  { %3040 = vmatpush1.bf16.msra.mxu1 %v3039_v38 }
 0x31e   :  { %3042 = vmatprep.subr.bf16.mxu1 %v3041_v39 }
 0x321   :  { %3044 = vmatpush1.bf16.msra.mxu1 %v3043_v42 }
 0x322   :  { %3046 = vmatprep.subr.bf16.mxu1 %v3045_v43 }
 0x325   :  { %3048 = vmatpush1.bf16.msra.mxu1 %v3047_v49 }
 0x326   :  { %3050 = vmatprep.subr.bf16.mxu1 %v3049_v50 }
 0x329   :  { %3052 = vmatpush1.bf16.msra.mxu1 %v3051_v55 }
 0x32a   :  { %3054 = vmatprep.subr.bf16.mxu1 %v3053_v56 }
 0x32d   :  { %3056 = vmatpush1.bf16.msra.mxu1 %v3055_v58 }
 0x32e   :  { %3058 = vmatprep.subr.bf16.mxu1 %v3057_v62  ;;  %v2670_v62 = vld [vmem:[%s4366_s15 + $0x80] sm:$0xff] }
 0x393   :  { %v1070_v63 = vpop.xlane.xlu1 %1069 }
 0x394   :  { %v1071_v61 = vmul.f32 0.00390625, %v1070_v63  ;;  %v2672_v63 = vld [vmem:[%s4366_s15 + $0x90] sm:$0xff] }
 0x396   :  { %v1072_v1 = vadd.f32 1e-05, %v1071_v61 }
 0x398   :  { %3375 = vrsqrt.f32 %v1072_v1 }
 0x3a2   :  { %v3376_v6 = vpop.eup %3375 }
 0x3a3   :  { %v1074_v8 = vmul.f32 %v3376_v6, %v4000_v51  ;;  %v1075_v10 = vmul.f32 %v3376_v6, %v4002_v15 }
 0x3a5   :  { %v1088_v16 = vmul.f32 %v1084_v5, %v1075_v10  ;;  %v1087_v17 = vmul.f32 %v1080_v4, %v1074_v8  ;;  %v2677_v4 = vld [vmem:[%s4366_s15 + $0xb8] sm:$0xff]  ;;  %v3059_v10 = vpack.c.bf16 %v2672_v63, %v2670_v62  ;;  %v1510_v62 = vld [vmem:[#allocation5 + $0x258] sm:$0xff] }
 0x3a7   :  { %v1101_v19 = vadd.f32 %v1097_v13, %v1088_v16  ;;  %v1100_v23 = vadd.f32 %v1093_v12, %v1087_v17  ;;  %v3061_v13 = vpack.c.bf16 %v2677_v4, %v2675_v3  ;;  %v2674_v16 = vld [vmem:[%s4366_s15 + $0xa0] sm:$0xff]  ;;  %v2676_v17 = vld [vmem:[%s4366_s15 + $0xb0] sm:$0xff] }
 0x3a8   :  { %v1512_v3 = vld [vmem:[#allocation5 + $0x268] sm:$0xff]  ;;  %v1514_v4 = vld [vmem:[#allocation5 + $0x278] sm:$0xff] }
 0x3a9   :  { %v1105_v24 = vmul.f32 0.70710677, %v1101_v19  ;;  %v1104_v26 = vmul.f32 0.70710677, %v1100_v23  ;;  %v1103_v61 = vmul.f32 0.5, %v1101_v19  ;;  %v1102_v5 = vmul.f32 0.5, %v1100_v23 }
 0x3aa   :  { %v2679_v19 = vld [vmem:[%s4366_s15 + $0xc8] sm:$0xff]  ;;  %v2681_v23 = vld [vmem:[%s4366_s15 + $0xd8] sm:$0xff] }
 0x3ab   :  { %v1107_v27 = vand.u32 2147483647, %v1105_v24  ;;  %v1106_v28 = vand.u32 2147483647, %v1104_v26  ;;  %vm1147_vm7 = vcmp.lt.f32.partialorder %v1105_v24, 0.0  ;;  %vm1146_vm8 = vcmp.lt.f32.partialorder %v1104_v26, 0.0 }
 0x3ac   :  { %v3063_v24 = vpack.c.bf16 %v2676_v17, %v2674_v16  ;;  %v3065_v26 = vpack.c.bf16 %v2681_v23, %v2679_v19  ;;  %v1515_v17 = vld [vmem:[#allocation5 + $0x280] sm:$0xff]  ;;  %v1517_v19 = vld [vmem:[#allocation5 + $0x290] sm:$0xff]  ;;  %v1520_v23 = vld [vmem:[#allocation5 + $0x2a8] sm:$0xff] }
 0x3ad   :  { %v1109_v29 = vmul.f32 0.3275911, %v1107_v27  ;;  %v1108_v30 = vmul.f32 0.3275911, %v1106_v28  ;;  %v1135_v51 = vsub.f32 0.0, %v1107_v27  ;;  %v1134_v15 = vsub.f32 0.0, %v1106_v28 }
 0x3af   :  { %v1111_v31 = vadd.f32 1.0, %v1109_v29  ;;  %v1110_v32 = vadd.f32 1.0, %v1108_v30  ;;  %v1137_v20 = vmul.f32 %v1135_v51, %v1107_v27  ;;  %v1136_v34 = vmul.f32 %v1134_v15, %v1106_v28  ;;  %v2678_v27 = vld [vmem:[%s4366_s15 + $0xc0] sm:$0xff]  ;;  %v2680_v28 = vld [vmem:[%s4366_s15 + $0xd0] sm:$0xff]  ;;  %v2683_v29 = vld [vmem:[%s4366_s15 + $0xe8] sm:$0xff] }
 0x3b0   :  { %v2685_v30 = vld [vmem:[%s4366_s15 + $0xf8] sm:$0xff]  ;;  %v2682_v51 = vld [vmem:[%s4366_s15 + $0xe0] sm:$0xff]  ;;  %v2684_v15 = vld [vmem:[%s4366_s15 + $0xf0] sm:$0xff] }
 0x3b1   :  { %3377 = vrcp.f32 %v1111_v31  ;;  %v1140_v37 = vmul.f32 1.442695, %v1137_v20  ;;  %v1138_v21 = vmul.f32 1.442695, %v1136_v34  ;;  %v3067_v31 = vpack.c.bf16 %v2680_v28, %v2678_v27  ;;  %v1382_v20 = vld [vmem:[%s4367_s16] sm:$0x3] }
 0x3b2   :  { %3379 = vrcp.f32 %v1110_v32  ;;  %v3069_v32 = vpack.c.bf16 %v2685_v30, %v2683_v29  ;;  %v1519_v28 = vld [vmem:[#allocation5 + $0x2a0] sm:$0xff]  ;;  %v1521_v29 = vld [vmem:[#allocation5 + $0x2b0] sm:$0xff]  ;;  %v1524_v30 = vld [vmem:[#allocation5 + $0x2c8] sm:$0xff] }
 0x3b3   :  { %3381 = vpow2.f32 %v1140_v37 }
 0x3b4   :  { %3383 = vpow2.f32 %v1138_v21 }
 0x3bb   :  { %v3378_v33 = vpop.eup %3377 }
 0x3bc   :  { %v3380_v22 = vpop.eup %3379  ;;  %v1117_v47 = vmul.f32 1.0614054, %v3378_v33 }
 0x3bd   :  { %v1116_v35 = vmul.f32 1.0614054, %v3380_v22  ;;  %v3382_v52 = vpop.eup %3381 }
 0x3be   :  { %v1119_v36 = vadd.f32 -1.4531521, %v1117_v47  ;;  %v3384_v54 = vpop.eup %3383  ;;  %v1391_v47 = vrot.slane %v1382_v20, %v3864_v7 }
 0x3bf   :  { %v1118_v38 = vadd.f32 -1.4531521, %v1116_v35 }
 0x3c0   :  { %v1121_v39 = vmul.f32 %v3378_v33, %v1119_v36 }
 0x3c1   :  { %v1120_v40 = vmul.f32 %v3380_v22, %v1118_v38 }
 0x3c2   :  { %v1123_v18 = vadd.f32 1.4214138, %v1121_v39 }
 0x3c3   :  { %v1122_v41 = vadd.f32 1.4214138, %v1120_v40 }
 0x3c4   :  { %v1125_v42 = vmul.f32 %v3378_v33, %v1123_v18 }
 0x3c5   :  { %v1124_v43 = vmul.f32 %v3380_v22, %v1122_v41 }
 0x3c6   :  { %v1127_v44 = vadd.f32 -0.28449672, %v1125_v42 }
 0x3c7   :  { %v1126_v45 = vadd.f32 -0.28449672, %v1124_v43 }
 0x3c8   :  { %v1129_v46 = vmul.f32 %v3378_v33, %v1127_v44 }
 0x3c9   :  { %v1128_v48 = vmul.f32 %v3380_v22, %v1126_v45 }
 0x3ca   :  { %v1131_v49 = vadd.f32 0.2548296, %v1129_v46 }
 0x3cb   :  { %v1130_v50 = vadd.f32 0.2548296, %v1128_v48 }
 0x3cc   :  { %v1133_v25 = vmul.f32 %v3378_v33, %v1131_v49  ;;  %v3071_v33 = vpack.c.bf16 %v2684_v15, %v2682_v51  ;;  %v1500_v49 = vld [vmem:[#allocation5 + $0x208] sm:$0xff]  ;;  %v1523_v15 = vld [vmem:[#allocation5 + $0x2c0] sm:$0xff] }
 0x3cd   :  { %v1132_v53 = vmul.f32 %v3380_v22, %v1130_v50  ;;  %v1387_v22 = vrot.slane %v1382_v20, %v3861_v14  ;;  %v1502_v50 = vld [vmem:[#allocation5 + $0x218] sm:$0xff]  ;;  %v1528_v20 = vld [vmem:[#allocation5 + $0x2e8] sm:$0xff] }
 0x3ce   :  { %v1143_v55 = vmul.f32 %v3382_v52, %v1133_v25  ;;  %v3073_v25 = vpack.c.bf16 %v1502_v50, %v1500_v49  ;;  %v1499_v52 = vld [vmem:[#allocation5 + $0x200] sm:$0xff]  ;;  %v1537_v49 = vld [vmem:[#allocation5 + $0x330] sm:$0xff]  ;;  %v1540_v50 = vld [vmem:[#allocation5 + $0x348] sm:$0xff] }
 0x3cf   :  { %v1142_v56 = vmul.f32 %v3384_v54, %v1132_v53  ;;  %v1501_v53 = vld [vmem:[#allocation5 + $0x210] sm:$0xff] }
 0x3d0   :  { %v1145_v57 = vsub.f32 1.0, %v1143_v55  ;;  %v3075_v54 = vpack.c.bf16 %v1501_v53, %v1499_v52  ;;  %v1504_v55 = vld [vmem:[#allocation5 + $0x228] sm:$0xff] }
 0x3d1   :  { %v1144_v0 = vsub.f32 1.0, %v1142_v56  ;;  %v1506_v56 = vld [vmem:[#allocation5 + $0x238] sm:$0xff] }
 0x3d2   :  { %v1149_v58 = vsub.f32 0.0, %v1145_v57 }
 0x3d3   :  { %v1148_v59 = vsub.f32 0.0, %v1144_v0 }
 0x3d4   :  { %v1151_v60 = vsel %vm1147_vm7, %v1149_v58, %v1145_v57  ;;  %v3077_v57 = vpack.c.bf16 %v1506_v56, %v1504_v55  ;;  %v1505_v58 = vld [vmem:[#allocation5 + $0x230] sm:$0xff]  ;;  %v1544_v56 = vld [vmem:[#allocation5 + $0x368] sm:$0xff] }
 0x3d5   :  { %v1153_v1 = vadd.f32 1.0, %v1151_v60  ;;  %v1150_v2 = vsel %vm1146_vm8, %v1148_v59, %v1144_v0  ;;  %v1503_v0 = vld [vmem:[#allocation5 + $0x220] sm:$0xff]  ;;  %v1508_v60 = vld [vmem:[#allocation5 + $0x248] sm:$0xff]  ;;  %v1541_v55 = vld [vmem:[#allocation5 + $0x350] sm:$0xff] }
 0x3d6   :  { %v1152_v6 = vadd.f32 1.0, %v1150_v2  ;;  %v3079_v59 = vpack.c.bf16 %v1505_v58, %v1503_v0  ;;  %v3081_v63 = vpack.c.bf16 %v1510_v62, %v1508_v60  ;;  %v1545_v60 = vld [vmem:[#allocation5 + $0x370] sm:$0xff]  ;;  %v1548_v62 = vld [vmem:[#allocation5 + $0x388] sm:$0xff] }
 0x3d7   :  { %v1155_v8 = vmul.f32 %v1153_v1, %v1103_v61  ;;  %v1507_v61 = vld [vmem:[#allocation5 + $0x240] sm:$0xff]  ;;  %v1509_v1 = vld [vmem:[#allocation5 + $0x250] sm:$0xff] }
 0x3d8   :  { %v1154_v12 = vmul.f32 %v1152_v6, %v1102_v5  ;;  %v3083_v2 = vpack.c.bf16 %v1509_v1, %v1507_v61  ;;  %v1511_v5 = vld [vmem:[#allocation5 + $0x260] sm:$0xff]  ;;  %v3085_v6 = vpack.c.bf16 %v1514_v4, %v1512_v3  ;;  %v1549_v3 = vld [vmem:[#allocation5 + $0x390] sm:$0xff]  ;;  %v1552_v4 = vld [vmem:[#allocation5 + $0x3a8] sm:$0xff] }
 0x3d9   :  { %1375 = vmatprep.mubr.f32.mxu1 %v1155_v8  ;;  %v1513_v8 = vld [vmem:[#allocation5 + $0x270] sm:$0xff] }
 0x3da   :  { %1376 = vmatmul.mubr.f32.vlgmr.msra.gmra.mrb[2].mxu1 %v1154_v12  ;;  %v1518_v12 = vld [vmem:[#allocation5 + $0x298] sm:$0xff] }
 0x3db   :  { %3060 = vmatpush1.bf16.msra.mxu1 %v3059_v10  ;;  %1644 = vmatprep.mubr.f32.mxu1 %v3502_v9  ;;  %v1516_v10 = vld [vmem:[#allocation5 + $0x288] sm:$0xff] }
 0x3dc   :  { %3062 = vmatprep.subr.bf16.mxu1 %v3061_v13  ;;  %v3087_v13 = vpack.c.bf16 %v1513_v8, %v1511_v5  ;;  %v3089_v16 = vpack.c.bf16 %v1518_v12, %v1516_v10  ;;  %v1554_v5 = vld [vmem:[#allocation5 + $0x3b8] sm:$0xff]  ;;  %v1551_v10 = vld [vmem:[#allocation5 + $0x3a0] sm:$0xff]  ;;  %v1553_v12 = vld [vmem:[#allocation5 + $0x3b0] sm:$0xff] }
 0x3dd   :  { %v3125_v8 = vpack.c.bf16 %v1554_v5, %v1552_v4 }
 0x3df   :  { %3064 = vmatpush1.bf16.msra.mxu1 %v3063_v24  ;;  %v1522_v24 = vld [vmem:[#allocation5 + $0x2b8] sm:$0xff] }
 0x3e0   :  { %3066 = vmatprep.subr.bf16.mxu1 %v3065_v26  ;;  %v3091_v26 = vpack.c.bf16 %v1517_v19, %v1515_v17  ;;  %v3093_v27 = vpack.c.bf16 %v1522_v24, %v1520_v23  ;;  %v3127_v17 = vpack.c.bf16 %v1553_v12, %v1551_v10  ;;  %v1555_v23 = vld [vmem:[#allocation5 + $0x3c0] sm:$0xff]  ;;  %v1557_v24 = vld [vmem:[#allocation5 + $0x3d0] sm:$0xff] }
 0x3e3   :  { %3068 = vmatpush1.bf16.msra.mxu1 %v3067_v31  ;;  %v1526_v31 = vld [vmem:[#allocation5 + $0x2d8] sm:$0xff] }
 0x3e4   :  { %3070 = vmatprep.subr.bf16.mxu1 %v3069_v32  ;;  %v3095_v32 = vpack.c.bf16 %v1521_v29, %v1519_v28  ;;  %v3097_v51 = vpack.c.bf16 %v1526_v31, %v1524_v30  ;;  %v3131_v28 = vpack.c.bf16 %v1557_v24, %v1555_v23  ;;  %v1559_v30 = vld [vmem:[#allocation5 + $0x3e0] sm:$0xff]  ;;  %v1561_v31 = vld [vmem:[#allocation5 + $0x3f0] sm:$0xff] }
 0x3e7   :  { %3072 = vmatpush1.bf16.msra.mxu1 %v3071_v33  ;;  %v1525_v33 = vld [vmem:[#allocation5 + $0x2d0] sm:$0xff] }
 0x3e8   :  { %3074 = vmatprep.subr.bf16.mxu1 %v3073_v25  ;;  %v1542_v25 = vld [vmem:[#allocation5 + $0x358] sm:$0xff] }
 0x3e9   :  { %v3113_v53 = vpack.c.bf16 %v1542_v25, %v1540_v50 }
 0x3ea   :  { %2686 = vmatmul.mubr.msk.f32.vlgmr.msra.gmra.mrb[4].mxu1 %vm1236_vm6, %v3994_v11 }
 0x3eb   :  { %3076 = vmatpush1.bf16.msra.mxu1 %v3075_v54  ;;  %v1539_v54 = vld [vmem:[#allocation5 + $0x340] sm:$0xff] }
 0x3ec   :  { %3078 = vmatprep.subr.bf16.mxu1 %v3077_v57  ;;  %v1546_v57 = vld [vmem:[#allocation5 + $0x378] sm:$0xff]  ;;  %v3115_v0 = vpack.c.bf16 %v1541_v55, %v1539_v54 }
 0x3ed   :  { %v3117_v58 = vpack.c.bf16 %v1546_v57, %v1544_v56 }
 0x3ef   :  { %3080 = vmatpush1.bf16.msra.mxu1 %v3079_v59  ;;  %v1543_v59 = vld [vmem:[#allocation5 + $0x360] sm:$0xff] }
 0x3f0   :  { %3082 = vmatprep.subr.bf16.mxu1 %v3081_v63  ;;  %v1550_v63 = vld [vmem:[#allocation5 + $0x398] sm:$0xff]  ;;  %v3119_v61 = vpack.c.bf16 %v1545_v60, %v1543_v59 }
 0x3f1   :  { %v3121_v1 = vpack.c.bf16 %v1550_v63, %v1548_v62 }
 0x3f3   :  { %3084 = vmatpush1.bf16.msra.mxu1 %v3083_v2  ;;  %v1547_v2 = vld [vmem:[#allocation5 + $0x380] sm:$0xff] }
 0x3f4   :  { %3086 = vmatprep.subr.bf16.mxu1 %v3085_v6  ;;  %v3123_v6 = vpack.c.bf16 %v1549_v3, %v1547_v2 }
 0x3f7   :  { %3088 = vmatpush1.bf16.msra.mxu1 %v3087_v13  ;;  %v1556_v13 = vld [vmem:[#allocation5 + $0x3c8] sm:$0xff] }
 0x3f8   :  { %3090 = vmatprep.subr.bf16.mxu1 %v3089_v16  ;;  %v1558_v16 = vld [vmem:[#allocation5 + $0x3d8] sm:$0xff] }
 0x3f9   :  { %v3129_v19 = vpack.c.bf16 %v1558_v16, %v1556_v13 }
 0x3fb   :  { %3092 = vmatpush1.bf16.msra.mxu1 %v3091_v26  ;;  %v1560_v26 = vld [vmem:[#allocation5 + $0x3e8] sm:$0xff] }
 0x3fc   :  { %3094 = vmatprep.subr.bf16.mxu1 %v3093_v27  ;;  %v1562_v27 = vld [vmem:[#allocation5 + $0x3f8] sm:$0xff] }
 0x3fd   :  { %v3133_v29 = vpack.c.bf16 %v1562_v27, %v1560_v26 }
 0x3ff   :  { %3096 = vmatpush1.bf16.msra.mxu1 %v3095_v32  ;;  %v3135_v32 = vpack.c.bf16 %v1561_v31, %v1559_v30 }
 0x400   :  { %3098 = vmatprep.subr.bf16.mxu1 %v3097_v51  ;;  %v2711_v51 = vld [vmem:[%s4366_s15 + $0x188] sm:$0xff] }
 0x4ad   :  { %v1377_v34 = vpop.f32.mrb[2].mxu1 }
 0x4ae   :  { %v1394_v35 = vadd.f32 %v1387_v22, %v1377_v34  ;;  %v1379_v36 = vpop.f32.mrb[3].mxu1  ;;  %v1530_v22 = vld [vmem:[#allocation5 + $0x2f8] sm:$0xff] }
 0x4af   :  { %v1395_v37 = vadd.f32 %v1391_v47, %v1379_v36  ;;  %v3099_v47 = vpack.c.bf16 %v1525_v33, %v1523_v15  ;;  %v3101_v34 = vpack.c.bf16 %v1530_v22, %v1528_v20  ;;  %v1529_v36 = vld [vmem:[#allocation5 + $0x2f0] sm:$0xff]  ;;  %v2713_v15 = vld [vmem:[%s4366_s15 + $0x198] sm:$0xff] }
 0x4b0   :  { %v1398_v38 = vsel %vm1054_vm5, %v1394_v35, 0.0  ;;  %v3217_v33 = vpack.c.bf16 %v2713_v15, %v2711_v51 }
 0x4b1   :  { %v1399_v39 = vsel %vm1054_vm5, %v1395_v37, 0.0  ;;  %3100 = vmatpush1.bf16.msra.mxu1 %v3099_v47 }
 0x4b2   :  { %v1400_v21 = vadd.f32 %v1399_v39, %v1398_v38  ;;  %v1534_v38 = vld [vmem:[#allocation5 + $0x318] sm:$0xff]  ;;  %3102 = vmatprep.subr.bf16.mxu1 %v3101_v34  ;;  %v1396_v34 = vld [vmem:[%s4368_s17] sm:$0x3] }
 0x4b4   :  { %1401 = vadd.xlane.f32.xlu1 %v1400_v21 }
 0x541   :  { %v1402_v40 = vpop.xlane.xlu1 %1401 }
 0x542   :  { %v1403_v18 = vmul.f32 0.00390625, %v1402_v40  ;;  %v1531_v40 = vld [vmem:[#allocation5 + $0x300] sm:$0xff] }
 0x544   :  { %v4080_v41 = vsub.f32 %v1394_v35, %v1403_v18  ;;  %v4082_v42 = vsub.f32 %v1395_v37, %v1403_v18  ;;  %v1527_v35 = vld [vmem:[#allocation5 + $0x2e0] sm:$0xff]  ;;  %v1532_v37 = vld [vmem:[#allocation5 + $0x308] sm:$0xff]  ;;  %v1533_v18 = vld [vmem:[#allocation5 + $0x310] sm:$0xff] }
 0x545   :  { %v3103_v39 = vpack.c.bf16 %v1529_v36, %v1527_v35  ;;  %v3105_v21 = vpack.c.bf16 %v1534_v38, %v1532_v37  ;;  %v1397_v35 = vld [vmem:[%s4369_s18] sm:$0x3]  ;;  %v1422_v36 = vrot.slane %v1396_v34, %v3861_v14  ;;  %v1426_v37 = vrot.slane %v1396_v34, %v3864_v7 }
 0x546   :  { %v1406_v43 = vmul.f32 %v4080_v41, %v4080_v41  ;;  %v1407_v44 = vmul.f32 %v4082_v42, %v4082_v42 }
 0x547   :  { %3104 = vmatpush1.bf16.msra.mxu1 %v3103_v39 }
 0x548   :  { %v1408_v45 = vsel %vm1054_vm5, %v1406_v43, 0.0  ;;  %v1409_v46 = vsel %vm1054_vm5, %v1407_v44, 0.0  ;;  %v1536_v43 = vld [vmem:[#allocation5 + $0x328] sm:$0xff]  ;;  %v1538_v44 = vld [vmem:[#allocation5 + $0x338] sm:$0xff]  ;;  %3106 = vmatprep.subr.bf16.mxu1 %v3105_v21 }
 0x549   :  { %v1410_v48 = vadd.f32 %v1409_v46, %v1408_v45  ;;  %v3107_v45 = vpack.c.bf16 %v1533_v18, %v1531_v40  ;;  %v3109_v46 = vpack.c.bf16 %v1538_v44, %v1536_v43  ;;  %v1435_v40 = vrot.slane %v1397_v35, %v3861_v14 }
 0x54a   :  { %v1439_v18 = vrot.slane %v1397_v35, %v3864_v7  ;;  %v2715_v35 = vld [vmem:[%s4366_s15 + $0x1a8] sm:$0xff] }
 0x54b   :  { %1411 = vadd.xlane.f32.xlu1 %v1410_v48  ;;  %v1535_v48 = vld [vmem:[#allocation5 + $0x320] sm:$0xff]  ;;  %3108 = vmatpush1.bf16.msra.mxu1 %v3107_v45 }
 0x54c   :  { %v3111_v52 = vpack.c.bf16 %v1537_v49, %v1535_v48  ;;  %3110 = vmatprep.subr.bf16.mxu1 %v3109_v46 }
 0x54f   :  { %3112 = vmatpush1.bf16.msra.mxu1 %v3111_v52 }
 0x550   :  { %3114 = vmatprep.subr.bf16.mxu1 %v3113_v53 }
 0x553   :  { %3116 = vmatpush1.bf16.msra.mxu1 %v3115_v0 }
 0x554   :  { %3118 = vmatprep.subr.bf16.mxu1 %v3117_v58 }
 0x557   :  { %3120 = vmatpush1.bf16.msra.mxu1 %v3119_v61 }
 0x558   :  { %3122 = vmatprep.subr.bf16.mxu1 %v3121_v1 }
 0x55b   :  { %3124 = vmatpush1.bf16.msra.mxu1 %v3123_v6 }
 0x55c   :  { %3126 = vmatprep.subr.bf16.mxu1 %v3125_v8 }
 0x55f   :  { %3128 = vmatpush1.bf16.msra.mxu1 %v3127_v17 }
 0x560   :  { %3130 = vmatprep.subr.bf16.mxu1 %v3129_v19 }
 0x563   :  { %3132 = vmatpush1.bf16.msra.mxu1 %v3131_v28 }
 0x564   :  { %3134 = vmatprep.subr.bf16.mxu1 %v3133_v29 }
 0x567   :  { %3136 = vmatpush1.bf16.msra.mxu1 %v3135_v32 }
 0x568   :  { %3218 = vmatprep.subr.bf16.mxu1 %v3217_v33  ;;  %v2710_v33 = vld [vmem:[%s4366_s15 + $0x180] sm:$0xff] }
 0x5d8   :  { %v1412_v20 = vpop.xlane.xlu1 %1411 }
 0x5d9   :  { %v1413_v22 = vmul.f32 0.00390625, %v1412_v20  ;;  %v2712_v20 = vld [vmem:[%s4366_s15 + $0x190] sm:$0xff] }
 0x5db   :  { %v1414_v47 = vadd.f32 1e-05, %v1413_v22 }
 0x5dd   :  { %3385 = vrsqrt.f32 %v1414_v47 }
 0x5e7   :  { %v3386_v38 = vpop.eup %3385 }
 0x5e8   :  { %v1416_v39 = vmul.f32 %v3386_v38, %v4080_v41  ;;  %v1417_v21 = vmul.f32 %v3386_v38, %v4082_v42 }
 0x5ea   :  { %v1430_v43 = vmul.f32 %v1426_v37, %v1417_v21  ;;  %v1429_v44 = vmul.f32 %v1422_v36, %v1416_v39  ;;  %v2717_v36 = vld [vmem:[%s4366_s15 + $0x1b8] sm:$0xff]  ;;  %v3219_v21 = vpack.c.bf16 %v2712_v20, %v2710_v33  ;;  %v1852_v20 = vld [vmem:[#allocation5 + $0x450] sm:$0xff] }
 0x5eb   :  { %v1850_v33 = vld [vmem:[#allocation5 + $0x440] sm:$0xff] }
 0x5ec   :  { %v1443_v45 = vadd.f32 %v1439_v18, %v1430_v43  ;;  %v1442_v46 = vadd.f32 %v1435_v40, %v1429_v44  ;;  %v3221_v18 = vpack.c.bf16 %v2717_v36, %v2715_v35  ;;  %v2714_v43 = vld [vmem:[%s4366_s15 + $0x1a0] sm:$0xff]  ;;  %v2716_v44 = vld [vmem:[%s4366_s15 + $0x1b0] sm:$0xff]  ;;  %v1854_v35 = vld [vmem:[#allocation5 + $0x460] sm:$0xff] }
 0x5ee   :  { %v1447_v48 = vmul.f32 0.70710677, %v1443_v45  ;;  %v1446_v49 = vmul.f32 0.70710677, %v1442_v46  ;;  %v1445_v22 = vmul.f32 0.5, %v1443_v45  ;;  %v1444_v37 = vmul.f32 0.5, %v1442_v46 }
 0x5ef   :  { %v2719_v45 = vld [vmem:[%s4366_s15 + $0x1c8] sm:$0xff]  ;;  %v2721_v46 = vld [vmem:[%s4366_s15 + $0x1d8] sm:$0xff] }
 0x5f0   :  { %v1449_v50 = vand.u32 2147483647, %v1447_v48  ;;  %v1448_v25 = vand.u32 2147483647, %v1446_v49  ;;  %vm1489_vm9 = vcmp.lt.f32.partialorder %v1447_v48, 0.0  ;;  %vm1488_vm10 = vcmp.lt.f32.partialorder %v1446_v49, 0.0 }
 0x5f1   :  { %v3223_v48 = vpack.c.bf16 %v2716_v44, %v2714_v43  ;;  %v3225_v49 = vpack.c.bf16 %v2721_v46, %v2719_v45  ;;  %v1860_v43 = vld [vmem:[#allocation5 + $0x490] sm:$0xff]  ;;  %v1863_v44 = vld [vmem:[#allocation5 + $0x4a8] sm:$0xff]  ;;  %v1865_v45 = vld [vmem:[#allocation5 + $0x4b8] sm:$0xff] }
 0x5f2   :  { %v1451_v52 = vmul.f32 0.3275911, %v1449_v50  ;;  %v1450_v53 = vmul.f32 0.3275911, %v1448_v25  ;;  %v1477_v41 = vsub.f32 0.0, %v1449_v50  ;;  %v1476_v42 = vsub.f32 0.0, %v1448_v25 }
 0x5f4   :  { %v1453_v54 = vadd.f32 1.0, %v1451_v52  ;;  %v1452_v55 = vadd.f32 1.0, %v1450_v53  ;;  %v1479_v57 = vmul.f32 %v1477_v41, %v1449_v50  ;;  %v1478_v59 = vmul.f32 %v1476_v42, %v1448_v25  ;;  %v2718_v50 = vld [vmem:[%s4366_s15 + $0x1c0] sm:$0xff]  ;;  %v2720_v25 = vld [vmem:[%s4366_s15 + $0x1d0] sm:$0xff]  ;;  %v2723_v52 = vld [vmem:[%s4366_s15 + $0x1e8] sm:$0xff] }
 0x5f5   :  { %v2725_v53 = vld [vmem:[%s4366_s15 + $0x1f8] sm:$0xff]  ;;  %v2724_v41 = vld [vmem:[%s4366_s15 + $0x1f0] sm:$0xff] }
 0x5f6   :  { %3387 = vrcp.f32 %v1453_v54  ;;  %v1482_v63 = vmul.f32 1.442695, %v1479_v57  ;;  %v1480_v2 = vmul.f32 1.442695, %v1478_v59  ;;  %v3229_v54 = vpack.c.bf16 %v2725_v53, %v2723_v52  ;;  %v1869_v52 = vld [vmem:[#allocation5 + $0x4d8] sm:$0xff] }
 0x5f7   :  { %3389 = vrcp.f32 %v1452_v55  ;;  %v2722_v55 = vld [vmem:[%s4366_s15 + $0x1e0] sm:$0xff] }
 0x5f8   :  { %3391 = vpow2.f32 %v1482_v63  ;;  %v3231_v42 = vpack.c.bf16 %v2724_v41, %v2722_v55  ;;  %v1868_v55 = vld [vmem:[#allocation5 + $0x4d0] sm:$0xff]  ;;  %v1871_v41 = vld [vmem:[#allocation5 + $0x4e8] sm:$0xff] }
 0x5f9   :  { %3393 = vpow2.f32 %v1480_v2 }
 0x600   :  { %v3388_v56 = vpop.eup %3387 }
 0x601   :  { %v3390_v0 = vpop.eup %3389  ;;  %v1459_v58 = vmul.f32 1.0614054, %v3388_v56 }
 0x602   :  { %v1458_v60 = vmul.f32 1.0614054, %v3390_v0  ;;  %v3392_v24 = vpop.eup %3391 }
 0x603   :  { %v1461_v62 = vadd.f32 -1.4531521, %v1459_v58  ;;  %v3394_v27 = vpop.eup %3393 }
 0x604   :  { %v1460_v61 = vadd.f32 -1.4531521, %v1458_v60 }
 0x605   :  { %v1463_v1 = vmul.f32 %v3388_v56, %v1461_v62 }
 0x606   :  { %v1462_v3 = vmul.f32 %v3390_v0, %v1460_v61 }
 0x607   :  { %v1465_v4 = vadd.f32 1.4214138, %v1463_v1 }
 0x608   :  { %v1464_v5 = vadd.f32 1.4214138, %v1462_v3 }
 0x609   :  { %v1467_v6 = vmul.f32 %v3388_v56, %v1465_v4 }
 0x60a   :  { %v1466_v8 = vmul.f32 %v3390_v0, %v1464_v5 }
 0x60b   :  { %v1469_v10 = vadd.f32 -0.28449672, %v1467_v6 }
 0x60c   :  { %v1468_v12 = vadd.f32 -0.28449672, %v1466_v8 }
 0x60d   :  { %v1471_v13 = vmul.f32 %v3388_v56, %v1469_v10 }
 0x60e   :  { %v1470_v16 = vmul.f32 %v3390_v0, %v1468_v12 }
 0x60f   :  { %v1473_v17 = vadd.f32 0.2548296, %v1471_v13  ;;  %v1843_v13 = vld [vmem:[#allocation5 + $0x408] sm:$0xff] }
 0x610   :  { %v1472_v19 = vadd.f32 0.2548296, %v1470_v16  ;;  %v1845_v16 = vld [vmem:[#allocation5 + $0x418] sm:$0xff] }
 0x611   :  { %v1475_v23 = vmul.f32 %v3388_v56, %v1473_v17  ;;  %v2687_v56 = vld [vmem:[%s4367_s16 + $0x2] sm:$0x3]  ;;  %v3153_v17 = vpack.c.bf16 %v1845_v16, %v1843_v13  ;;  %v1885_v13 = vld [vmem:[#allocation5 + $0x558] sm:$0xff] }
 0x612   :  { %v1474_v26 = vmul.f32 %v3390_v0, %v1472_v19  ;;  %v1728_v57 = vrot.slane %v2687_v56, %v3861_v14  ;;  %v1732_v0 = vrot.slane %v2687_v56, %v3864_v7  ;;  %v1842_v19 = vld [vmem:[#allocation5 + $0x400] sm:$0xff] }
 0x613   :  { %v1485_v28 = vmul.f32 %v3392_v24, %v1475_v23  ;;  %v1844_v23 = vld [vmem:[#allocation5 + $0x410] sm:$0xff]  ;;  %3154 = vmatprep.subr.bf16.mxu0 %v3153_v17 }
 0x614   :  { %v1484_v29 = vmul.f32 %v3394_v27, %v1474_v26  ;;  %v3155_v24 = vpack.c.bf16 %v1844_v23, %v1842_v19  ;;  %v1847_v26 = vld [vmem:[#allocation5 + $0x428] sm:$0xff]  ;;  %v1849_v27 = vld [vmem:[#allocation5 + $0x438] sm:$0xff]  ;;  %v1882_v19 = vld [vmem:[#allocation5 + $0x540] sm:$0xff] }
 0x615   :  { %v1487_v30 = vsub.f32 1.0, %v1485_v28  ;;  %v3157_v28 = vpack.c.bf16 %v1849_v27, %v1847_v26  ;;  %v1884_v23 = vld [vmem:[#allocation5 + $0x550] sm:$0xff]  ;;  %v1889_v26 = vld [vmem:[#allocation5 + $0x578] sm:$0xff] }
 0x616   :  { %v1486_v31 = vsub.f32 1.0, %v1484_v29  ;;  %3156 = vmatpush1.bf16.msra.mxu0 %v3155_v24  ;;  %v1846_v29 = vld [vmem:[#allocation5 + $0x420] sm:$0xff]  ;;  %v1887_v24 = vld [vmem:[#allocation5 + $0x568] sm:$0xff]  ;;  %v3195_v27 = vpack.c.bf16 %v1884_v23, %v1882_v19 }
 0x617   :  { %v1491_v32 = vsub.f32 0.0, %v1487_v30  ;;  %3158 = vmatprep.subr.bf16.mxu0 %v3157_v28  ;;  %v3197_v28 = vpack.c.bf16 %v1889_v26, %v1887_v24 }
 0x618   :  { %v1490_v51 = vsub.f32 0.0, %v1486_v31 }
 0x619   :  { %v1493_v15 = vsel %vm1489_vm9, %v1491_v32, %v1487_v30  ;;  %v1848_v30 = vld [vmem:[#allocation5 + $0x430] sm:$0xff]  ;;  %v1851_v32 = vld [vmem:[#allocation5 + $0x448] sm:$0xff] }
 0x61a   :  { %v1495_v47 = vadd.f32 1.0, %v1493_v15  ;;  %v1492_v34 = vsel %vm1488_vm10, %v1490_v51, %v1486_v31  ;;  %v3159_v31 = vpack.c.bf16 %v1848_v30, %v1846_v29  ;;  %v1853_v51 = vld [vmem:[#allocation5 + $0x458] sm:$0xff]  ;;  %v1886_v29 = vld [vmem:[#allocation5 + $0x560] sm:$0xff]  ;;  %v1888_v30 = vld [vmem:[#allocation5 + $0x570] sm:$0xff] }
 0x61b   :  { %v1494_v38 = vadd.f32 1.0, %v1492_v34  ;;  %v3161_v15 = vpack.c.bf16 %v1853_v51, %v1851_v32  ;;  %v1857_v34 = vld [vmem:[#allocation5 + $0x478] sm:$0xff]  ;;  %v3199_v51 = vpack.c.bf16 %v1888_v30, %v1886_v29 }
 0x61c   :  { %v1497_v39 = vmul.f32 %v1495_v47, %v1445_v22  ;;  %3160 = vmatpush1.bf16.msra.mxu0 %v3159_v31  ;;  %v3163_v22 = vpack.c.bf16 %v1852_v20, %v1850_v33  ;;  %v1855_v47 = vld [vmem:[#allocation5 + $0x468] sm:$0xff]  ;;  %v1893_v32 = vld [vmem:[#allocation5 + $0x598] sm:$0xff]  ;;  %v1890_v33 = vld [vmem:[#allocation5 + $0x580] sm:$0xff] }
 0x61d   :  { %v1496_v40 = vmul.f32 %v1494_v38, %v1444_v37  ;;  %3162 = vmatprep.subr.bf16.mxu0 %v3161_v15  ;;  %v3165_v36 = vpack.c.bf16 %v1857_v34, %v1855_v47  ;;  %v1856_v37 = vld [vmem:[#allocation5 + $0x470] sm:$0xff]  ;;  %v1859_v38 = vld [vmem:[#allocation5 + $0x488] sm:$0xff]  ;;  %v1897_v47 = vld [vmem:[#allocation5 + $0x5b8] sm:$0xff] }
 0x61e   :  { %1715 = vmatprep.mubr.f32.mxu1 %v1497_v39  ;;  %v1861_v39 = vld [vmem:[#allocation5 + $0x498] sm:$0xff]  ;;  %v1891_v31 = vld [vmem:[#allocation5 + $0x588] sm:$0xff]  ;;  %v1892_v20 = vld [vmem:[#allocation5 + $0x590] sm:$0xff] }
 0x61f   :  { %1716 = vmatmul.mubr.f32.vlgmr.msra.gmra.mrb[4].mxu1 %v1496_v40  ;;  %v3169_v40 = vpack.c.bf16 %v1861_v39, %v1859_v38  ;;  %v3201_v15 = vpack.c.bf16 %v1893_v32, %v1891_v31  ;;  %v3203_v34 = vpack.c.bf16 %v1892_v20, %v1890_v33  ;;  %v1899_v38 = vld [vmem:[#allocation5 + $0x5c8] sm:$0xff]  ;;  %v1901_v39 = vld [vmem:[#allocation5 + $0x5d8] sm:$0xff] }
 0x620   :  { %3220 = vmatpush1.bf16.msra.mxu1 %v3219_v21  ;;  %2330 = vmatprep.mubr.f32.mxu1 %v3502_v9  ;;  %v3227_v9 = vpack.c.bf16 %v2720_v25, %v2718_v50  ;;  %v3167_v21 = vpack.c.bf16 %v1856_v37, %v1854_v35  ;;  %v1864_v50 = vld [vmem:[#allocation5 + $0x4b0] sm:$0xff]  ;;  %v1867_v25 = vld [vmem:[#allocation5 + $0x4c8] sm:$0xff] }
 0x621   :  { %3222 = vmatprep.subr.bf16.mxu1 %v3221_v18  ;;  %3164 = vmatpush1.bf16.msra.mxu0 %v3163_v22  ;;  %v1858_v18 = vld [vmem:[#allocation5 + $0x480] sm:$0xff]  ;;  %v1895_v22 = vld [vmem:[#allocation5 + $0x5a8] sm:$0xff]  ;;  %v1896_v37 = vld [vmem:[#allocation5 + $0x5b0] sm:$0xff] }
 0x622   :  { %3166 = vmatprep.subr.bf16.mxu0 %v3165_v36  ;;  %v3171_v46 = vpack.c.bf16 %v1860_v43, %v1858_v18  ;;  %v3205_v35 = vpack.c.bf16 %v1897_v47, %v1895_v22  ;;  %v1894_v36 = vld [vmem:[#allocation5 + $0x5a0] sm:$0xff]  ;;  %v1900_v43 = vld [vmem:[#allocation5 + $0x5d0] sm:$0xff] }
 0x623   :  { %v1898_v18 = vld [vmem:[#allocation5 + $0x5c0] sm:$0xff] }
 0x624   :  { %3224 = vmatpush1.bf16.msra.mxu1 %v3223_v48  ;;  %v3173_v48 = vpack.c.bf16 %v1865_v45, %v1863_v44  ;;  %v1903_v44 = vld [vmem:[#allocation5 + $0x5e8] sm:$0xff]  ;;  %v1905_v45 = vld [vmem:[#allocation5 + $0x5f8] sm:$0xff] }
 0x625   :  { %3226 = vmatprep.subr.bf16.mxu1 %v3225_v49  ;;  %3168 = vmatpush1.bf16.msra.mxu0 %v3167_v21  ;;  %v1862_v49 = vld [vmem:[#allocation5 + $0x4a0] sm:$0xff]  ;;  %v3207_v21 = vpack.c.bf16 %v1896_v37, %v1894_v36 }
 0x626   :  { %3170 = vmatprep.subr.bf16.mxu0 %v3169_v40  ;;  %v3175_v53 = vpack.c.bf16 %v1864_v50, %v1862_v49  ;;  %v3209_v40 = vpack.c.bf16 %v1901_v39, %v1899_v38  ;;  %v1902_v49 = vld [vmem:[#allocation5 + $0x5e0] sm:$0xff]  ;;  %v1904_v50 = vld [vmem:[#allocation5 + $0x5f0] sm:$0xff] }
 0x628   :  { %3228 = vmatpush1.bf16.msra.mxu1 %v3227_v9  ;;  %v3177_v9 = vpack.c.bf16 %v1869_v52, %v1867_v25  ;;  %v3215_v25 = vpack.c.bf16 %v1904_v50, %v1902_v49 }
 0x629   :  { %3230 = vmatprep.subr.bf16.mxu1 %v3229_v54  ;;  %3172 = vmatpush1.bf16.msra.mxu0 %v3171_v46  ;;  %v1866_v54 = vld [vmem:[#allocation5 + $0x4c0] sm:$0xff]  ;;  %v3211_v46 = vpack.c.bf16 %v1900_v43, %v1898_v18 }
 0x62a   :  { %3174 = vmatprep.subr.bf16.mxu0 %v3173_v48  ;;  %v3179_v56 = vpack.c.bf16 %v1868_v55, %v1866_v54  ;;  %v3213_v48 = vpack.c.bf16 %v1905_v45, %v1903_v44  ;;  %v2688_v54 = vld [vmem:[%s4368_s17 + $0x2] sm:$0x3] }
 0x62b   :  { %v2689_v55 = vld [vmem:[%s4369_s18 + $0x2] sm:$0x3] }
 0x62c   :  { %3232 = vmatpush1.bf16.msra.mxu1 %v3231_v42  ;;  %v1873_v42 = vld [vmem:[#allocation5 + $0x4f8] sm:$0xff] }
 0x62d   :  { %3176 = vmatpush1.bf16.msra.mxu0 %v3175_v53 }
 0x62e   :  { %3178 = vmatprep.subr.bf16.mxu0 %v3177_v9 }
 0x62f   :  { %2726 = vmatmul.mubr.msk.f32.vlgmr.msra.gmra.mrb[6].mxu1 %vm1236_vm6, %v3994_v11 }
 0x631   :  { %3180 = vmatpush1.bf16.msra.mxu0 %v3179_v56 }
 0x6f2   :  { %v1717_v58 = vpop.f32.mrb[4].mxu1 }
 0x6f3   :  { %v1735_v59 = vadd.f32 %v1728_v57, %v1717_v58  ;;  %v1719_v60 = vpop.f32.mrb[5].mxu1  ;;  %v3181_v57 = vpack.c.bf16 %v1873_v42, %v1871_v41  ;;  %v1872_v58 = vld [vmem:[#allocation5 + $0x4f0] sm:$0xff]  ;;  %v1765_v41 = vrot.slane %v2688_v54, %v3861_v14  ;;  %v1769_v42 = vrot.slane %v2688_v54, %v3864_v7 }
 0x6f4   :  { %v1736_v62 = vadd.f32 %v1732_v0, %v1719_v60  ;;  %v1870_v0 = vld [vmem:[#allocation5 + $0x4e0] sm:$0xff]  ;;  %v1877_v60 = vld [vmem:[#allocation5 + $0x518] sm:$0xff] }
 0x6f5   :  { %v1741_v63 = vsel %vm1054_vm5, %v1735_v59, 0.0  ;;  %3182 = vmatprep.subr.bf16.mxu0 %v3181_v57 }
 0x6f6   :  { %v1742_v61 = vsel %vm1054_vm5, %v1736_v62, 0.0 }
 0x6f7   :  { %v1743_v1 = vadd.f32 %v1742_v61, %v1741_v63  ;;  %v1874_v61 = vld [vmem:[#allocation5 + $0x500] sm:$0xff] }
 0x6f9   :  { %1744 = vadd.xlane.f32.xlu1 %v1743_v1  ;;  %v1876_v1 = vld [vmem:[#allocation5 + $0x510] sm:$0xff] }
 0x786   :  { %v1745_v2 = vpop.xlane.xlu1 %1744 }
 0x787   :  { %v1746_v11 = vmul.f32 0.00390625, %v1745_v2  ;;  %v1879_v2 = vld [vmem:[#allocation5 + $0x528] sm:$0xff] }
 0x789   :  { %v4160_v3 = vsub.f32 %v1735_v59, %v1746_v11  ;;  %v4162_v4 = vsub.f32 %v1736_v62, %v1746_v11  ;;  %v1875_v59 = vld [vmem:[#allocation5 + $0x508] sm:$0xff]  ;;  %v3183_v62 = vpack.c.bf16 %v1872_v58, %v1870_v0  ;;  %v1881_v11 = vld [vmem:[#allocation5 + $0x538] sm:$0xff]  ;;  %v1778_v58 = vrot.slane %v2689_v55, %v3861_v14 }
 0x78a   :  { %v3185_v63 = vpack.c.bf16 %v1877_v60, %v1875_v59  ;;  %v1782_v59 = vrot.slane %v2689_v55, %v3864_v7  ;;  %v2707_v55 = vld [vmem:[%s4367_s16 + $0x4] sm:$0x3] }
 0x78b   :  { %v1749_v5 = vmul.f32 %v4160_v3, %v4160_v3  ;;  %v1750_v6 = vmul.f32 %v4162_v4, %v4162_v4  ;;  %3184 = vmatpush1.bf16.msra.mxu0 %v3183_v62 }
 0x78c   :  { %3186 = vmatprep.subr.bf16.mxu0 %v3185_v63 }
 0x78d   :  { %v1751_v8 = vsel %vm1054_vm5, %v1749_v5, 0.0  ;;  %v1752_v10 = vsel %vm1054_vm5, %v1750_v6, 0.0  ;;  %v3187_v5 = vpack.c.bf16 %v1876_v1, %v1874_v61  ;;  %v3189_v6 = vpack.c.bf16 %v1881_v11, %v1879_v2 }
 0x78e   :  { %v1753_v12 = vadd.f32 %v1752_v10, %v1751_v8  ;;  %v1878_v8 = vld [vmem:[#allocation5 + $0x520] sm:$0xff]  ;;  %v1880_v10 = vld [vmem:[#allocation5 + $0x530] sm:$0xff] }
 0x78f   :  { %3188 = vmatpush1.bf16.msra.mxu0 %v3187_v5  ;;  %v3191_v16 = vpack.c.bf16 %v1880_v10, %v1878_v8 }
 0x790   :  { %1754 = vadd.xlane.f32.xlu1 %v1753_v12  ;;  %v1883_v12 = vld [vmem:[#allocation5 + $0x548] sm:$0xff]  ;;  %3190 = vmatprep.subr.bf16.mxu0 %v3189_v6 }
 0x791   :  { %v3193_v17 = vpack.c.bf16 %v1885_v13, %v1883_v12 }
 0x793   :  { %3192 = vmatpush1.bf16.msra.mxu0 %v3191_v16 }
 0x794   :  { %3194 = vmatprep.subr.bf16.mxu0 %v3193_v17 }
 0x797   :  { %3196 = vmatpush1.bf16.msra.mxu0 %v3195_v27 }
 0x798   :  { %3198 = vmatprep.subr.bf16.mxu0 %v3197_v28 }
 0x79b   :  { %3200 = vmatpush1.bf16.msra.mxu0 %v3199_v51 }
 0x79c   :  { %3202 = vmatprep.subr.bf16.mxu0 %v3201_v15 }
 0x79f   :  { %3204 = vmatpush1.bf16.msra.mxu0 %v3203_v34 }
 0x7a0   :  { %3206 = vmatprep.subr.bf16.mxu0 %v3205_v35 }
 0x7a3   :  { %3208 = vmatpush1.bf16.msra.mxu0 %v3207_v21 }
 0x7a4   :  { %3210 = vmatprep.subr.bf16.mxu0 %v3209_v40 }
 0x7a7   :  { %3212 = vmatpush1.bf16.msra.mxu0 %v3211_v46 }
 0x7a8   :  { %3214 = vmatprep.subr.bf16.mxu0 %v3213_v48 }
 0x7ab   :  { %3216 = vmatpush1.bf16.msra.mxu0 %v3215_v25 }
 0x81d   :  { %v1755_v52 = vpop.xlane.xlu1 %1754 }
 0x81e   :  { %v1756_v53 = vmul.f32 0.00390625, %v1755_v52 }
 0x820   :  { %v1757_v9 = vadd.f32 1e-05, %v1756_v53 }
 0x822   :  { %3395 = vrsqrt.f32 %v1757_v9 }
 0x82c   :  { %v3396_v56 = vpop.eup %3395 }
 0x82d   :  { %v1759_v57 = vmul.f32 %v3396_v56, %v4160_v3  ;;  %v1760_v0 = vmul.f32 %v3396_v56, %v4162_v4 }
 0x82f   :  { %v1773_v60 = vmul.f32 %v1769_v42, %v1760_v0  ;;  %v1772_v62 = vmul.f32 %v1765_v41, %v1759_v57  ;;  %v2071_v41 = vrot.slane %v2707_v55, %v3861_v14  ;;  %v2075_v42 = vrot.slane %v2707_v55, %v3864_v7 }
 0x831   :  { %v1786_v63 = vadd.f32 %v1782_v59, %v1773_v60  ;;  %v1785_v61 = vadd.f32 %v1778_v58, %v1772_v62 }
 0x833   :  { %v1790_v1 = vmul.f32 0.70710677, %v1786_v63  ;;  %v1789_v2 = vmul.f32 0.70710677, %v1785_v61  ;;  %v1788_v49 = vmul.f32 0.5, %v1786_v63  ;;  %v1787_v52 = vmul.f32 0.5, %v1785_v61 }
 0x835   :  { %v1792_v11 = vand.u32 2147483647, %v1790_v1  ;;  %v1791_v5 = vand.u32 2147483647, %v1789_v2  ;;  %vm1832_vm11 = vcmp.lt.f32.partialorder %v1790_v1, 0.0  ;;  %vm1831_vm12 = vcmp.lt.f32.partialorder %v1789_v2, 0.0 }
 0x837   :  { %v1794_v6 = vmul.f32 0.3275911, %v1792_v11  ;;  %v1793_v8 = vmul.f32 0.3275911, %v1791_v5  ;;  %v1820_v3 = vsub.f32 0.0, %v1792_v11  ;;  %v1819_v4 = vsub.f32 0.0, %v1791_v5 }
 0x839   :  { %v1796_v10 = vadd.f32 1.0, %v1794_v6  ;;  %v1795_v12 = vadd.f32 1.0, %v1793_v8  ;;  %v1822_v16 = vmul.f32 %v1820_v3, %v1792_v11  ;;  %v1821_v23 = vmul.f32 %v1819_v4, %v1791_v5  ;;  %v2188_v3 = vld [vmem:[#allocation5 + $0x618] sm:$0xff] }
 0x83b   :  { %3397 = vrcp.f32 %v1796_v10  ;;  %v1825_v27 = vmul.f32 1.442695, %v1822_v16  ;;  %v1823_v30 = vmul.f32 1.442695, %v1821_v23  ;;  %v2187_v16 = vld [vmem:[#allocation5 + $0x610] sm:$0xff]  ;;  %v2192_v23 = vld [vmem:[#allocation5 + $0x638] sm:$0xff] }
 0x83c   :  { %3399 = vrcp.f32 %v1795_v12  ;;  %v2186_v12 = vld [vmem:[#allocation5 + $0x608] sm:$0xff] }
 0x83d   :  { %3401 = vpow2.f32 %v1825_v27  ;;  %v3233_v4 = vpack.c.bf16 %v2188_v3, %v2186_v12  ;;  %v2191_v27 = vld [vmem:[#allocation5 + $0x630] sm:$0xff]  ;;  %v2228_v12 = vld [vmem:[#allocation5 + $0x758] sm:$0xff] }
 0x83e   :  { %3403 = vpow2.f32 %v1823_v30  ;;  %v2196_v30 = vld [vmem:[#allocation5 + $0x658] sm:$0xff] }
 0x83f   :  { %3234 = vmatprep.subr.bf16.mxu1 %v3233_v4 }
 0x845   :  { %v3398_v13 = vpop.eup %3397 }
 0x846   :  { %v3400_v17 = vpop.eup %3399  ;;  %v1802_v19 = vmul.f32 1.0614054, %v3398_v13 }
 0x847   :  { %v1801_v24 = vmul.f32 1.0614054, %v3400_v17  ;;  %v3402_v38 = vpop.eup %3401 }
 0x848   :  { %v1804_v26 = vadd.f32 -1.4531521, %v1802_v19  ;;  %v3404_v21 = vpop.eup %3403  ;;  %v2190_v19 = vld [vmem:[#allocation5 + $0x628] sm:$0xff] }
 0x849   :  { %v1803_v28 = vadd.f32 -1.4531521, %v1801_v24  ;;  %v3237_v24 = vpack.c.bf16 %v2192_v23, %v2190_v19  ;;  %v2232_v19 = vld [vmem:[#allocation5 + $0x778] sm:$0xff] }
 0x84a   :  { %v1806_v29 = vmul.f32 %v3398_v13, %v1804_v26  ;;  %v2189_v26 = vld [vmem:[#allocation5 + $0x620] sm:$0xff] }
 0x84b   :  { %v1805_v31 = vmul.f32 %v3400_v17, %v1803_v28  ;;  %v3239_v28 = vpack.c.bf16 %v2191_v27, %v2189_v26  ;;  %v2229_v26 = vld [vmem:[#allocation5 + $0x760] sm:$0xff]  ;;  %v2231_v27 = vld [vmem:[#allocation5 + $0x770] sm:$0xff] }
 0x84c   :  { %v1808_v32 = vadd.f32 1.4214138, %v1806_v29  ;;  %v2194_v29 = vld [vmem:[#allocation5 + $0x648] sm:$0xff] }
 0x84d   :  { %v1807_v51 = vadd.f32 1.4214138, %v1805_v31  ;;  %v3241_v31 = vpack.c.bf16 %v2196_v30, %v2194_v29  ;;  %v2236_v29 = vld [vmem:[#allocation5 + $0x798] sm:$0xff]  ;;  %v3279_v30 = vpack.c.bf16 %v2231_v27, %v2229_v26 }
 0x84e   :  { %v1810_v15 = vmul.f32 %v3398_v13, %v1808_v32  ;;  %v2193_v32 = vld [vmem:[#allocation5 + $0x640] sm:$0xff] }
 0x84f   :  { %v1809_v33 = vmul.f32 %v3400_v17, %v1807_v51  ;;  %v2195_v51 = vld [vmem:[#allocation5 + $0x650] sm:$0xff] }
 0x850   :  { %v1812_v20 = vadd.f32 -0.28449672, %v1810_v15  ;;  %v3243_v15 = vpack.c.bf16 %v2195_v51, %v2193_v32  ;;  %v2233_v32 = vld [vmem:[#allocation5 + $0x780] sm:$0xff]  ;;  %v2235_v51 = vld [vmem:[#allocation5 + $0x790] sm:$0xff] }
 0x851   :  { %v1811_v22 = vadd.f32 -0.28449672, %v1809_v33  ;;  %v2198_v33 = vld [vmem:[#allocation5 + $0x668] sm:$0xff] }
 0x852   :  { %v1814_v47 = vmul.f32 %v3398_v13, %v1812_v20  ;;  %v2200_v20 = vld [vmem:[#allocation5 + $0x678] sm:$0xff] }
 0x853   :  { %v1813_v34 = vmul.f32 %v3400_v17, %v1811_v22  ;;  %v2197_v22 = vld [vmem:[#allocation5 + $0x660] sm:$0xff] }
 0x854   :  { %v1816_v35 = vadd.f32 0.2548296, %v1814_v47  ;;  %v3245_v47 = vpack.c.bf16 %v2200_v20, %v2198_v33  ;;  %v2240_v33 = vld [vmem:[#allocation5 + $0x7b8] sm:$0xff]  ;;  %v3283_v20 = vpack.c.bf16 %v2235_v51, %v2233_v32 }
 0x855   :  { %v1815_v36 = vadd.f32 0.2548296, %v1813_v34  ;;  %v2199_v34 = vld [vmem:[#allocation5 + $0x670] sm:$0xff] }
 0x856   :  { %v1818_v37 = vmul.f32 %v3398_v13, %v1816_v35  ;;  %v2185_v13 = vld [vmem:[#allocation5 + $0x600] sm:$0xff]  ;;  %v2202_v35 = vld [vmem:[#allocation5 + $0x688] sm:$0xff] }
 0x857   :  { %v1817_v39 = vmul.f32 %v3400_v17, %v1815_v36  ;;  %v3235_v17 = vpack.c.bf16 %v2187_v16, %v2185_v13  ;;  %v2204_v36 = vld [vmem:[#allocation5 + $0x698] sm:$0xff]  ;;  %v2225_v13 = vld [vmem:[#allocation5 + $0x740] sm:$0xff]  ;;  %v2227_v16 = vld [vmem:[#allocation5 + $0x750] sm:$0xff] }
 0x858   :  { %v1828_v40 = vmul.f32 %v3402_v38, %v1818_v37  ;;  %v3247_v37 = vpack.c.bf16 %v2199_v34, %v2197_v22  ;;  %v3249_v38 = vpack.c.bf16 %v2204_v36, %v2202_v35  ;;  %v3275_v23 = vpack.c.bf16 %v2227_v16, %v2225_v13  ;;  %v2239_v34 = vld [vmem:[#allocation5 + $0x7b0] sm:$0xff]  ;;  %v2242_v35 = vld [vmem:[#allocation5 + $0x7c8] sm:$0xff]  ;;  %v2244_v36 = vld [vmem:[#allocation5 + $0x7d8] sm:$0xff] }
 0x859   :  { %v1827_v18 = vmul.f32 %v3404_v21, %v1817_v39  ;;  %3236 = vmatpush1.bf16.msra.mxu1 %v3235_v17  ;;  %v2201_v39 = vld [vmem:[#allocation5 + $0x680] sm:$0xff]  ;;  %v2203_v21 = vld [vmem:[#allocation5 + $0x690] sm:$0xff]  ;;  %v2230_v17 = vld [vmem:[#allocation5 + $0x768] sm:$0xff] }
 0x85a   :  { %v1830_v43 = vsub.f32 1.0, %v1828_v40  ;;  %3238 = vmatprep.subr.bf16.mxu1 %v3237_v24  ;;  %v2206_v40 = vld [vmem:[#allocation5 + $0x6a8] sm:$0xff]  ;;  %v3277_v24 = vpack.c.bf16 %v2232_v19, %v2230_v17 }
 0x85b   :  { %v1829_v44 = vsub.f32 1.0, %v1827_v18  ;;  %v2208_v18 = vld [vmem:[#allocation5 + $0x6b8] sm:$0xff] }
 0x85c   :  { %v1834_v45 = vsub.f32 0.0, %v1830_v43 }
 0x85d   :  { %v1833_v46 = vsub.f32 0.0, %v1829_v44  ;;  %3240 = vmatpush1.bf16.msra.mxu1 %v3239_v28  ;;  %v2234_v28 = vld [vmem:[#allocation5 + $0x788] sm:$0xff] }
 0x85e   :  { %v1836_v48 = vsel %vm1832_vm11, %v1834_v45, %v1830_v43  ;;  %3242 = vmatprep.subr.bf16.mxu1 %v3241_v31  ;;  %v3251_v43 = vpack.c.bf16 %v2203_v21, %v2201_v39  ;;  %v2205_v45 = vld [vmem:[#allocation5 + $0x6a0] sm:$0xff]  ;;  %v3281_v31 = vpack.c.bf16 %v2236_v29, %v2234_v28  ;;  %v2243_v21 = vld [vmem:[#allocation5 + $0x7d0] sm:$0xff] }
 0x85f   :  { %v1838_v50 = vadd.f32 1.0, %v1836_v48  ;;  %v1835_v25 = vsel %vm1831_vm12, %v1833_v46, %v1829_v44  ;;  %v3253_v44 = vpack.c.bf16 %v2208_v18, %v2206_v40  ;;  %v2207_v46 = vld [vmem:[#allocation5 + $0x6b0] sm:$0xff]  ;;  %v2210_v48 = vld [vmem:[#allocation5 + $0x6c8] sm:$0xff]  ;;  %v2241_v39 = vld [vmem:[#allocation5 + $0x7c0] sm:$0xff] }
 0x860   :  { %v1837_v53 = vadd.f32 1.0, %v1835_v25  ;;  %v2246_v40 = vld [vmem:[#allocation5 + $0x7e8] sm:$0xff]  ;;  %v2248_v18 = vld [vmem:[#allocation5 + $0x7f8] sm:$0xff] }
 0x861   :  { %v1840_v9 = vmul.f32 %v1838_v50, %v1788_v49  ;;  %3244 = vmatpush1.bf16.msra.mxu1 %v3243_v15  ;;  %v2212_v49 = vld [vmem:[#allocation5 + $0x6d8] sm:$0xff]  ;;  %v3255_v50 = vpack.c.bf16 %v2207_v46, %v2205_v45  ;;  %v2238_v15 = vld [vmem:[#allocation5 + $0x7a8] sm:$0xff]  ;;  %v2245_v45 = vld [vmem:[#allocation5 + $0x7e0] sm:$0xff] }
 0x862   :  { %v1839_v54 = vmul.f32 %v1837_v53, %v1787_v52  ;;  %3246 = vmatprep.subr.bf16.mxu1 %v3245_v47  ;;  %v3257_v25 = vpack.c.bf16 %v2212_v49, %v2210_v48  ;;  %v2209_v52 = vld [vmem:[#allocation5 + $0x6c0] sm:$0xff]  ;;  %v2211_v53 = vld [vmem:[#allocation5 + $0x6d0] sm:$0xff]  ;;  %v3285_v22 = vpack.c.bf16 %v2240_v33, %v2238_v15 }
 0x863   :  { %2058 = vmatprep.mubr.f32.mxu0 %v1840_v9  ;;  %v2214_v9 = vld [vmem:[#allocation5 + $0x6e8] sm:$0xff]  ;;  %v3259_v55 = vpack.c.bf16 %v2211_v53, %v2209_v52  ;;  %v2237_v47 = vld [vmem:[#allocation5 + $0x7a0] sm:$0xff]  ;;  %v2247_v46 = vld [vmem:[#allocation5 + $0x7f0] sm:$0xff] }
 0x864   :  { %2059 = vmatmul.mubr.f32.vlgmr.msra.gmra.mrb[4].mxu0 %v1839_v54  ;;  %v2216_v54 = vld [vmem:[#allocation5 + $0x6f8] sm:$0xff]  ;;  %v3295_v48 = vpack.c.bf16 %v2247_v46, %v2245_v45  ;;  %v2708_v52 = vld [vmem:[%s4368_s17 + $0x4] sm:$0x3] }
 0x865   :  { %3248 = vmatpush1.bf16.msra.mxu1 %v3247_v37  ;;  %v3287_v37 = vpack.c.bf16 %v2239_v34, %v2237_v47  ;;  %v2709_v53 = vld [vmem:[%s4369_s18 + $0x4] sm:$0x3] }
 0x866   :  { %3250 = vmatprep.subr.bf16.mxu1 %v3249_v38  ;;  %v3289_v38 = vpack.c.bf16 %v2244_v36, %v2242_v35 }
 0x869   :  { %3252 = vmatpush1.bf16.msra.mxu1 %v3251_v43  ;;  %v3291_v43 = vpack.c.bf16 %v2243_v21, %v2241_v39 }
 0x86a   :  { %3254 = vmatprep.subr.bf16.mxu1 %v3253_v44  ;;  %v3293_v44 = vpack.c.bf16 %v2248_v18, %v2246_v40 }
 0x86d   :  { %3256 = vmatpush1.bf16.msra.mxu1 %v3255_v50 }
 0x86e   :  { %3258 = vmatprep.subr.bf16.mxu1 %v3257_v25 }
 0x871   :  { %3260 = vmatpush1.bf16.msra.mxu1 %v3259_v55 }
 0x937   :  { %v2060_v56 = vpop.f32.mrb[4].mxu0 }
 0x938   :  { %v2078_v57 = vadd.f32 %v2071_v41, %v2060_v56  ;;  %v2062_v0 = vpop.f32.mrb[5].mxu0  ;;  %v3261_v41 = vpack.c.bf16 %v2216_v54, %v2214_v9  ;;  %v2215_v56 = vld [vmem:[#allocation5 + $0x6f0] sm:$0xff]  ;;  %v2108_v9 = vrot.slane %v2708_v52, %v3861_v14  ;;  %v2112_v54 = vrot.slane %v2708_v52, %v3864_v7 }
 0x939   :  { %v2079_v58 = vadd.f32 %v2075_v42, %v2062_v0  ;;  %v2213_v42 = vld [vmem:[#allocation5 + $0x6e0] sm:$0xff]  ;;  %v2220_v0 = vld [vmem:[#allocation5 + $0x718] sm:$0xff] }
 0x93a   :  { %v2084_v59 = vsel %vm1054_vm5, %v2078_v57, 0.0  ;;  %3262 = vmatprep.subr.bf16.mxu1 %v3261_v41 }
 0x93b   :  { %v2085_v60 = vsel %vm1054_vm5, %v2079_v58, 0.0 }
 0x93c   :  { %v2086_v62 = vadd.f32 %v2085_v60, %v2084_v59  ;;  %v2217_v60 = vld [vmem:[#allocation5 + $0x700] sm:$0xff] }
 0x93e   :  { %2087 = vadd.xlane.f32.xlu1 %v2086_v62  ;;  %v2219_v62 = vld [vmem:[#allocation5 + $0x710] sm:$0xff] }
 0x9cb   :  { %v2088_v63 = vpop.xlane.xlu1 %2087 }
 0x9cc   :  { %v2089_v61 = vmul.f32 0.00390625, %v2088_v63  ;;  %v2222_v63 = vld [vmem:[#allocation5 + $0x728] sm:$0xff] }
 0x9ce   :  { %v4189_v1 = vsub.f32 %v2078_v57, %v2089_v61  ;;  %v4191_v2 = vsub.f32 %v2079_v58, %v2089_v61  ;;  %v2218_v57 = vld [vmem:[#allocation5 + $0x708] sm:$0xff]  ;;  %v3263_v58 = vpack.c.bf16 %v2215_v56, %v2213_v42  ;;  %v2224_v61 = vld [vmem:[#allocation5 + $0x738] sm:$0xff]  ;;  %v2121_v56 = vrot.slane %v2709_v53, %v3861_v14 }
 0x9cf   :  { %v3265_v59 = vpack.c.bf16 %v2220_v0, %v2218_v57  ;;  %v2125_v57 = vrot.slane %v2709_v53, %v3864_v7  ;;  %v2727_v53 = vld [vmem:[%s4367_s16 + $0x6] sm:$0x3] }
 0x9d0   :  { %v2092_v11 = vmul.f32 %v4189_v1, %v4189_v1  ;;  %v2093_v5 = vmul.f32 %v4191_v2, %v4191_v2  ;;  %3264 = vmatpush1.bf16.msra.mxu1 %v3263_v58 }
 0x9d1   :  { %3266 = vmatprep.subr.bf16.mxu1 %v3265_v59 }
 0x9d2   :  { %v2094_v6 = vsel %vm1054_vm5, %v2092_v11, 0.0  ;;  %v2095_v8 = vsel %vm1054_vm5, %v2093_v5, 0.0  ;;  %v3267_v11 = vpack.c.bf16 %v2219_v62, %v2217_v60  ;;  %v3269_v5 = vpack.c.bf16 %v2224_v61, %v2222_v63 }
 0x9d3   :  { %v2096_v10 = vadd.f32 %v2095_v8, %v2094_v6  ;;  %v2221_v6 = vld [vmem:[#allocation5 + $0x720] sm:$0xff]  ;;  %v2223_v8 = vld [vmem:[#allocation5 + $0x730] sm:$0xff] }
 0x9d4   :  { %3268 = vmatpush1.bf16.msra.mxu1 %v3267_v11  ;;  %v3271_v3 = vpack.c.bf16 %v2223_v8, %v2221_v6 }
 0x9d5   :  { %2097 = vadd.xlane.f32.xlu1 %v2096_v10  ;;  %v2226_v10 = vld [vmem:[#allocation5 + $0x748] sm:$0xff]  ;;  %3270 = vmatprep.subr.bf16.mxu1 %v3269_v5 }
 0x9d6   :  { %v3273_v4 = vpack.c.bf16 %v2228_v12, %v2226_v10 }
 0x9d8   :  { %3272 = vmatpush1.bf16.msra.mxu1 %v3271_v3 }
 0x9d9   :  { %3274 = vmatprep.subr.bf16.mxu1 %v3273_v4 }
 0x9dc   :  { %3276 = vmatpush1.bf16.msra.mxu1 %v3275_v23 }
 0x9dd   :  { %3278 = vmatprep.subr.bf16.mxu1 %v3277_v24 }
 0x9e0   :  { %3280 = vmatpush1.bf16.msra.mxu1 %v3279_v30 }
 0x9e1   :  { %3282 = vmatprep.subr.bf16.mxu1 %v3281_v31 }
 0x9e4   :  { %3284 = vmatpush1.bf16.msra.mxu1 %v3283_v20 }
 0x9e5   :  { %3286 = vmatprep.subr.bf16.mxu1 %v3285_v22 }
 0x9e8   :  { %3288 = vmatpush1.bf16.msra.mxu1 %v3287_v37 }
 0x9e9   :  { %3290 = vmatprep.subr.bf16.mxu1 %v3289_v38 }
 0x9ec   :  { %3292 = vmatpush1.bf16.msra.mxu1 %v3291_v43 }
 0x9ed   :  { %3294 = vmatprep.subr.bf16.mxu1 %v3293_v44 }
 0x9f0   :  { %3296 = vmatpush1.bf16.msra.mxu1 %v3295_v48 }
 0xa62   :  { %v2098_v49 = vpop.xlane.xlu1 %2097 }
 0xa63   :  { %v2099_v50 = vmul.f32 0.00390625, %v2098_v49 }
 0xa65   :  { %v2100_v25 = vadd.f32 1e-05, %v2099_v50 }
 0xa67   :  { %3405 = vrsqrt.f32 %v2100_v25 }
 0xa71   :  { %v3406_v55 = vpop.eup %3405 }
 0xa72   :  { %v2102_v41 = vmul.f32 %v3406_v55, %v4189_v1  ;;  %v2103_v42 = vmul.f32 %v3406_v55, %v4191_v2 }
 0xa74   :  { %v2116_v0 = vmul.f32 %v2112_v54, %v2103_v42  ;;  %v2115_v58 = vmul.f32 %v2108_v9, %v2102_v41  ;;  %v2414_v9 = vrot.slane %v2727_v53, %v3861_v14  ;;  %v2418_v54 = vrot.slane %v2727_v53, %v3864_v7 }
 0xa76   :  { %v2129_v59 = vadd.f32 %v2125_v57, %v2116_v0  ;;  %v2128_v60 = vadd.f32 %v2121_v56, %v2115_v58 }
 0xa78   :  { %v2133_v62 = vmul.f32 0.70710677, %v2129_v59  ;;  %v2132_v63 = vmul.f32 0.70710677, %v2128_v60  ;;  %v2131_v45 = vmul.f32 0.5, %v2129_v59  ;;  %v2130_v49 = vmul.f32 0.5, %v2128_v60 }
 0xa7a   :  { %v2135_v61 = vand.u32 2147483647, %v2133_v62  ;;  %v2134_v11 = vand.u32 2147483647, %v2132_v63  ;;  %vm2175_vm13 = vcmp.lt.f32.partialorder %v2133_v62, 0.0  ;;  %vm2174_vm14 = vcmp.lt.f32.partialorder %v2132_v63, 0.0 }
 0xa7c   :  { %v2137_v5 = vmul.f32 0.3275911, %v2135_v61  ;;  %v2136_v6 = vmul.f32 0.3275911, %v2134_v11  ;;  %v2163_v1 = vsub.f32 0.0, %v2135_v61  ;;  %v2162_v2 = vsub.f32 0.0, %v2134_v11 }
 0xa7e   :  { %v2139_v8 = vadd.f32 1.0, %v2137_v5  ;;  %v2138_v10 = vadd.f32 1.0, %v2136_v6  ;;  %v2165_v3 = vmul.f32 %v2163_v1, %v2135_v61  ;;  %v2164_v16 = vmul.f32 %v2162_v2, %v2134_v11  ;;  %v2544_v1 = vld [vmem:[%s4370_s19 + $0x88] sm:$0xff]  ;;  %v2527_v2 = vld [vmem:[%s4370_s19] sm:$0xff] }
 0xa80   :  { %3407 = vrcp.f32 %v2139_v8  ;;  %v2168_v23 = vmul.f32 1.442695, %v2165_v3  ;;  %v2166_v27 = vmul.f32 1.442695, %v2164_v16  ;;  %v2528_v3 = vld [vmem:[%s4370_s19 + $0x8] sm:$0xff] }
 0xa81   :  { %3409 = vrcp.f32 %v2138_v10  ;;  %v2543_v10 = vld [vmem:[%s4370_s19 + $0x80] sm:$0xff]  ;;  %v3299_v16 = vpack.c.bf16 %v2528_v3, %v2527_v2 }
 0xa82   :  { %3411 = vpow2.f32 %v2168_v23  ;;  %v2530_v23 = vld [vmem:[%s4370_s19 + $0x18] sm:$0xff] }
 0xa83   :  { %3413 = vpow2.f32 %v2166_v27 }
 0xa8a   :  { %v3408_v12 = vpop.eup %3407 }
 0xa8b   :  { %v3410_v4 = vpop.eup %3409  ;;  %v2145_v13 = vmul.f32 1.0614054, %v3408_v12 }
 0xa8c   :  { %v2144_v17 = vmul.f32 1.0614054, %v3410_v4  ;;  %v3412_v35 = vpop.eup %3411 }
 0xa8d   :  { %v2147_v19 = vadd.f32 -1.4531521, %v2145_v13  ;;  %v3414_v37 = vpop.eup %3413  ;;  %v2546_v13 = vld [vmem:[%s4370_s19 + $0x98] sm:$0xff] }
 0xa8e   :  { %v2146_v24 = vadd.f32 -1.4531521, %v2144_v17 }
 0xa8f   :  { %v2149_v26 = vmul.f32 %v3408_v12, %v2147_v19  ;;  %v2529_v19 = vld [vmem:[%s4370_s19 + $0x10] sm:$0xff] }
 0xa90   :  { %v2148_v28 = vmul.f32 %v3410_v4, %v2146_v24  ;;  %v2547_v24 = vld [vmem:[%s4370_s19 + $0xa0] sm:$0xff]  ;;  %v3303_v27 = vpack.c.bf16 %v2530_v23, %v2529_v19 }
 0xa91   :  { %v2151_v29 = vadd.f32 1.4214138, %v2149_v26  ;;  %v2548_v26 = vld [vmem:[%s4370_s19 + $0xa8] sm:$0xff] }
 0xa92   :  { %v2150_v30 = vadd.f32 1.4214138, %v2148_v28  ;;  %v3305_v28 = vpack.c.bf16 %v2548_v26, %v2547_v24 }
 0xa93   :  { %v2153_v31 = vmul.f32 %v3408_v12, %v2151_v29  ;;  %v2531_v29 = vld [vmem:[%s4370_s19 + $0x20] sm:$0xff] }
 0xa94   :  { %v2152_v32 = vmul.f32 %v3410_v4, %v2150_v30  ;;  %v2532_v30 = vld [vmem:[%s4370_s19 + $0x28] sm:$0xff] }
 0xa95   :  { %v2155_v51 = vadd.f32 -0.28449672, %v2153_v31  ;;  %v2549_v31 = vld [vmem:[%s4370_s19 + $0xb0] sm:$0xff] }
 0xa96   :  { %v2154_v15 = vadd.f32 -0.28449672, %v2152_v32  ;;  %v2550_v32 = vld [vmem:[%s4370_s19 + $0xb8] sm:$0xff] }
 0xa97   :  { %v2157_v33 = vmul.f32 %v3408_v12, %v2155_v51  ;;  %v3307_v51 = vpack.c.bf16 %v2532_v30, %v2531_v29 }
 0xa98   :  { %v2156_v20 = vmul.f32 %v3410_v4, %v2154_v15  ;;  %v3309_v15 = vpack.c.bf16 %v2550_v32, %v2549_v31 }
 0xa99   :  { %v2159_v22 = vadd.f32 0.2548296, %v2157_v33  ;;  %v2533_v33 = vld [vmem:[%s4370_s19 + $0x30] sm:$0xff] }
 0xa9a   :  { %v2158_v47 = vadd.f32 0.2548296, %v2156_v20  ;;  %v2534_v20 = vld [vmem:[%s4370_s19 + $0x38] sm:$0xff] }
 0xa9b   :  { %v2161_v34 = vmul.f32 %v3408_v12, %v2159_v22  ;;  %v3297_v12 = vpack.c.bf16 %v2544_v1, %v2543_v10  ;;  %v2551_v22 = vld [vmem:[%s4370_s19 + $0xc0] sm:$0xff] }
 0xa9c   :  { %v2160_v36 = vmul.f32 %v3410_v4, %v2158_v47  ;;  %v2545_v4 = vld [vmem:[%s4370_s19 + $0x90] sm:$0xff]  ;;  %v2552_v47 = vld [vmem:[%s4370_s19 + $0xc8] sm:$0xff] }
 0xa9d   :  { %v2171_v38 = vmul.f32 %v3412_v35, %v2161_v34  ;;  %v3301_v17 = vpack.c.bf16 %v2546_v13, %v2545_v4  ;;  %3298 = vmatprep.subr.bf16.mxu0 %v3297_v12  ;;  %v3311_v34 = vpack.c.bf16 %v2534_v20, %v2533_v33  ;;  %v3313_v35 = vpack.c.bf16 %v2552_v47, %v2551_v22 }
 0xa9e   :  { %v2170_v39 = vmul.f32 %v3414_v37, %v2160_v36  ;;  %3300 = vmatpush3.bf16.msra.mxu0 %v3299_v16  ;;  %v2535_v36 = vld [vmem:[%s4370_s19 + $0x40] sm:$0xff]  ;;  %v2536_v37 = vld [vmem:[%s4370_s19 + $0x48] sm:$0xff] }
 0xa9f   :  { %v2173_v21 = vsub.f32 1.0, %v2171_v38  ;;  %3302 = vmatprep.subr.bf16.mxu0 %v3301_v17  ;;  %v2553_v38 = vld [vmem:[%s4370_s19 + $0xd0] sm:$0xff] }
 0xaa0   :  { %v2172_v40 = vsub.f32 1.0, %v2170_v39  ;;  %v2554_v39 = vld [vmem:[%s4370_s19 + $0xd8] sm:$0xff] }
 0xaa1   :  { %v2177_v18 = vsub.f32 0.0, %v2173_v21 }
 0xaa2   :  { %v2176_v43 = vsub.f32 0.0, %v2172_v40  ;;  %3304 = vmatpush3.bf16.msra.mxu0 %v3303_v27 }
 0xaa3   :  { %v2179_v44 = vsel %vm2175_vm13, %v2177_v18, %v2173_v21  ;;  %3306 = vmatprep.subr.bf16.mxu0 %v3305_v28  ;;  %v3315_v21 = vpack.c.bf16 %v2536_v37, %v2535_v36  ;;  %v2537_v18 = vld [vmem:[%s4370_s19 + $0x50] sm:$0xff] }
 0xaa4   :  { %v2181_v46 = vadd.f32 1.0, %v2179_v44  ;;  %v2178_v48 = vsel %vm2174_vm14, %v2176_v43, %v2172_v40  ;;  %v3317_v40 = vpack.c.bf16 %v2554_v39, %v2553_v38  ;;  %v2538_v43 = vld [vmem:[%s4370_s19 + $0x58] sm:$0xff]  ;;  %v2555_v44 = vld [vmem:[%s4370_s19 + $0xe0] sm:$0xff] }
 0xaa5   :  { %v2180_v50 = vadd.f32 1.0, %v2178_v48 }
 0xaa6   :  { %v2183_v25 = vmul.f32 %v2181_v46, %v2131_v45  ;;  %3308 = vmatpush3.bf16.msra.mxu0 %v3307_v51  ;;  %v2556_v45 = vld [vmem:[%s4370_s19 + $0xe8] sm:$0xff]  ;;  %v3319_v46 = vpack.c.bf16 %v2538_v43, %v2537_v18 }
 0xaa7   :  { %v2182_v52 = vmul.f32 %v2180_v50, %v2130_v49  ;;  %3310 = vmatprep.subr.bf16.mxu0 %v3309_v15  ;;  %v3321_v48 = vpack.c.bf16 %v2556_v45, %v2555_v44  ;;  %v2539_v49 = vld [vmem:[%s4370_s19 + $0x60] sm:$0xff]  ;;  %v2540_v50 = vld [vmem:[%s4370_s19 + $0x68] sm:$0xff] }
 0xaa8   :  { %2401 = vmatprep.mubr.f32.mxu1 %v2183_v25  ;;  %v2557_v25 = vld [vmem:[%s4370_s19 + $0xf0] sm:$0xff]  ;;  %v3323_v53 = vpack.c.bf16 %v2540_v50, %v2539_v49 }
 0xaa9   :  { %2402 = vmatmul.mubr.f32.vlgmr.msra.gmra.mrb[6].mxu1 %v2182_v52  ;;  %v2558_v52 = vld [vmem:[%s4370_s19 + $0xf8] sm:$0xff] }
 0xaaa   :  { %3312 = vmatpush3.bf16.msra.mxu0 %v3311_v34 }
 0xaab   :  { %3314 = vmatprep.subr.bf16.mxu0 %v3313_v35 }
 0xaae   :  { %3316 = vmatpush3.bf16.msra.mxu0 %v3315_v21 }
 0xaaf   :  { %3318 = vmatprep.subr.bf16.mxu0 %v3317_v40 }
 0xab2   :  { %3320 = vmatpush3.bf16.msra.mxu0 %v3319_v46 }
 0xab3   :  { %3322 = vmatprep.subr.bf16.mxu0 %v3321_v48 }
 0xab6   :  { %3324 = vmatpush3.bf16.msra.mxu0 %v3323_v53 }
 0xb7c   :  { %v2403_v55 = vpop.f32.mrb[6].mxu1 }
 0xb7d   :  { %v2421_v41 = vadd.f32 %v2414_v9, %v2403_v55  ;;  %v2405_v42 = vpop.f32.mrb[7].mxu1  ;;  %v3325_v9 = vpack.c.bf16 %v2558_v52, %v2557_v25  ;;  %v2542_v55 = vld [vmem:[%s4370_s19 + $0x78] sm:$0xff] }
 0xb7e   :  { %v2422_v56 = vadd.f32 %v2418_v54, %v2405_v42  ;;  %v2541_v54 = vld [vmem:[%s4370_s19 + $0x70] sm:$0xff]  ;;  %s3510_s19 = smov [#allocation7]  }
 0xb7f   :  { %v2427_v57 = vsel %vm1054_vm5, %v2421_v41, 0.0  ;;  %3326 = vmatprep.subr.bf16.mxu0 %v3325_v9  ;;  %s2644_s29 = sshll.u32 %s3510_s19, 4  ;;  %s2645_s29 = int_to_ptr.vmem [resolvable:$true] %s2644_s29 }
 0xb80   :  { %v2428_v0 = vsel %vm1054_vm5, %v2422_v56, 0.0  ;;  %s3469_s14 = scalar_lea.vmem %s2645_s29, 32  ;;  %p3474_p3 = scmp.lt.s32.totalorder %s2645_s29, %s2645_s29 }
 0xb81   :  { %v2429_v58 = vadd.f32 %v2428_v0, %v2427_v57  ;;  %v2728_v0 = vld [vmem:[%s4368_s17 + $0x6] sm:$0x3]  ;;  %p3470_p2 = scmp.ne.s32.totalorder %s2645_s29, %s3469_s14  ;;  %p3475_p4 = scmp.lt.s32.totalorder %s3469_s14, %s3469_s14 }
 0xb83   :  { %2430 = vadd.xlane.f32.xlu1 %v2429_v58  ;;  %v2729_v58 = vld [vmem:[%s4369_s18 + $0x6] sm:$0x3]  ;;  %p3476_p5 = por %p3475_p4, %p3474_p3 }
 0xb85   :  { %p3477_p6 = pnand %p3476_p5, %p3470_p2 }
 0xc10   :  { %v2431_v59 = vpop.xlane.xlu1 %2430 }
 0xc11   :  { %v2432_v60 = vmul.f32 0.00390625, %v2431_v59  ;;  %v2451_v59 = vrot.slane %v2728_v0, %v3861_v14 }
 0xc13   :  { %v4218_v62 = vsub.f32 %v2421_v41, %v2432_v60  ;;  %v4220_v63 = vsub.f32 %v2422_v56, %v2432_v60  ;;  %v3327_v41 = vpack.c.bf16 %v2542_v55, %v2541_v54  ;;  %v2455_v60 = vrot.slane %v2728_v0, %v3864_v7  ;;  %v2730_v0 = vld [vmem:[%s4371_s20] ss:$0 sm:$0xff] }
 0xc15   :  { %v2435_v61 = vmul.f32 %v4218_v62, %v4218_v62  ;;  %v2436_v11 = vmul.f32 %v4220_v63, %v4220_v63  ;;  %3328 = vmatpush3.bf16.msra.mxu0 %v3327_v41 }
 0xc17   :  { %v2437_v5 = vsel %vm1054_vm5, %v2435_v61, 0.0  ;;  %v2438_v6 = vsel %vm1054_vm5, %v2436_v11, 0.0 }
 0xc18   :  { %v2439_v8 = vadd.f32 %v2438_v6, %v2437_v5  ;;  %v2464_v6 = vrot.slane %v2729_v58, %v3861_v14 }
 0xc1a   :  { %2440 = vadd.xlane.f32.xlu1 %v2439_v8  ;;  %v2468_v8 = vrot.slane %v2729_v58, %v3864_v7 }
 0xca7   :  { %v2441_v42 = vpop.xlane.xlu1 %2440 }
 0xca8   :  { %v2442_v56 = vmul.f32 0.00390625, %v2441_v42 }
 0xcaa   :  { %v2443_v57 = vadd.f32 1e-05, %v2442_v56 }
 0xcac   :  { %3415 = vrsqrt.f32 %v2443_v57 }
 0xcb6   :  { %v3416_v61 = vpop.eup %3415 }
 0xcb7   :  { %v2445_v11 = vmul.f32 %v3416_v61, %v4218_v62  ;;  %v2446_v5 = vmul.f32 %v3416_v61, %v4220_v63 }
 0xcb9   :  { %v2459_v10 = vmul.f32 %v2455_v60, %v2446_v5  ;;  %v2458_v1 = vmul.f32 %v2451_v59, %v2445_v11 }
 0xcbb   :  { %v2472_v2 = vadd.f32 %v2468_v8, %v2459_v10  ;;  %v2471_v12 = vadd.f32 %v2464_v6, %v2458_v1 }
 0xcbd   :  { %v2476_v3 = vmul.f32 0.70710677, %v2472_v2  ;;  %v2475_v4 = vmul.f32 0.70710677, %v2471_v12  ;;  %v2474_v53 = vmul.f32 0.5, %v2472_v2  ;;  %v2473_v55 = vmul.f32 0.5, %v2471_v12 }
 0xcbf   :  { %v2478_v13 = vand.u32 2147483647, %v2476_v3  ;;  %v2477_v16 = vand.u32 2147483647, %v2475_v4  ;;  %vm2518_vm15 = vcmp.lt.f32.partialorder %v2476_v3, 0.0  ;;  %vm2517_vm0 = vcmp.lt.f32.partialorder %v2475_v4, 0.0 }
 0xcc1   :  { %v2480_v17 = vmul.f32 0.3275911, %v2478_v13  ;;  %v2479_v19 = vmul.f32 0.3275911, %v2477_v16  ;;  %v2506_v62 = vsub.f32 0.0, %v2478_v13  ;;  %v2505_v63 = vsub.f32 0.0, %v2477_v16 }
 0xcc3   :  { %v2482_v23 = vadd.f32 1.0, %v2480_v17  ;;  %v2481_v24 = vadd.f32 1.0, %v2479_v19  ;;  %v2508_v14 = vmul.f32 %v2506_v62, %v2478_v13  ;;  %v2507_v28 = vmul.f32 %v2505_v63, %v2477_v16 }
 0xcc5   :  { %3417 = vrcp.f32 %v2482_v23  ;;  %v2511_v31 = vmul.f32 1.442695, %v2508_v14  ;;  %v2509_v15 = vmul.f32 1.442695, %v2507_v28 }
 0xcc6   :  { %3419 = vrcp.f32 %v2481_v24 }
 0xcc7   :  { %3421 = vpow2.f32 %v2511_v31 }
 0xcc8   :  { %3423 = vpow2.f32 %v2509_v15 }
 0xccf   :  { %v3418_v26 = vpop.eup %3417 }
 0xcd0   :  { %v3420_v27 = vpop.eup %3419  ;;  %v2488_v7 = vmul.f32 1.0614054, %v3418_v26 }
 0xcd1   :  { %v2487_v29 = vmul.f32 1.0614054, %v3420_v27  ;;  %v3422_v18 = vpop.eup %3421 }
 0xcd2   :  { %v2490_v30 = vadd.f32 -1.4531521, %v2488_v7  ;;  %v3424_v44 = vpop.eup %3423 }
 0xcd3   :  { %v2489_v32 = vadd.f32 -1.4531521, %v2487_v29 }
 0xcd4   :  { %v2492_v51 = vmul.f32 %v3418_v26, %v2490_v30 }
 0xcd5   :  { %v2491_v33 = vmul.f32 %v3420_v27, %v2489_v32 }
 0xcd6   :  { %v2494_v20 = vadd.f32 1.4214138, %v2492_v51 }
 0xcd7   :  { %v2493_v22 = vadd.f32 1.4214138, %v2491_v33 }
 0xcd8   :  { %v2496_v47 = vmul.f32 %v3418_v26, %v2494_v20 }
 0xcd9   :  { %v2495_v34 = vmul.f32 %v3420_v27, %v2493_v22 }
 0xcda   :  { %v2498_v35 = vadd.f32 -0.28449672, %v2496_v47 }
 0xcdb   :  { %v2497_v36 = vadd.f32 -0.28449672, %v2495_v34 }
 0xcdc   :  { %v2500_v37 = vmul.f32 %v3418_v26, %v2498_v35 }
 0xcdd   :  { %v2499_v38 = vmul.f32 %v3420_v27, %v2497_v36 }
 0xcde   :  { %v2502_v39 = vadd.f32 0.2548296, %v2500_v37 }
 0xcdf   :  { %v2501_v21 = vadd.f32 0.2548296, %v2499_v38 }
 0xce0   :  { %v2504_v40 = vmul.f32 %v3418_v26, %v2502_v39 }
 0xce1   :  { %v2503_v43 = vmul.f32 %v3420_v27, %v2501_v21 }
 0xce2   :  { %v2514_v45 = vmul.f32 %v3422_v18, %v2504_v40 }
 0xce3   :  { %v2513_v46 = vmul.f32 %v3424_v44, %v2503_v43 }
 0xce4   :  { %v2516_v48 = vsub.f32 1.0, %v2514_v45 }
 0xce5   :  { %v2515_v49 = vsub.f32 1.0, %v2513_v46 }
 0xce6   :  { %v2520_v50 = vsub.f32 0.0, %v2516_v48 }
 0xce7   :  { %v2519_v25 = vsub.f32 0.0, %v2515_v49 }
 0xce8   :  { %v2522_v52 = vsel %vm2518_vm15, %v2520_v50, %v2516_v48 }
 0xce9   :  { %v2524_v9 = vadd.f32 1.0, %v2522_v52  ;;  %v2521_v54 = vsel %vm2517_vm0, %v2519_v25, %v2515_v49 }
 0xcea   :  { %v2523_v41 = vadd.f32 1.0, %v2521_v54 }
 0xceb   :  { %v2526_v42 = vmul.f32 %v2524_v9, %v2474_v53 }
 0xcec   :  { %v2525_v56 = vmul.f32 %v2523_v41, %v2473_v55 }
 0xced   :  { %2630 = vmatprep.mubr.f32.mxu0 %v2526_v42 }
 0xcee   :  { %2631 = vmatmul.mubr.f32.vlgmr.msra.gmra.mrb[6].mxu0 %v2525_v56 }
 0xdc1   :  { %v2798_v57 = vpop.f32.mrb[6].mxu0 }
 0xdc2   :  { %v2799_v58 = vpop.f32.mrb[7].mxu0 }
 0xdc3   :  { %v2800_v59 = vadd.f32 %v2799_v58, %v2798_v57 }
 0xdc5   :  { %v2633_v60 = vadd.f32 %v2800_v59, %v2730_v0 }
 0xdc7   :  { %2637 = vst.msk [vmem:[#allocation7] sm:$0x3] %vm2636_vm1, %v2633_v60 }
 0xdc8   :  { %3480 = shalt.err (!%p3477_p6)
}
 0xdc9   :  { %s3481_s13 = scalar_lea.hbm %s4372_s21, 32 }
 0xdca   :  { %p3482_p7 = scmp.ne.s32.totalorder %s4372_s21, %s3481_s13  ;;  %p3485_p8 = scmp.lt.u32.totalorder %s3481_s13, %s4372_s21 }
 0xdcc   :  { %p3487_p9 = pnand %p3485_p8, %p3482_p7 }
 0xdce   :  { %3490 = shalt.err (!%p3487_p9)
}
 0xdcf   :  { %2647 = dma.vmem_to_hbm [thread:$0]  %s2645_s29, 32, %s4372_s21, [#allocation4]  }
 0xdd0   :  { %3495 = dma.done.wait [#allocation4], 32  }
 0xdd1   :  { %3496 = vsyncadd [#allocation4], 4294967264 }
 0xdd2   :  { %2651 = vsyncpa [#allocation3], 1 }
 0xdd3   :  { %2652 = vsyncpa [#allocation6], 1 }
 0xdd4   :  { %2653 = vsyncpa [#allocation4], 1 }

</bundles_post_ra>
